<compile_context>
chip_gen: v7x
topology: tpu7x:2x2x1
jax: 0.10.0
libtpu: 0.0.40
codegen_flags: <defaults>
</compile_context>

<pallas_src>
import jax
import jax.numpy as jnp
import numpy as np
from jax.experimental import pallas as pl
from jax.experimental.pallas import tpu as pltpu

# dtype fed to the MXU (accumulation is always f32). bf16 is the fast path on
# v6e/v7x; use jnp.float32 for bit-exact f32 math (e.g. on v5e).
MXU_DTYPE = jnp.bfloat16


# ---------------------------------------------------------------------------
# small tiling helpers
# ---------------------------------------------------------------------------
def _row_tile(n, cap=512):
    """Row-tile size for the GEMM kernels: whole array if small, else a
    multiple-of-8 divisor <= cap (keeps the (8,128) block constraint)."""
    if n <= cap:
        return n
    for t in range(cap - cap % 8, 7, -8):
        if n % t == 0:
            return t
    return n


def _time_chunk(t, cap=16):
    """Largest divisor of T that is <= cap (steps unrolled per grid step)."""
    c = min(t, cap)
    while t % c:
        c -= 1
    return c


# ---------------------------------------------------------------------------
# Input-projection kernels (hoisted out of the recurrence).
# One fused GEMM over all rows (T*B), all 3 gates and both directions (6H).
# ---------------------------------------------------------------------------
def inproj1_kernel(x_ref, w_ref, b_ref, of_ref, ob_ref):
    # x: (tm, Din) f32, w: (Din, 6H) bf16, b: (1, 6H) f32 (b_ih + b_hh[r,z] folded)
    y = jnp.dot(x_ref[...].astype(MXU_DTYPE), w_ref[...],
                preferred_element_type=jnp.float32) + b_ref[...]
    g = of_ref.shape[-1]                 # 3H
    of_ref[...] = y[:, :g]               # forward-direction gates
    ob_ref[...] = y[:, g:]               # backward-direction gates


def inproj1_pallas(x, w, b):
    R, K = x.shape
    G6 = w.shape[1]
    G3 = G6 // 2
    tm = _row_tile(R)
    return pl.pallas_call(
        inproj1_kernel,
        out_shape=(jax.ShapeDtypeStruct((R, G3), jnp.float32),
                   jax.ShapeDtypeStruct((R, G3), jnp.float32)),
        grid_spec=pltpu.PrefetchScalarGridSpec(
            num_scalar_prefetch=0,
            grid=(R // tm,),
            in_specs=[pl.BlockSpec((tm, K), lambda i: (i, 0)),
                      pl.BlockSpec((K, G6), lambda i: (0, 0)),
                      pl.BlockSpec((1, G6), lambda i: (0, 0))],
            out_specs=[pl.BlockSpec((tm, G3), lambda i: (i, 0)),
                       pl.BlockSpec((tm, G3), lambda i: (i, 0))],
        ),
        compiler_params=pltpu.CompilerParams(dimension_semantics=("parallel",)),
    )(x, w, b)


def inproj2_kernel(xa_ref, xb_ref, wa_ref, wb_ref, b_ref, of_ref, ob_ref):
    # Layer>=1 projection: consumes the previous layer's fwd/bwd halves
    # separately (split-K), so the concat(hf, hb) is never materialized.
    y = (jnp.dot(xa_ref[...].astype(MXU_DTYPE), wa_ref[...],
                 preferred_element_type=jnp.float32)
         + jnp.dot(xb_ref[...].astype(MXU_DTYPE), wb_ref[...],
                   preferred_element_type=jnp.float32)
         + b_ref[...])
    g = of_ref.shape[-1]
    of_ref[...] = y[:, :g]
    ob_ref[...] = y[:, g:]


def inproj2_pallas(xa, xb, wa, wb, b):
    R, K = xa.shape
    G6 = wa.shape[1]
    G3 = G6 // 2
    tm = _row_tile(R)
    row_spec = pl.BlockSpec((tm, K), lambda i: (i, 0))
    w_spec = pl.BlockSpec((K, G6), lambda i: (0, 0))
    o_spec = pl.BlockSpec((tm, G3), lambda i: (i, 0))
    return pl.pallas_call(
        inproj2_kernel,
        out_shape=(jax.ShapeDtypeStruct((R, G3), jnp.float32),
                   jax.ShapeDtypeStruct((R, G3), jnp.float32)),
        grid_spec=pltpu.PrefetchScalarGridSpec(
            num_scalar_prefetch=0,
            grid=(R // tm,),
            in_specs=[row_spec, row_spec, w_spec, w_spec,
                      pl.BlockSpec((1, G6), lambda i: (0, 0))],
            out_specs=[o_spec, o_spec],
        ),
        compiler_params=pltpu.CompilerParams(dimension_semantics=("parallel",)),
    )(xa, xb, wa, wb, b)


# ---------------------------------------------------------------------------
# GRU recurrence kernel: one grid step == one chunk of Tc time steps,
# all 4 independent streams (rnn1-fwd, rnn1-bwd, rnn2-fwd, rnn2-bwd) updated
# per step.  Backward streams read/write reversed time blocks (index_map) and
# iterate the chunk in reverse, so their outputs land time-aligned.
# ---------------------------------------------------------------------------
def gru_rec_kernel(gi1f_ref, gi1b_ref, gi2f_ref, gi2b_ref, whh_ref, bhh_ref,
                   o1f_ref, o1b_ref, o2f_ref, o2b_ref, h_scr):
    @pl.when(pl.program_id(0) == 0)
    def _init():
        h_scr[...] = jnp.zeros_like(h_scr)

    Tc = o1f_ref.shape[0]
    H = o1f_ref.shape[2]
    streams = ((0, gi1f_ref, o1f_ref, False),
               (1, gi1b_ref, o1b_ref, True),
               (2, gi2f_ref, o2f_ref, False),
               (3, gi2b_ref, o2b_ref, True))

    # Statically unrolled chunk loop (Tc is small) -> full LLO visibility.
    for s in range(Tc):
        for d, gi_ref, o_ref, rev in streams:
            t = (Tc - 1 - s) if rev else s
            gi = gi_ref[t]                       # (B, 3H) f32 (bias pre-added)
            h = h_scr[d]                         # (B, H)  f32
            # single fused 3-gate recurrent matmul per stream per step
            gh = jnp.dot(h.astype(MXU_DTYPE), whh_ref[d],
                         preferred_element_type=jnp.float32) + bhh_ref[d]
            r = jax.nn.sigmoid(gi[:, :H] + gh[:, :H])
            z = jax.nn.sigmoid(gi[:, H:2 * H] + gh[:, H:2 * H])
            n = jnp.tanh(gi[:, 2 * H:] + r * gh[:, 2 * H:])
            h_new = (1.0 - z) * n + z * h
            h_scr[d] = h_new
            o_ref[t] = h_new


def gru_layer_pallas(gi1f, gi1b, gi2f, gi2b, whh4, bhh4):
    """One bidirectional GRU layer for BOTH modules at once.

    gi*: (T, B, 3H) precomputed input projections (f32), per module/direction.
    whh4: (4, H, 3H) stacked hidden weights (streams: r1f, r1b, r2f, r2b).
    bhh4: (4, 1, 3H) hidden bias with only the n-gate slot nonzero.
    Returns 4 hidden sequences (T, B, H), already in forward time order.
    """
    T, B, G3 = gi1f.shape
    H = G3 // 3
    Tc = _time_chunk(T)
    nb = T // Tc

    fwd_map = lambda t: (t, 0, 0)
    bwd_map = lambda t: (nb - 1 - t, 0, 0)       # time reversal via index_map
    gi_f = pl.BlockSpec((Tc, B, G3), fwd_map)
    gi_b = pl.BlockSpec((Tc, B, G3), bwd_map)
    o_f = pl.BlockSpec((Tc, B, H), fwd_map)
    o_b = pl.BlockSpec((Tc, B, H), bwd_map)

    out_sds = jax.ShapeDtypeStruct((T, B, H), jnp.float32)
    return pl.pallas_call(
        gru_rec_kernel,
        out_shape=(out_sds, out_sds, out_sds, out_sds),
        grid_spec=pltpu.PrefetchScalarGridSpec(
            num_scalar_prefetch=0,
            grid=(nb,),
            in_specs=[gi_f, gi_b, gi_f, gi_b,
                      pl.BlockSpec((4, H, G3), lambda t: (0, 0, 0)),
                      pl.BlockSpec((4, 1, G3), lambda t: (0, 0, 0))],
            out_specs=[o_f, o_b, o_f, o_b],
            scratch_shapes=[pltpu.VMEM((4, B, H), jnp.float32)],
        ),
        # The time axis carries the hidden state in scratch -> MUST stay
        # sequential ("arbitrary").  Never mark it "parallel".
        compiler_params=pltpu.CompilerParams(dimension_semantics=("arbitrary",)),
    )(gi1f, gi1b, gi2f, gi2b, whh4, bhh4)


# ---------------------------------------------------------------------------
# Fused head: linear1(ctx_h) | linear2(pos_h), ReLU, written directly into the
# concatenated output slab (no separate concat pass, one wide store).
# ---------------------------------------------------------------------------
def head_kernel(h1f_ref, h1b_ref, h2f_ref, h2b_ref,
                w1f_ref, w1b_ref, w2f_ref, w2b_ref, b1_ref, b2_ref, o_ref):
    def lin(hf, hb, wf, wb, b):
        return (jnp.dot(hf[...].astype(MXU_DTYPE), wf[...],
                        preferred_element_type=jnp.float32)
                + jnp.dot(hb[...].astype(MXU_DTYPE), wb[...],
                          preferred_element_type=jnp.float32)
                + b[...])
    y1 = lin(h1f_ref, h1b_ref, w1f_ref, w1b_ref, b1_ref)
    y2 = lin(h2f_ref, h2b_ref, w2f_ref, w2b_ref, b2_ref)
    o_ref[...] = jnp.maximum(jnp.concatenate([y1, y2], axis=-1), 0.0)


def head_pallas(h1f, h1b, h2f, h2b, w1f, w1b, w2f, w2b, b1, b2):
    R, H = h1f.shape
    tm = _row_tile(R)
    x_spec = pl.BlockSpec((tm, H), lambda i: (i, 0))
    w_spec = pl.BlockSpec((H, H), lambda i: (0, 0))
    b_spec = pl.BlockSpec((1, H), lambda i: (0, 0))
    return pl.pallas_call(
        head_kernel,
        out_shape=jax.ShapeDtypeStruct((R, 2 * H), jnp.float32),
        grid_spec=pltpu.PrefetchScalarGridSpec(
            num_scalar_prefetch=0,
            grid=(R // tm,),
            in_specs=[x_spec] * 4 + [w_spec] * 4 + [b_spec] * 2,
            out_specs=pl.BlockSpec((tm, 2 * H), lambda i: (i, 0)),
        ),
        compiler_params=pltpu.CompilerParams(dimension_semantics=("parallel",)),
    )(h1f, h1b, h2f, h2b, w1f, w1b, w2f, w2b, b1, b2)


# ---------------------------------------------------------------------------
# Parameter preparation: PyTorch-format params -> kernel-format params
# (transposed, gate/direction-fused, biases folded, bf16 weights, streams
# stacked in order [rnn1-fwd, rnn1-bwd, rnn2-fwd, rnn2-bwd]).
# ---------------------------------------------------------------------------
def prepare_params(raw):
    H = raw["rnn1"][0]["fwd"][1].shape[1]
    prep = {"con_len": raw["con_len"], "H": H, "layers": []}
    for l in range(len(raw["rnn1"])):
        layer = {}
        for m in ("rnn1", "rnn2"):
            lp = raw[m][l]

            def fold_in_bias(p):
                # b_ih + b_hh for the r/z gates (the n-gate b_hh must stay in
                # the recurrence because it is multiplied by r there).
                _, _, b_ih, b_hh = p
                return b_ih + jnp.concatenate(
                    [b_hh[:2 * H], jnp.zeros((H,), jnp.float32)])

            bcat = jnp.concatenate(
                [fold_in_bias(lp["fwd"]), fold_in_bias(lp["bwd"])]).reshape(1, 6 * H)
            if l == 0:
                wf = lp["fwd"][0].T                       # (Din, 3H)
                wb = lp["bwd"][0].T
                layer[m] = dict(
                    w=jnp.concatenate([wf, wb], axis=1).astype(MXU_DTYPE),
                    b=bcat)
            else:
                wf = lp["fwd"][0].T                       # (2H, 3H)
                wb = lp["bwd"][0].T
                layer[m] = dict(
                    wa=jnp.concatenate([wf[:H], wb[:H]], axis=1).astype(MXU_DTYPE),
                    wb=jnp.concatenate([wf[H:], wb[H:]], axis=1).astype(MXU_DTYPE),
                    b=bcat)
        whh, bhh = [], []
        for m in ("rnn1", "rnn2"):
            for d in ("fwd", "bwd"):
                w_hh = raw[m][l][d][1]                    # (3H, H)
                b_hh = raw[m][l][d][3]
                whh.append(w_hh.T)                        # (H, 3H)
                bhh.append(jnp.concatenate(
                    [jnp.zeros((2 * H,), jnp.float32), b_hh[2 * H:]]).reshape(1, 3 * H))
        layer["whh"] = jnp.stack(whh).astype(MXU_DTYPE)   # (4, H, 3H)
        layer["bhh"] = jnp.stack(bhh)                     # (4, 1, 3H) f32
        prep["layers"].append(layer)

    w1 = raw["lin1_w"].T                                  # (2H, H)
    w2 = raw["lin2_w"].T
    prep["head"] = dict(
        w1f=w1[:H].astype(MXU_DTYPE), w1b=w1[H:].astype(MXU_DTYPE),
        w2f=w2[:H].astype(MXU_DTYPE), w2b=w2[H:].astype(MXU_DTYPE),
        b1=raw["lin1_b"].reshape(1, H), b2=raw["lin2_b"].reshape(1, H))
    return prep


# ---------------------------------------------------------------------------
# RefineLayer forward
# ---------------------------------------------------------------------------
def refine_layer_forward(inputs, prep):
    con_len = prep["con_len"]
    H = prep["H"]
    B = inputs.shape[0]

    x_tm = jnp.transpose(inputs, (1, 0, 2))     # single layout change in
    ctx = x_tm[:con_len]                        # (T, B, D)  -> rnn1 / linear1
    pos = x_tm[con_len:]                        # (T, B, D)  -> rnn2 / linear2
    T, _, D = ctx.shape
    assert pos.shape[0] == T                    # required by the final concat
    R = T * B
    rs = lambda a: a.reshape(T, B, -1)          # free (contiguous) reshapes
    fl = lambda a: a.reshape(R, -1)

    h1f = h1b = h2f = h2b = None
    for li, layer in enumerate(prep["layers"]):
        if li == 0:
            gi1f, gi1b = inproj1_pallas(ctx.reshape(R, D),
                                        layer["rnn1"]["w"], layer["rnn1"]["b"])
            gi2f, gi2b = inproj1_pallas(pos.reshape(R, D),
                                        layer["rnn2"]["w"], layer["rnn2"]["b"])
        else:
            gi1f, gi1b = inproj2_pallas(fl(h1f), fl(h1b),
                                        layer["rnn1"]["wa"], layer["rnn1"]["wb"],
                                        layer["rnn1"]["b"])
            gi2f, gi2b = inproj2_pallas(fl(h2f), fl(h2b),
                                        layer["rnn2"]["wa"], layer["rnn2"]["wb"],
                                        layer["rnn2"]["b"])
        h1f, h1b, h2f, h2b = gru_layer_pallas(rs(gi1f), rs(gi1b),
                                              rs(gi2f), rs(gi2b),
                                              layer["whh"], layer["bhh"])

    hd = prep["head"]
    out2 = head_pallas(fl(h1f), fl(h1b), fl(h2f), fl(h2b),
                       hd["w1f"], hd["w1b"], hd["w2f"], hd["w2b"],
                       hd["b1"], hd["b2"])                # (T*B, 2H), ReLU'd
    return jnp.transpose(out2.reshape(T, B, 2 * H), (1, 0, 2))   # (B, T, 2H)


# ---------------------------------------------------------------------------
# Deterministic PyTorch-style parameter init (raw / PyTorch layout)
# ---------------------------------------------------------------------------
def init_gru_params(key, input_dim, hidden, num_layers=2):
    params = []
    s = 1.0 / np.sqrt(hidden)
    for layer in range(num_layers):
        in_dim = input_dim if layer == 0 else 2 * hidden
        lp = {}
        for d in ("fwd", "bwd"):
            key, k1, k2, k3, k4 = jax.random.split(key, 5)
            lp[d] = (
                jax.random.uniform(k1, (3 * hidden, in_dim), jnp.float32, -s, s),
                jax.random.uniform(k2, (3 * hidden, hidden), jnp.float32, -s, s),
                jax.random.uniform(k3, (3 * hidden,), jnp.float32, -s, s),
                jax.random.uniform(k4, (3 * hidden,), jnp.float32, -s, s),
            )
        params.append(lp)
    return params, key


# ---------------------------------------------------------------------------
# Pure-JAX reference (same math; MXU inputs cast the same way for comparison)
# ---------------------------------------------------------------------------
def _mm(a, b):
    return jnp.dot(a.astype(MXU_DTYPE), b.astype(MXU_DTYPE),
                   preferred_element_type=jnp.float32)


def gru_ref(x, layer_params):
    B = x.shape[0]
    h = x
    for lp in layer_params:
        H = lp["fwd"][1].shape[1]

        def run_dir(xs, p):
            w_ih, w_hh, b_ih, b_hh = p

            def step(hprev, x_t):
                gi = _mm(x_t, w_ih.T) + b_ih
                gh = _mm(hprev, w_hh.T) + b_hh
                r = jax.nn.sigmoid(gi[:, :H] + gh[:, :H])
                z = jax.nn.sigmoid(gi[:, H:2 * H] + gh[:, H:2 * H])
                n = jnp.tanh(gi[:, 2 * H:] + r * gh[:, 2 * H:])
                hn = (1.0 - z) * n + z * hprev
                return hn, hn

            h0 = jnp.zeros((B, H), jnp.float32)
            _, ys = jax.lax.scan(step, h0, jnp.transpose(xs, (1, 0, 2)))
            return jnp.transpose(ys, (1, 0, 2))

        hf = run_dir(h, lp["fwd"])
        hb = jnp.flip(run_dir(jnp.flip(h, axis=1), lp["bwd"]), axis=1)
        h = jnp.concatenate([hf, hb], axis=-1)
    return h


def refine_layer_ref(inputs, raw):
    con_len = raw["con_len"]
    ctx = inputs[:, :con_len, :]
    pos = inputs[:, con_len:, :]
    ctx_h = gru_ref(ctx, raw["rnn1"])
    pos_h = gru_ref(pos, raw["rnn2"])
    ctx_o = _mm(ctx_h, raw["lin1_w"].T) + raw["lin1_b"]
    pos_o = _mm(pos_h, raw["lin2_w"].T) + raw["lin2_b"]
    return jax.nn.relu(jnp.concatenate([ctx_o, pos_o], axis=-1))


if __name__ == "__main__":
    # Small shapes consistent with the module; torch.cat(dim=-1) at the end
    # requires equal context/positive lengths, so seq = 2 * con_len.
    max_lens = 5
    con_len = max_lens - 1          # 4
    input_dim = 32
    gru_dim = 32
    batch = 2
    seq = 2 * con_len               # 8

    key = jax.random.PRNGKey(0)
    key, kx = jax.random.split(key)
    inputs = jax.random.normal(kx, (batch, seq, input_dim), jnp.float32)

    rnn1, key = init_gru_params(key, input_dim, gru_dim)
    rnn2, key = init_gru_params(key, input_dim, gru_dim)
    key, k1, k2, k3, k4 = jax.random.split(key, 5)
    s = 1.0 / np.sqrt(2 * gru_dim)
    raw = dict(
        con_len=con_len, rnn1=rnn1, rnn2=rnn2,
        lin1_w=jax.random.uniform(k1, (gru_dim, 2 * gru_dim), jnp.float32, -s, s),
        lin1_b=jax.random.uniform(k2, (gru_dim,), jnp.float32, -s, s),
        lin2_w=jax.random.uniform(k3, (gru_dim, 2 * gru_dim), jnp.float32, -s, s),
        lin2_b=jax.random.uniform(k4, (gru_dim,), jnp.float32, -s, s),
    )

    prep = prepare_params(raw)
    fwd = jax.jit(lambda x: refine_layer_forward(x, prep))
    out = jax.block_until_ready(fwd(inputs))

    ref = jax.block_until_ready(refine_layer_ref(inputs, raw))
    assert out.shape == (batch, con_len, 2 * gru_dim), out.shape
    err = float(jnp.max(jnp.abs(out - ref)))
    assert err < 1e-3, f"mismatch vs reference: max abs err {err}"

    print("KERNEL_OK")
</pallas_src>

<mosaic_0001>
module attributes {stable_mosaic.version = 11 : i64} {
  func.func @inproj1_kernel(%arg0: i32, %arg1: memref<8x32xf32, #tpu.memory_space<vmem>>, %arg2: memref<32x192xbf16, #tpu.memory_space<vmem>>, %arg3: memref<1x192xf32, #tpu.memory_space<vmem>>, %arg4: memref<8x96xf32, #tpu.memory_space<vmem>>, %arg5: memref<8x96xf32, #tpu.memory_space<vmem>>) attributes {dimension_semantics = [#tpu.dimension_semantics<parallel>], iteration_bounds = array<i64: 1>, scalar_prefetch = 0 : i64, scratch_operands = 0 : i64, tpu.core_type = #tpu.core_type<tc>, window_params = [{transform_indices = @transform_0, window_bounds = array<i64: 8, 32>}, {pipeline_mode = #tpu.pipeline_mode<synchronous>, transform_indices = @transform_1, window_bounds = array<i64: 32, 192>}, {pipeline_mode = #tpu.pipeline_mode<synchronous>, transform_indices = @transform_2, window_bounds = array<i64: 1, 192>}, {transform_indices = @transform_3, window_bounds = array<i64: 8, 96>}, {transform_indices = @transform_4, window_bounds = array<i64: 8, 96>}]} {
    %c0 = arith.constant 0 : index
    %c0_0 = arith.constant 0 : index
    %0 = vector.load %arg1[%c0, %c0_0] : memref<8x32xf32, #tpu.memory_space<vmem>>, vector<8x32xf32>
    %1 = arith.truncf %0 : vector<8x32xf32> to vector<8x32xbf16>
    %c0_1 = arith.constant 0 : index
    %c0_2 = arith.constant 0 : index
    %2 = vector.load %arg2[%c0_1, %c0_2] : memref<32x192xbf16, #tpu.memory_space<vmem>>, vector<32x192xbf16>
    %cst = arith.constant dense<0.000000e+00> : vector<8x192xf32>
    %3 = tpu.matmul %1, %2, %cst {dimension_numbers = #tpu.dot_dimension_numbers<[1], [0], [0], [1], [0, 0, 1, 1], [], []>} : vector<8x32xbf16>, vector<32x192xbf16>, vector<8x192xf32> -> vector<8x192xf32>
    %c0_3 = arith.constant 0 : index
    %c0_4 = arith.constant 0 : index
    %4 = vector.load %arg3[%c0_3, %c0_4] : memref<1x192xf32, #tpu.memory_space<vmem>>, vector<1x192xf32>
    %5 = vector.broadcast %4 : vector<1x192xf32> to vector<8x192xf32>
    %6 = arith.addf %3, %5 : vector<8x192xf32>
    %7 = vector.extract_strided_slice %6 {offsets = [0, 0], sizes = [8, 96], strides = [1, 1]} : vector<8x192xf32> to vector<8x96xf32>
    %c0_5 = arith.constant 0 : index
    %c0_6 = arith.constant 0 : index
    %8 = vector.load %arg4[%c0_5, %c0_6] : memref<8x96xf32, #tpu.memory_space<vmem>>, vector<8x96xf32>
    tpu.vector_store %arg4[%c0_5, %c0_6], %7 {strides = array<i32>} : memref<8x96xf32, #tpu.memory_space<vmem>>, vector<8x96xf32>,
    %9 = vector.extract_strided_slice %6 {offsets = [0, 96], sizes = [8, 96], strides = [1, 1]} : vector<8x192xf32> to vector<8x96xf32>
    %c0_7 = arith.constant 0 : index
    %c0_8 = arith.constant 0 : index
    %10 = vector.load %arg5[%c0_7, %c0_8] : memref<8x96xf32, #tpu.memory_space<vmem>>, vector<8x96xf32>
    tpu.vector_store %arg5[%c0_7, %c0_8], %9 {strides = array<i32>} : memref<8x96xf32, #tpu.memory_space<vmem>>, vector<8x96xf32>,
    return
  }
  func.func @transform_0(%arg0: i32) -> (i32, i32) {
    %c0_i32 = arith.constant 0 : i32
    %c0_i32_0 = arith.constant 0 : i32
    return %arg0, %c0_i32 : i32, i32
  }
  func.func @transform_1(%arg0: i32) -> (i32, i32) {
    %c0_i32 = arith.constant 0 : i32
    %c0_i32_0 = arith.constant 0 : i32
    %c0_i32_1 = arith.constant 0 : i32
    return %c0_i32, %c0_i32_0 : i32, i32
  }
  func.func @transform_2(%arg0: i32) -> (i32, i32) {
    %c0_i32 = arith.constant 0 : i32
    %c0_i32_0 = arith.constant 0 : i32
    %c0_i32_1 = arith.constant 0 : i32
    return %c0_i32, %c0_i32_0 : i32, i32
  }
  func.func @transform_3(%arg0: i32) -> (i32, i32) {
    %c0_i32 = arith.constant 0 : i32
    %c0_i32_0 = arith.constant 0 : i32
    return %arg0, %c0_i32 : i32, i32
  }
  func.func @transform_4(%arg0: i32) -> (i32, i32) {
    %c0_i32 = arith.constant 0 : i32
    %c0_i32_0 = arith.constant 0 : i32
    return %arg0, %c0_i32 : i32, i32
  }
}

module attributes {stable_mosaic.version = 11 : i64} {
  func.func @inproj2_kernel(%arg0: i32, %arg1: memref<8x32xf32, #tpu.memory_space<vmem>>, %arg2: memref<8x32xf32, #tpu.memory_space<vmem>>, %arg3: memref<32x192xbf16, #tpu.memory_space<vmem>>, %arg4: memref<32x192xbf16, #tpu.memory_space<vmem>>, %arg5: memref<1x192xf32, #tpu.memory_space<vmem>>, %arg6: memref<8x96xf32, #tpu.memory_space<vmem>>, %arg7: memref<8x96xf32, #tpu.memory_space<vmem>>) attributes {dimension_semantics = [#tpu.dimension_semantics<parallel>], iteration_bounds = array<i64: 1>, scalar_prefetch = 0 : i64, scratch_operands = 0 : i64, tpu.core_type = #tpu.core_type<tc>, window_params = [{transform_indices = @transform_0, window_bounds = array<i64: 8, 32>}, {transform_indices = @transform_1, window_bounds = array<i64: 8, 32>}, {pipeline_mode = #tpu.pipeline_mode<synchronous>, transform_indices = @transform_2, window_bounds = array<i64: 32, 192>}, {pipeline_mode = #tpu.pipeline_mode<synchronous>, transform_indices = @transform_3, window_bounds = array<i64: 32, 192>}, {pipeline_mode = #tpu.pipeline_mode<synchronous>, transform_indices = @transform_4, window_bounds = array<i64: 1, 192>}, {transform_indices = @transform_5, window_bounds = array<i64: 8, 96>}, {transform_indices = @transform_6, window_bounds = array<i64: 8, 96>}]} {
    %c0 = arith.constant 0 : index
    %c0_0 = arith.constant 0 : index
    %0 = vector.load %arg1[%c0, %c0_0] : memref<8x32xf32, #tpu.memory_space<vmem>>, vector<8x32xf32>
    %1 = arith.truncf %0 : vector<8x32xf32> to vector<8x32xbf16>
    %c0_1 = arith.constant 0 : index
    %c0_2 = arith.constant 0 : index
    %2 = vector.load %arg3[%c0_1, %c0_2] : memref<32x192xbf16, #tpu.memory_space<vmem>>, vector<32x192xbf16>
    %cst = arith.constant dense<0.000000e+00> : vector<8x192xf32>
    %3 = tpu.matmul %1, %2, %cst {dimension_numbers = #tpu.dot_dimension_numbers<[1], [0], [0], [1], [0, 0, 1, 1], [], []>} : vector<8x32xbf16>, vector<32x192xbf16>, vector<8x192xf32> -> vector<8x192xf32>
    %c0_3 = arith.constant 0 : index
    %c0_4 = arith.constant 0 : index
    %4 = vector.load %arg2[%c0_3, %c0_4] : memref<8x32xf32, #tpu.memory_space<vmem>>, vector<8x32xf32>
    %5 = arith.truncf %4 : vector<8x32xf32> to vector<8x32xbf16>
    %c0_5 = arith.constant 0 : index
    %c0_6 = arith.constant 0 : index
    %6 = vector.load %arg4[%c0_5, %c0_6] : memref<32x192xbf16, #tpu.memory_space<vmem>>, vector<32x192xbf16>
    %cst_7 = arith.constant dense<0.000000e+00> : vector<8x192xf32>
    %7 = tpu.matmul %5, %6, %cst_7 {dimension_numbers = #tpu.dot_dimension_numbers<[1], [0], [0], [1], [0, 0, 1, 1], [], []>} : vector<8x32xbf16>, vector<32x192xbf16>, vector<8x192xf32> -> vector<8x192xf32>
    %8 = arith.addf %3, %7 : vector<8x192xf32>
    %c0_8 = arith.constant 0 : index
    %c0_9 = arith.constant 0 : index
    %9 = vector.load %arg5[%c0_8, %c0_9] : memref<1x192xf32, #tpu.memory_space<vmem>>, vector<1x192xf32>
    %10 = vector.broadcast %9 : vector<1x192xf32> to vector<8x192xf32>
    %11 = arith.addf %8, %10 : vector<8x192xf32>
    %12 = vector.extract_strided_slice %11 {offsets = [0, 0], sizes = [8, 96], strides = [1, 1]} : vector<8x192xf32> to vector<8x96xf32>
    %c0_10 = arith.constant 0 : index
    %c0_11 = arith.constant 0 : index
    %13 = vector.load %arg6[%c0_10, %c0_11] : memref<8x96xf32, #tpu.memory_space<vmem>>, vector<8x96xf32>
    tpu.vector_store %arg6[%c0_10, %c0_11], %12 {strides = array<i32>} : memref<8x96xf32, #tpu.memory_space<vmem>>, vector<8x96xf32>,
    %14 = vector.extract_strided_slice %11 {offsets = [0, 96], sizes = [8, 96], strides = [1, 1]} : vector<8x192xf32> to vector<8x96xf32>
    %c0_12 = arith.constant 0 : index
    %c0_13 = arith.constant 0 : index
    %15 = vector.load %arg7[%c0_12, %c0_13] : memref<8x96xf32, #tpu.memory_space<vmem>>, vector<8x96xf32>
    tpu.vector_store %arg7[%c0_12, %c0_13], %14 {strides = array<i32>} : memref<8x96xf32, #tpu.memory_space<vmem>>, vector<8x96xf32>,
    return
  }
  func.func @transform_0(%arg0: i32) -> (i32, i32) {
    %c0_i32 = arith.constant 0 : i32
    %c0_i32_0 = arith.constant 0 : i32
    return %arg0, %c0_i32 : i32, i32
  }
  func.func @transform_1(%arg0: i32) -> (i32, i32) {
    %c0_i32 = arith.constant 0 : i32
    %c0_i32_0 = arith.constant 0 : i32
    return %arg0, %c0_i32 : i32, i32
  }
  func.func @transform_2(%arg0: i32) -> (i32, i32) {
    %c0_i32 = arith.constant 0 : i32
    %c0_i32_0 = arith.constant 0 : i32
    %c0_i32_1 = arith.constant 0 : i32
    return %c0_i32, %c0_i32_0 : i32, i32
  }
  func.func @transform_3(%arg0: i32) -> (i32, i32) {
    %c0_i32 = arith.constant 0 : i32
    %c0_i32_0 = arith.constant 0 : i32
    %c0_i32_1 = arith.constant 0 : i32
    return %c0_i32, %c0_i32_0 : i32, i32
  }
  func.func @transform_4(%arg0: i32) -> (i32, i32) {
    %c0_i32 = arith.constant 0 : i32
    %c0_i32_0 = arith.constant 0 : i32
    %c0_i32_1 = arith.constant 0 : i32
    return %c0_i32, %c0_i32_0 : i32, i32
  }
  func.func @transform_5(%arg0: i32) -> (i32, i32) {
    %c0_i32 = arith.constant 0 : i32
    %c0_i32_0 = arith.constant 0 : i32
    return %arg0, %c0_i32 : i32, i32
  }
  func.func @transform_6(%arg0: i32) -> (i32, i32) {
    %c0_i32 = arith.constant 0 : i32
    %c0_i32_0 = arith.constant 0 : i32
    return %arg0, %c0_i32 : i32, i32
  }
}

module attributes {stable_mosaic.version = 11 : i64} {
  func.func @head_kernel(%arg0: i32, %arg1: memref<8x32xf32, #tpu.memory_space<vmem>>, %arg2: memref<8x32xf32, #tpu.memory_space<vmem>>, %arg3: memref<8x32xf32, #tpu.memory_space<vmem>>, %arg4: memref<8x32xf32, #tpu.memory_space<vmem>>, %arg5: memref<32x32xbf16, #tpu.memory_space<vmem>>, %arg6: memref<32x32xbf16, #tpu.memory_space<vmem>>, %arg7: memref<32x32xbf16, #tpu.memory_space<vmem>>, %arg8: memref<32x32xbf16, #tpu.memory_space<vmem>>, %arg9: memref<1x32xf32, #tpu.memory_space<vmem>>, %arg10: memref<1x32xf32, #tpu.memory_space<vmem>>, %arg11: memref<8x64xf32, #tpu.memory_space<vmem>>) attributes {dimension_semantics = [#tpu.dimension_semantics<parallel>], iteration_bounds = array<i64: 1>, scalar_prefetch = 0 : i64, scratch_operands = 0 : i64, tpu.core_type = #tpu.core_type<tc>, window_params = [{transform_indices = @transform_0, window_bounds = array<i64: 8, 32>}, {transform_indices = @transform_1, window_bounds = array<i64: 8, 32>}, {transform_indices = @transform_2, window_bounds = array<i64: 8, 32>}, {transform_indices = @transform_3, window_bounds = array<i64: 8, 32>}, {pipeline_mode = #tpu.pipeline_mode<synchronous>, transform_indices = @transform_4, window_bounds = array<i64: 32, 32>}, {pipeline_mode = #tpu.pipeline_mode<synchronous>, transform_indices = @transform_5, window_bounds = array<i64: 32, 32>}, {pipeline_mode = #tpu.pipeline_mode<synchronous>, transform_indices = @transform_6, window_bounds = array<i64: 32, 32>}, {pipeline_mode = #tpu.pipeline_mode<synchronous>, transform_indices = @transform_7, window_bounds = array<i64: 32, 32>}, {pipeline_mode = #tpu.pipeline_mode<synchronous>, transform_indices = @transform_8, window_bounds = array<i64: 1, 32>}, {pipeline_mode = #tpu.pipeline_mode<synchronous>, transform_indices = @transform_9, window_bounds = array<i64: 1, 32>}, {transform_indices = @transform_10, window_bounds = array<i64: 8, 64>}]} {
    %c0 = arith.constant 0 : index
    %c0_0 = arith.constant 0 : index
    %0 = vector.load %arg1[%c0, %c0_0] : memref<8x32xf32, #tpu.memory_space<vmem>>, vector<8x32xf32>
    %1 = arith.truncf %0 : vector<8x32xf32> to vector<8x32xbf16>
    %c0_1 = arith.constant 0 : index
    %c0_2 = arith.constant 0 : index
    %2 = vector.load %arg5[%c0_1, %c0_2] : memref<32x32xbf16, #tpu.memory_space<vmem>>, vector<32x32xbf16>
    %cst = arith.constant dense<0.000000e+00> : vector<8x32xf32>
    %3 = tpu.matmul %1, %2, %cst {dimension_numbers = #tpu.dot_dimension_numbers<[1], [0], [0], [1], [0, 0, 1, 1], [], []>} : vector<8x32xbf16>, vector<32x32xbf16>, vector<8x32xf32> -> vector<8x32xf32>
    %c0_3 = arith.constant 0 : index
    %c0_4 = arith.constant 0 : index
    %4 = vector.load %arg2[%c0_3, %c0_4] : memref<8x32xf32, #tpu.memory_space<vmem>>, vector<8x32xf32>
    %5 = arith.truncf %4 : vector<8x32xf32> to vector<8x32xbf16>
    %c0_5 = arith.constant 0 : index
    %c0_6 = arith.constant 0 : index
    %6 = vector.load %arg6[%c0_5, %c0_6] : memref<32x32xbf16, #tpu.memory_space<vmem>>, vector<32x32xbf16>
    %cst_7 = arith.constant dense<0.000000e+00> : vector<8x32xf32>
    %7 = tpu.matmul %5, %6, %cst_7 {dimension_numbers = #tpu.dot_dimension_numbers<[1], [0], [0], [1], [0, 0, 1, 1], [], []>} : vector<8x32xbf16>, vector<32x32xbf16>, vector<8x32xf32> -> vector<8x32xf32>
    %8 = arith.addf %3, %7 : vector<8x32xf32>
    %c0_8 = arith.constant 0 : index
    %c0_9 = arith.constant 0 : index
    %9 = vector.load %arg9[%c0_8, %c0_9] : memref<1x32xf32, #tpu.memory_space<vmem>>, vector<1x32xf32>
    %10 = vector.broadcast %9 : vector<1x32xf32> to vector<8x32xf32>
    %11 = arith.addf %8, %10 : vector<8x32xf32>
    %c0_10 = arith.constant 0 : index
    %c0_11 = arith.constant 0 : index
    %12 = vector.load %arg3[%c0_10, %c0_11] : memref<8x32xf32, #tpu.memory_space<vmem>>, vector<8x32xf32>
    %13 = arith.truncf %12 : vector<8x32xf32> to vector<8x32xbf16>
    %c0_12 = arith.constant 0 : index
    %c0_13 = arith.constant 0 : index
    %14 = vector.load %arg7[%c0_12, %c0_13] : memref<32x32xbf16, #tpu.memory_space<vmem>>, vector<32x32xbf16>
    %cst_14 = arith.constant dense<0.000000e+00> : vector<8x32xf32>
    %15 = tpu.matmul %13, %14, %cst_14 {dimension_numbers = #tpu.dot_dimension_numbers<[1], [0], [0], [1], [0, 0, 1, 1], [], []>} : vector<8x32xbf16>, vector<32x32xbf16>, vector<8x32xf32> -> vector<8x32xf32>
    %c0_15 = arith.constant 0 : index
    %c0_16 = arith.constant 0 : index
    %16 = vector.load %arg4[%c0_15, %c0_16] : memref<8x32xf32, #tpu.memory_space<vmem>>, vector<8x32xf32>
    %17 = arith.truncf %16 : vector<8x32xf32> to vector<8x32xbf16>
    %c0_17 = arith.constant 0 : index
    %c0_18 = arith.constant 0 : index
    %18 = vector.load %arg8[%c0_17, %c0_18] : memref<32x32xbf16, #tpu.memory_space<vmem>>, vector<32x32xbf16>
    %cst_19 = arith.constant dense<0.000000e+00> : vector<8x32xf32>
    %19 = tpu.matmul %17, %18, %cst_19 {dimension_numbers = #tpu.dot_dimension_numbers<[1], [0], [0], [1], [0, 0, 1, 1], [], []>} : vector<8x32xbf16>, vector<32x32xbf16>, vector<8x32xf32> -> vector<8x32xf32>
    %20 = arith.addf %15, %19 : vector<8x32xf32>
    %c0_20 = arith.constant 0 : index
    %c0_21 = arith.constant 0 : index
    %21 = vector.load %arg10[%c0_20, %c0_21] : memref<1x32xf32, #tpu.memory_space<vmem>>, vector<1x32xf32>
    %22 = vector.broadcast %21 : vector<1x32xf32> to vector<8x32xf32>
    %23 = arith.addf %20, %22 : vector<8x32xf32>
    %24 = tpu.concatenate %11, %23 in 1 : vector<8x32xf32>, vector<8x32xf32> -> vector<8x64xf32>
    %cst_22 = arith.constant 0.000000e+00 : f32
    %25 = vector.broadcast %cst_22 : f32 to vector<8x64xf32>
    %26 = arith.maximumf %24, %25 : vector<8x64xf32>
    %c0_23 = arith.constant 0 : index
    %c0_24 = arith.constant 0 : index
    %27 = vector.load %arg11[%c0_23, %c0_24] : memref<8x64xf32, #tpu.memory_space<vmem>>, vector<8x64xf32>
    tpu.vector_store %arg11[%c0_23, %c0_24], %26 {strides = array<i32>} : memref<8x64xf32, #tpu.memory_space<vmem>>, vector<8x64xf32>,
    return
  }
  func.func @transform_0(%arg0: i32) -> (i32, i32) {
    %c0_i32 = arith.constant 0 : i32
    %c0_i32_0 = arith.constant 0 : i32
    return %arg0, %c0_i32 : i32, i32
  }
  func.func @transform_1(%arg0: i32) -> (i32, i32) {
    %c0_i32 = arith.constant 0 : i32
    %c0_i32_0 = arith.constant 0 : i32
    return %arg0, %c0_i32 : i32, i32
  }
  func.func @transform_2(%arg0: i32) -> (i32, i32) {
    %c0_i32 = arith.constant 0 : i32
    %c0_i32_0 = arith.constant 0 : i32
    return %arg0, %c0_i32 : i32, i32
  }
  func.func @transform_3(%arg0: i32) -> (i32, i32) {
    %c0_i32 = arith.constant 0 : i32
    %c0_i32_0 = arith.constant 0 : i32
    return %arg0, %c0_i32 : i32, i32
  }
  func.func @transform_4(%arg0: i32) -> (i32, i32) {
    %c0_i32 = arith.constant 0 : i32
    %c0_i32_0 = arith.constant 0 : i32
    %c0_i32_1 = arith.constant 0 : i32
    return %c0_i32, %c0_i32_0 : i32, i32
  }
  func.func @transform_5(%arg0: i32) -> (i32, i32) {
    %c0_i32 = arith.constant 0 : i32
    %c0_i32_0 = arith.constant 0 : i32
    %c0_i32_1 = arith.constant 0 : i32
    return %c0_i32, %c0_i32_0 : i32, i32
  }
  func.func @transform_6(%arg0: i32) -> (i32, i32) {
    %c0_i32 = arith.constant 0 : i32
    %c0_i32_0 = arith.constant 0 : i32
    %c0_i32_1 = arith.constant 0 : i32
    return %c0_i32, %c0_i32_0 : i32, i32
  }
  func.func @transform_7(%arg0: i32) -> (i32, i32) {
    %c0_i32 = arith.constant 0 : i32
    %c0_i32_0 = arith.constant 0 : i32
    %c0_i32_1 = arith.constant 0 : i32
    return %c0_i32, %c0_i32_0 : i32, i32
  }
  func.func @transform_8(%arg0: i32) -> (i32, i32) {
    %c0_i32 = arith.constant 0 : i32
    %c0_i32_0 = arith.constant 0 : i32
    %c0_i32_1 = arith.constant 0 : i32
    return %c0_i32, %c0_i32_0 : i32, i32
  }
  func.func @transform_9(%arg0: i32) -> (i32, i32) {
    %c0_i32 = arith.constant 0 : i32
    %c0_i32_0 = arith.constant 0 : i32
    %c0_i32_1 = arith.constant 0 : i32
    return %c0_i32, %c0_i32_0 : i32, i32
  }
  func.func @transform_10(%arg0: i32) -> (i32, i32) {
    %c0_i32 = arith.constant 0 : i32
    %c0_i32_0 = arith.constant 0 : i32
    return %arg0, %c0_i32 : i32, i32
  }
}

module attributes {stable_mosaic.version = 11 : i64} {
  func.func @gru_rec_kernel(%arg0: i32, %arg1: memref<4x2x96xf32, #tpu.memory_space<vmem>>, %arg2: memref<4x2x96xf32, #tpu.memory_space<vmem>>, %arg3: memref<4x2x96xf32, #tpu.memory_space<vmem>>, %arg4: memref<4x2x96xf32, #tpu.memory_space<vmem>>, %arg5: memref<4x32x96xbf16, #tpu.memory_space<vmem>>, %arg6: memref<4x1x96xf32, #tpu.memory_space<vmem>>, %arg7: memref<4x2x32xf32, #tpu.memory_space<vmem>>, %arg8: memref<4x2x32xf32, #tpu.memory_space<vmem>>, %arg9: memref<4x2x32xf32, #tpu.memory_space<vmem>>, %arg10: memref<4x2x32xf32, #tpu.memory_space<vmem>>, %arg11: memref<4x2x32xf32, #tpu.memory_space<vmem>>) attributes {dimension_semantics = [#tpu.dimension_semantics<arbitrary>], iteration_bounds = array<i64: 1>, scalar_prefetch = 0 : i64, scratch_operands = 1 : i64, tpu.core_type = #tpu.core_type<tc>, window_params = [{transform_indices = @transform_0, window_bounds = array<i64: 4, 2, 96>}, {transform_indices = @transform_1, window_bounds = array<i64: 4, 2, 96>}, {transform_indices = @transform_2, window_bounds = array<i64: 4, 2, 96>}, {transform_indices = @transform_3, window_bounds = array<i64: 4, 2, 96>}, {pipeline_mode = #tpu.pipeline_mode<synchronous>, transform_indices = @transform_4, window_bounds = array<i64: 4, 32, 96>}, {pipeline_mode = #tpu.pipeline_mode<synchronous>, transform_indices = @transform_5, window_bounds = array<i64: 4, 1, 96>}, {transform_indices = @transform_6, window_bounds = array<i64: 4, 2, 32>}, {transform_indices = @transform_7, window_bounds = array<i64: 4, 2, 32>}, {transform_indices = @transform_8, window_bounds = array<i64: 4, 2, 32>}, {transform_indices = @transform_9, window_bounds = array<i64: 4, 2, 32>}]} {
    %c0_i32 = arith.constant 0 : i32
    %0 = arith.cmpi eq, %arg0, %c0_i32 : i32
    %1 = arith.extui %0 : i1 to i32
    %c0_i32_0 = arith.constant 0 : i32
    %2 = arith.cmpi ne, %1, %c0_i32_0 : i32
    scf.if %2 {
      %cst_348 = arith.constant 0.000000e+00 : f32
      %707 = vector.broadcast %cst_348 : f32 to vector<4x2x32xf32>
      %c0_349 = arith.constant 0 : index
      %c0_350 = arith.constant 0 : index
      %c0_351 = arith.constant 0 : index
      %708 = vector.load %arg11[%c0_349, %c0_350, %c0_351] : memref<4x2x32xf32, #tpu.memory_space<vmem>>, vector<4x2x32xf32>
      tpu.vector_store %arg11[%c0_349, %c0_350, %c0_351], %707 {strides = array<i32>} : memref<4x2x32xf32, #tpu.memory_space<vmem>>, vector<4x2x32xf32>,
    } else {
    }
    %c0 = arith.constant 0 : index
    %c0_1 = arith.constant 0 : index
    %c0_2 = arith.constant 0 : index
    %3 = vector.load %arg1[%c0, %c0_1, %c0_2] : memref<4x2x96xf32, #tpu.memory_space<vmem>>, vector<1x2x96xf32>
    %4 = vector.shape_cast %3 : vector<1x2x96xf32> to vector<2x96xf32>
    %c0_3 = arith.constant 0 : index
    %c0_4 = arith.constant 0 : index
    %c0_5 = arith.constant 0 : index
    %5 = vector.load %arg11[%c0_3, %c0_4, %c0_5] : memref<4x2x32xf32, #tpu.memory_space<vmem>>, vector<1x2x32xf32>
    %6 = vector.shape_cast %5 : vector<1x2x32xf32> to vector<2x32xf32>
    %7 = arith.truncf %6 : vector<2x32xf32> to vector<2x32xbf16>
    %c0_6 = arith.constant 0 : index
    %c0_7 = arith.constant 0 : index
    %c0_8 = arith.constant 0 : index
    %8 = vector.load %arg5[%c0_6, %c0_7, %c0_8] : memref<4x32x96xbf16, #tpu.memory_space<vmem>>, vector<1x32x96xbf16>
    %9 = vector.shape_cast %8 : vector<1x32x96xbf16> to vector<32x96xbf16>
    %cst = arith.constant dense<0.000000e+00> : vector<2x96xf32>
    %10 = tpu.matmul %7, %9, %cst {dimension_numbers = #tpu.dot_dimension_numbers<[1], [0], [0], [1], [0, 0, 1, 1], [], []>} : vector<2x32xbf16>, vector<32x96xbf16>, vector<2x96xf32> -> vector<2x96xf32>
    %c0_9 = arith.constant 0 : index
    %c0_10 = arith.constant 0 : index
    %c0_11 = arith.constant 0 : index
    %11 = vector.load %arg6[%c0_9, %c0_10, %c0_11] : memref<4x1x96xf32, #tpu.memory_space<vmem>>, vector<1x1x96xf32>
    %12 = vector.shape_cast %11 : vector<1x1x96xf32> to vector<1x96xf32>
    %13 = vector.broadcast %12 : vector<1x96xf32> to vector<2x96xf32>
    %14 = arith.addf %10, %13 : vector<2x96xf32>
    %15 = vector.extract_strided_slice %4 {offsets = [0, 0], sizes = [2, 32], strides = [1, 1]} : vector<2x96xf32> to vector<2x32xf32>
    %16 = vector.extract_strided_slice %14 {offsets = [0, 0], sizes = [2, 32], strides = [1, 1]} : vector<2x96xf32> to vector<2x32xf32>
    %17 = arith.addf %15, %16 : vector<2x32xf32>
    %18 = arith.negf %17 : vector<2x32xf32>
    %19 = math.exp %18 : vector<2x32xf32>
    %cst_12 = arith.constant 1.000000e+00 : f32
    %20 = vector.broadcast %cst_12 : f32 to vector<2x32xf32>
    %21 = arith.addf %20, %19 : vector<2x32xf32>
    %22 = arith.divf %20, %21 : vector<2x32xf32>
    %23 = vector.extract_strided_slice %4 {offsets = [0, 32], sizes = [2, 32], strides = [1, 1]} : vector<2x96xf32> to vector<2x32xf32>
    %24 = vector.extract_strided_slice %14 {offsets = [0, 32], sizes = [2, 32], strides = [1, 1]} : vector<2x96xf32> to vector<2x32xf32>
    %25 = arith.addf %23, %24 : vector<2x32xf32>
    %26 = arith.negf %25 : vector<2x32xf32>
    %27 = math.exp %26 : vector<2x32xf32>
    %cst_13 = arith.constant 1.000000e+00 : f32
    %28 = vector.broadcast %cst_13 : f32 to vector<2x32xf32>
    %29 = arith.addf %28, %27 : vector<2x32xf32>
    %30 = arith.divf %28, %29 : vector<2x32xf32>
    %31 = vector.extract_strided_slice %4 {offsets = [0, 64], sizes = [2, 32], strides = [1, 1]} : vector<2x96xf32> to vector<2x32xf32>
    %32 = vector.extract_strided_slice %14 {offsets = [0, 64], sizes = [2, 32], strides = [1, 1]} : vector<2x96xf32> to vector<2x32xf32>
    %33 = arith.mulf %22, %32 : vector<2x32xf32>
    %34 = arith.addf %31, %33 : vector<2x32xf32>
    %35 = math.tanh %34 : vector<2x32xf32>
    %cst_14 = arith.constant 1.000000e+00 : f32
    %36 = vector.broadcast %cst_14 : f32 to vector<2x32xf32>
    %37 = arith.subf %36, %30 : vector<2x32xf32>
    %38 = arith.mulf %37, %35 : vector<2x32xf32>
    %39 = arith.mulf %30, %6 : vector<2x32xf32>
    %40 = arith.addf %38, %39 : vector<2x32xf32>
    %c0_15 = arith.constant 0 : index
    %c0_16 = arith.constant 0 : index
    %c0_17 = arith.constant 0 : index
    %41 = vector.load %arg11[%c0_15, %c0_16, %c0_17] : memref<4x2x32xf32, #tpu.memory_space<vmem>>, vector<1x2x32xf32>
    %42 = vector.shape_cast %41 : vector<1x2x32xf32> to vector<2x32xf32>
    %43 = vector.shape_cast %40 : vector<2x32xf32> to vector<1x2x32xf32>
    tpu.vector_store %arg11[%c0_15, %c0_16, %c0_17], %43 {strides = array<i32>} : memref<4x2x32xf32, #tpu.memory_space<vmem>>, vector<1x2x32xf32>,
    %c0_18 = arith.constant 0 : index
    %c0_19 = arith.constant 0 : index
    %c0_20 = arith.constant 0 : index
    %44 = vector.load %arg7[%c0_18, %c0_19, %c0_20] : memref<4x2x32xf32, #tpu.memory_space<vmem>>, vector<1x2x32xf32>
    %45 = vector.shape_cast %44 : vector<1x2x32xf32> to vector<2x32xf32>
    %46 = vector.shape_cast %40 : vector<2x32xf32> to vector<1x2x32xf32>
    tpu.vector_store %arg7[%c0_18, %c0_19, %c0_20], %46 {strides = array<i32>} : memref<4x2x32xf32, #tpu.memory_space<vmem>>, vector<1x2x32xf32>,
    %c3 = arith.constant 3 : index
    %c0_21 = arith.constant 0 : index
    %c0_22 = arith.constant 0 : index
    %47 = vector.load %arg2[%c3, %c0_21, %c0_22] : memref<4x2x96xf32, #tpu.memory_space<vmem>>, vector<1x2x96xf32>
    %48 = vector.shape_cast %47 : vector<1x2x96xf32> to vector<2x96xf32>
    %c1 = arith.constant 1 : index
    %c0_23 = arith.constant 0 : index
    %c0_24 = arith.constant 0 : index
    %49 = vector.load %arg11[%c1, %c0_23, %c0_24] : memref<4x2x32xf32, #tpu.memory_space<vmem>>, vector<1x2x32xf32>
    %50 = vector.shape_cast %49 : vector<1x2x32xf32> to vector<2x32xf32>
    %51 = arith.truncf %50 : vector<2x32xf32> to vector<2x32xbf16>
    %c1_25 = arith.constant 1 : index
    %c0_26 = arith.constant 0 : index
    %c0_27 = arith.constant 0 : index
    %52 = vector.load %arg5[%c1_25, %c0_26, %c0_27] : memref<4x32x96xbf16, #tpu.memory_space<vmem>>, vector<1x32x96xbf16>
    %53 = vector.shape_cast %52 : vector<1x32x96xbf16> to vector<32x96xbf16>
    %cst_28 = arith.constant dense<0.000000e+00> : vector<2x96xf32>
    %54 = tpu.matmul %51, %53, %cst_28 {dimension_numbers = #tpu.dot_dimension_numbers<[1], [0], [0], [1], [0, 0, 1, 1], [], []>} : vector<2x32xbf16>, vector<32x96xbf16>, vector<2x96xf32> -> vector<2x96xf32>
    %c1_29 = arith.constant 1 : index
    %c0_30 = arith.constant 0 : index
    %c0_31 = arith.constant 0 : index
    %55 = vector.load %arg6[%c1_29, %c0_30, %c0_31] : memref<4x1x96xf32, #tpu.memory_space<vmem>>, vector<1x1x96xf32>
    %56 = vector.shape_cast %55 : vector<1x1x96xf32> to vector<1x96xf32>
    %57 = vector.broadcast %56 : vector<1x96xf32> to vector<2x96xf32>
    %58 = arith.addf %54, %57 : vector<2x96xf32>
    %59 = vector.extract_strided_slice %48 {offsets = [0, 0], sizes = [2, 32], strides = [1, 1]} : vector<2x96xf32> to vector<2x32xf32>
    %60 = vector.extract_strided_slice %58 {offsets = [0, 0], sizes = [2, 32], strides = [1, 1]} : vector<2x96xf32> to vector<2x32xf32>
    %61 = arith.addf %59, %60 : vector<2x32xf32>
    %62 = arith.negf %61 : vector<2x32xf32>
    %63 = math.exp %62 : vector<2x32xf32>
    %cst_32 = arith.constant 1.000000e+00 : f32
    %64 = vector.broadcast %cst_32 : f32 to vector<2x32xf32>
    %65 = arith.addf %64, %63 : vector<2x32xf32>
    %66 = arith.divf %64, %65 : vector<2x32xf32>
    %67 = vector.extract_strided_slice %48 {offsets = [0, 32], sizes = [2, 32], strides = [1, 1]} : vector<2x96xf32> to vector<2x32xf32>
    %68 = vector.extract_strided_slice %58 {offsets = [0, 32], sizes = [2, 32], strides = [1, 1]} : vector<2x96xf32> to vector<2x32xf32>
    %69 = arith.addf %67, %68 : vector<2x32xf32>
    %70 = arith.negf %69 : vector<2x32xf32>
    %71 = math.exp %70 : vector<2x32xf32>
    %cst_33 = arith.constant 1.000000e+00 : f32
    %72 = vector.broadcast %cst_33 : f32 to vector<2x32xf32>
    %73 = arith.addf %72, %71 : vector<2x32xf32>
    %74 = arith.divf %72, %73 : vector<2x32xf32>
    %75 = vector.extract_strided_slice %48 {offsets = [0, 64], sizes = [2, 32], strides = [1, 1]} : vector<2x96xf32> to vector<2x32xf32>
    %76 = vector.extract_strided_slice %58 {offsets = [0, 64], sizes = [2, 32], strides = [1, 1]} : vector<2x96xf32> to vector<2x32xf32>
    %77 = arith.mulf %66, %76 : vector<2x32xf32>
    %78 = arith.addf %75, %77 : vector<2x32xf32>
    %79 = math.tanh %78 : vector<2x32xf32>
    %cst_34 = arith.constant 1.000000e+00 : f32
    %80 = vector.broadcast %cst_34 : f32 to vector<2x32xf32>
    %81 = arith.subf %80, %74 : vector<2x32xf32>
    %82 = arith.mulf %81, %79 : vector<2x32xf32>
    %83 = arith.mulf %74, %50 : vector<2x32xf32>
    %84 = arith.addf %82, %83 : vector<2x32xf32>
    %c1_35 = arith.constant 1 : index
    %c0_36 = arith.constant 0 : index
    %c0_37 = arith.constant 0 : index
    %85 = vector.load %arg11[%c1_35, %c0_36, %c0_37] : memref<4x2x32xf32, #tpu.memory_space<vmem>>, vector<1x2x32xf32>
    %86 = vector.shape_cast %85 : vector<1x2x32xf32> to vector<2x32xf32>
    %87 = vector.shape_cast %84 : vector<2x32xf32> to vector<1x2x32xf32>
    tpu.vector_store %arg11[%c1_35, %c0_36, %c0_37], %87 {strides = array<i32>} : memref<4x2x32xf32, #tpu.memory_space<vmem>>, vector<1x2x32xf32>,
    %c3_38 = arith.constant 3 : index
    %c0_39 = arith.constant 0 : index
    %c0_40 = arith.constant 0 : index
    %88 = vector.load %arg8[%c3_38, %c0_39, %c0_40] : memref<4x2x32xf32, #tpu.memory_space<vmem>>, vector<1x2x32xf32>
    %89 = vector.shape_cast %88 : vector<1x2x32xf32> to vector<2x32xf32>
    %90 = vector.shape_cast %84 : vector<2x32xf32> to vector<1x2x32xf32>
    tpu.vector_store %arg8[%c3_38, %c0_39, %c0_40], %90 {strides = array<i32>} : memref<4x2x32xf32, #tpu.memory_space<vmem>>, vector<1x2x32xf32>,
    %c0_41 = arith.constant 0 : index
    %c0_42 = arith.constant 0 : index
    %c0_43 = arith.constant 0 : index
    %91 = vector.load %arg3[%c0_41, %c0_42, %c0_43] : memref<4x2x96xf32, #tpu.memory_space<vmem>>, vector<1x2x96xf32>
    %92 = vector.shape_cast %91 : vector<1x2x96xf32> to vector<2x96xf32>
    %c2 = arith.constant 2 : index
    %c0_44 = arith.constant 0 : index
    %c0_45 = arith.constant 0 : index
    %93 = vector.load %arg11[%c2, %c0_44, %c0_45] : memref<4x2x32xf32, #tpu.memory_space<vmem>>, vector<1x2x32xf32>
    %94 = vector.shape_cast %93 : vector<1x2x32xf32> to vector<2x32xf32>
    %95 = arith.truncf %94 : vector<2x32xf32> to vector<2x32xbf16>
    %c2_46 = arith.constant 2 : index
    %c0_47 = arith.constant 0 : index
    %c0_48 = arith.constant 0 : index
    %96 = vector.load %arg5[%c2_46, %c0_47, %c0_48] : memref<4x32x96xbf16, #tpu.memory_space<vmem>>, vector<1x32x96xbf16>
    %97 = vector.shape_cast %96 : vector<1x32x96xbf16> to vector<32x96xbf16>
    %cst_49 = arith.constant dense<0.000000e+00> : vector<2x96xf32>
    %98 = tpu.matmul %95, %97, %cst_49 {dimension_numbers = #tpu.dot_dimension_numbers<[1], [0], [0], [1], [0, 0, 1, 1], [], []>} : vector<2x32xbf16>, vector<32x96xbf16>, vector<2x96xf32> -> vector<2x96xf32>
    %c2_50 = arith.constant 2 : index
    %c0_51 = arith.constant 0 : index
    %c0_52 = arith.constant 0 : index
    %99 = vector.load %arg6[%c2_50, %c0_51, %c0_52] : memref<4x1x96xf32, #tpu.memory_space<vmem>>, vector<1x1x96xf32>
    %100 = vector.shape_cast %99 : vector<1x1x96xf32> to vector<1x96xf32>
    %101 = vector.broadcast %100 : vector<1x96xf32> to vector<2x96xf32>
    %102 = arith.addf %98, %101 : vector<2x96xf32>
    %103 = vector.extract_strided_slice %92 {offsets = [0, 0], sizes = [2, 32], strides = [1, 1]} : vector<2x96xf32> to vector<2x32xf32>
    %104 = vector.extract_strided_slice %102 {offsets = [0, 0], sizes = [2, 32], strides = [1, 1]} : vector<2x96xf32> to vector<2x32xf32>
    %105 = arith.addf %103, %104 : vector<2x32xf32>
    %106 = arith.negf %105 : vector<2x32xf32>
    %107 = math.exp %106 : vector<2x32xf32>
    %cst_53 = arith.constant 1.000000e+00 : f32
    %108 = vector.broadcast %cst_53 : f32 to vector<2x32xf32>
    %109 = arith.addf %108, %107 : vector<2x32xf32>
    %110 = arith.divf %108, %109 : vector<2x32xf32>
    %111 = vector.extract_strided_slice %92 {offsets = [0, 32], sizes = [2, 32], strides = [1, 1]} : vector<2x96xf32> to vector<2x32xf32>
    %112 = vector.extract_strided_slice %102 {offsets = [0, 32], sizes = [2, 32], strides = [1, 1]} : vector<2x96xf32> to vector<2x32xf32>
    %113 = arith.addf %111, %112 : vector<2x32xf32>
    %114 = arith.negf %113 : vector<2x32xf32>
    %115 = math.exp %114 : vector<2x32xf32>
    %cst_54 = arith.constant 1.000000e+00 : f32
    %116 = vector.broadcast %cst_54 : f32 to vector<2x32xf32>
    %117 = arith.addf %116, %115 : vector<2x32xf32>
    %118 = arith.divf %116, %117 : vector<2x32xf32>
    %119 = vector.extract_strided_slice %92 {offsets = [0, 64], sizes = [2, 32], strides = [1, 1]} : vector<2x96xf32> to vector<2x32xf32>
    %120 = vector.extract_strided_slice %102 {offsets = [0, 64], sizes = [2, 32], strides = [1, 1]} : vector<2x96xf32> to vector<2x32xf32>
    %121 = arith.mulf %110, %120 : vector<2x32xf32>
    %122 = arith.addf %119, %121 : vector<2x32xf32>
    %123 = math.tanh %122 : vector<2x32xf32>
    %cst_55 = arith.constant 1.000000e+00 : f32
    %124 = vector.broadcast %cst_55 : f32 to vector<2x32xf32>
    %125 = arith.subf %124, %118 : vector<2x32xf32>
    %126 = arith.mulf %125, %123 : vector<2x32xf32>
    %127 = arith.mulf %118, %94 : vector<2x32xf32>
    %128 = arith.addf %126, %127 : vector<2x32xf32>
    %c2_56 = arith.constant 2 : index
    %c0_57 = arith.constant 0 : index
    %c0_58 = arith.constant 0 : index
    %129 = vector.load %arg11[%c2_56, %c0_57, %c0_58] : memref<4x2x32xf32, #tpu.memory_space<vmem>>, vector<1x2x32xf32>
    %130 = vector.shape_cast %129 : vector<1x2x32xf32> to vector<2x32xf32>
    %131 = vector.shape_cast %128 : vector<2x32xf32> to vector<1x2x32xf32>
    tpu.vector_store %arg11[%c2_56, %c0_57, %c0_58], %131 {strides = array<i32>} : memref<4x2x32xf32, #tpu.memory_space<vmem>>, vector<1x2x32xf32>,
    %c0_59 = arith.constant 0 : index
    %c0_60 = arith.constant 0 : index
    %c0_61 = arith.constant 0 : index
    %132 = vector.load %arg9[%c0_59, %c0_60, %c0_61] : memref<4x2x32xf32, #tpu.memory_space<vmem>>, vector<1x2x32xf32>
    %133 = vector.shape_cast %132 : vector<1x2x32xf32> to vector<2x32xf32>
    %134 = vector.shape_cast %128 : vector<2x32xf32> to vector<1x2x32xf32>
    tpu.vector_store %arg9[%c0_59, %c0_60, %c0_61], %134 {strides = array<i32>} : memref<4x2x32xf32, #tpu.memory_space<vmem>>, vector<1x2x32xf32>,
    %c3_62 = arith.constant 3 : index
    %c0_63 = arith.constant 0 : index
    %c0_64 = arith.constant 0 : index
    %135 = vector.load %arg4[%c3_62, %c0_63, %c0_64] : memref<4x2x96xf32, #tpu.memory_space<vmem>>, vector<1x2x96xf32>
    %136 = vector.shape_cast %135 : vector<1x2x96xf32> to vector<2x96xf32>
    %c3_65 = arith.constant 3 : index
    %c0_66 = arith.constant 0 : index
    %c0_67 = arith.constant 0 : index
    %137 = vector.load %arg11[%c3_65, %c0_66, %c0_67] : memref<4x2x32xf32, #tpu.memory_space<vmem>>, vector<1x2x32xf32>
    %138 = vector.shape_cast %137 : vector<1x2x32xf32> to vector<2x32xf32>
    %139 = arith.truncf %138 : vector<2x32xf32> to vector<2x32xbf16>
    %c3_68 = arith.constant 3 : index
    %c0_69 = arith.constant 0 : index
    %c0_70 = arith.constant 0 : index
    %140 = vector.load %arg5[%c3_68, %c0_69, %c0_70] : memref<4x32x96xbf16, #tpu.memory_space<vmem>>, vector<1x32x96xbf16>
    %141 = vector.shape_cast %140 : vector<1x32x96xbf16> to vector<32x96xbf16>
    %cst_71 = arith.constant dense<0.000000e+00> : vector<2x96xf32>
    %142 = tpu.matmul %139, %141, %cst_71 {dimension_numbers = #tpu.dot_dimension_numbers<[1], [0], [0], [1], [0, 0, 1, 1], [], []>} : vector<2x32xbf16>, vector<32x96xbf16>, vector<2x96xf32> -> vector<2x96xf32>
    %c3_72 = arith.constant 3 : index
    %c0_73 = arith.constant 0 : index
    %c0_74 = arith.constant 0 : index
    %143 = vector.load %arg6[%c3_72, %c0_73, %c0_74] : memref<4x1x96xf32, #tpu.memory_space<vmem>>, vector<1x1x96xf32>
    %144 = vector.shape_cast %143 : vector<1x1x96xf32> to vector<1x96xf32>
    %145 = vector.broadcast %144 : vector<1x96xf32> to vector<2x96xf32>
    %146 = arith.addf %142, %145 : vector<2x96xf32>
    %147 = vector.extract_strided_slice %136 {offsets = [0, 0], sizes = [2, 32], strides = [1, 1]} : vector<2x96xf32> to vector<2x32xf32>
    %148 = vector.extract_strided_slice %146 {offsets = [0, 0], sizes = [2, 32], strides = [1, 1]} : vector<2x96xf32> to vector<2x32xf32>
    %149 = arith.addf %147, %148 : vector<2x32xf32>
    %150 = arith.negf %149 : vector<2x32xf32>
    %151 = math.exp %150 : vector<2x32xf32>
    %cst_75 = arith.constant 1.000000e+00 : f32
    %152 = vector.broadcast %cst_75 : f32 to vector<2x32xf32>
    %153 = arith.addf %152, %151 : vector<2x32xf32>
    %154 = arith.divf %152, %153 : vector<2x32xf32>
    %155 = vector.extract_strided_slice %136 {offsets = [0, 32], sizes = [2, 32], strides = [1, 1]} : vector<2x96xf32> to vector<2x32xf32>
    %156 = vector.extract_strided_slice %146 {offsets = [0, 32], sizes = [2, 32], strides = [1, 1]} : vector<2x96xf32> to vector<2x32xf32>
    %157 = arith.addf %155, %156 : vector<2x32xf32>
    %158 = arith.negf %157 : vector<2x32xf32>
    %159 = math.exp %158 : vector<2x32xf32>
    %cst_76 = arith.constant 1.000000e+00 : f32
    %160 = vector.broadcast %cst_76 : f32 to vector<2x32xf32>
    %161 = arith.addf %160, %159 : vector<2x32xf32>
    %162 = arith.divf %160, %161 : vector<2x32xf32>
    %163 = vector.extract_strided_slice %136 {offsets = [0, 64], sizes = [2, 32], strides = [1, 1]} : vector<2x96xf32> to vector<2x32xf32>
    %164 = vector.extract_strided_slice %146 {offsets = [0, 64], sizes = [2, 32], strides = [1, 1]} : vector<2x96xf32> to vector<2x32xf32>
    %165 = arith.mulf %154, %164 : vector<2x32xf32>
    %166 = arith.addf %163, %165 : vector<2x32xf32>
    %167 = math.tanh %166 : vector<2x32xf32>
    %cst_77 = arith.constant 1.000000e+00 : f32
    %168 = vector.broadcast %cst_77 : f32 to vector<2x32xf32>
    %169 = arith.subf %168, %162 : vector<2x32xf32>
    %170 = arith.mulf %169, %167 : vector<2x32xf32>
    %171 = arith.mulf %162, %138 : vector<2x32xf32>
    %172 = arith.addf %170, %171 : vector<2x32xf32>
    %c3_78 = arith.constant 3 : index
    %c0_79 = arith.constant 0 : index
    %c0_80 = arith.constant 0 : index
    %173 = vector.load %arg11[%c3_78, %c0_79, %c0_80] : memref<4x2x32xf32, #tpu.memory_space<vmem>>, vector<1x2x32xf32>
    %174 = vector.shape_cast %173 : vector<1x2x32xf32> to vector<2x32xf32>
    %175 = vector.shape_cast %172 : vector<2x32xf32> to vector<1x2x32xf32>
    tpu.vector_store %arg11[%c3_78, %c0_79, %c0_80], %175 {strides = array<i32>} : memref<4x2x32xf32, #tpu.memory_space<vmem>>, vector<1x2x32xf32>,
    %c3_81 = arith.constant 3 : index
    %c0_82 = arith.constant 0 : index
    %c0_83 = arith.constant 0 : index
    %176 = vector.load %arg10[%c3_81, %c0_82, %c0_83] : memref<4x2x32xf32, #tpu.memory_space<vmem>>, vector<1x2x32xf32>
    %177 = vector.shape_cast %176 : vector<1x2x32xf32> to vector<2x32xf32>
    %178 = vector.shape_cast %172 : vector<2x32xf32> to vector<1x2x32xf32>
    tpu.vector_store %arg10[%c3_81, %c0_82, %c0_83], %178 {strides = array<i32>} : memref<4x2x32xf32, #tpu.memory_space<vmem>>, vector<1x2x32xf32>,
    %c1_84 = arith.constant 1 : index
    %c0_85 = arith.constant 0 : index
    %c0_86 = arith.constant 0 : index
    %179 = vector.load %arg1[%c1_84, %c0_85, %c0_86] : memref<4x2x96xf32, #tpu.memory_space<vmem>>, vector<1x2x96xf32>
    %180 = vector.shape_cast %179 : vector<1x2x96xf32> to vector<2x96xf32>
    %c0_87 = arith.constant 0 : index
    %c0_88 = arith.constant 0 : index
    %c0_89 = arith.constant 0 : index
    %181 = vector.load %arg11[%c0_87, %c0_88, %c0_89] : memref<4x2x32xf32, #tpu.memory_space<vmem>>, vector<1x2x32xf32>
    %182 = vector.shape_cast %181 : vector<1x2x32xf32> to vector<2x32xf32>
    %183 = arith.truncf %182 : vector<2x32xf32> to vector<2x32xbf16>
    %c0_90 = arith.constant 0 : index
    %c0_91 = arith.constant 0 : index
    %c0_92 = arith.constant 0 : index
    %184 = vector.load %arg5[%c0_90, %c0_91, %c0_92] : memref<4x32x96xbf16, #tpu.memory_space<vmem>>, vector<1x32x96xbf16>
    %185 = vector.shape_cast %184 : vector<1x32x96xbf16> to vector<32x96xbf16>
    %cst_93 = arith.constant dense<0.000000e+00> : vector<2x96xf32>
    %186 = tpu.matmul %183, %185, %cst_93 {dimension_numbers = #tpu.dot_dimension_numbers<[1], [0], [0], [1], [0, 0, 1, 1], [], []>} : vector<2x32xbf16>, vector<32x96xbf16>, vector<2x96xf32> -> vector<2x96xf32>
    %c0_94 = arith.constant 0 : index
    %c0_95 = arith.constant 0 : index
    %c0_96 = arith.constant 0 : index
    %187 = vector.load %arg6[%c0_94, %c0_95, %c0_96] : memref<4x1x96xf32, #tpu.memory_space<vmem>>, vector<1x1x96xf32>
    %188 = vector.shape_cast %187 : vector<1x1x96xf32> to vector<1x96xf32>
    %189 = vector.broadcast %188 : vector<1x96xf32> to vector<2x96xf32>
    %190 = arith.addf %186, %189 : vector<2x96xf32>
    %191 = vector.extract_strided_slice %180 {offsets = [0, 0], sizes = [2, 32], strides = [1, 1]} : vector<2x96xf32> to vector<2x32xf32>
    %192 = vector.extract_strided_slice %190 {offsets = [0, 0], sizes = [2, 32], strides = [1, 1]} : vector<2x96xf32> to vector<2x32xf32>
    %193 = arith.addf %191, %192 : vector<2x32xf32>
    %194 = arith.negf %193 : vector<2x32xf32>
    %195 = math.exp %194 : vector<2x32xf32>
    %cst_97 = arith.constant 1.000000e+00 : f32
    %196 = vector.broadcast %cst_97 : f32 to vector<2x32xf32>
    %197 = arith.addf %196, %195 : vector<2x32xf32>
    %198 = arith.divf %196, %197 : vector<2x32xf32>
    %199 = vector.extract_strided_slice %180 {offsets = [0, 32], sizes = [2, 32], strides = [1, 1]} : vector<2x96xf32> to vector<2x32xf32>
    %200 = vector.extract_strided_slice %190 {offsets = [0, 32], sizes = [2, 32], strides = [1, 1]} : vector<2x96xf32> to vector<2x32xf32>
    %201 = arith.addf %199, %200 : vector<2x32xf32>
    %202 = arith.negf %201 : vector<2x32xf32>
    %203 = math.exp %202 : vector<2x32xf32>
    %cst_98 = arith.constant 1.000000e+00 : f32
    %204 = vector.broadcast %cst_98 : f32 to vector<2x32xf32>
    %205 = arith.addf %204, %203 : vector<2x32xf32>
    %206 = arith.divf %204, %205 : vector<2x32xf32>
    %207 = vector.extract_strided_slice %180 {offsets = [0, 64], sizes = [2, 32], strides = [1, 1]} : vector<2x96xf32> to vector<2x32xf32>
    %208 = vector.extract_strided_slice %190 {offsets = [0, 64], sizes = [2, 32], strides = [1, 1]} : vector<2x96xf32> to vector<2x32xf32>
    %209 = arith.mulf %198, %208 : vector<2x32xf32>
    %210 = arith.addf %207, %209 : vector<2x32xf32>
    %211 = math.tanh %210 : vector<2x32xf32>
    %cst_99 = arith.constant 1.000000e+00 : f32
    %212 = vector.broadcast %cst_99 : f32 to vector<2x32xf32>
    %213 = arith.subf %212, %206 : vector<2x32xf32>
    %214 = arith.mulf %213, %211 : vector<2x32xf32>
    %215 = arith.mulf %206, %182 : vector<2x32xf32>
    %216 = arith.addf %214, %215 : vector<2x32xf32>
    %c0_100 = arith.constant 0 : index
    %c0_101 = arith.constant 0 : index
    %c0_102 = arith.constant 0 : index
    %217 = vector.load %arg11[%c0_100, %c0_101, %c0_102] : memref<4x2x32xf32, #tpu.memory_space<vmem>>, vector<1x2x32xf32>
    %218 = vector.shape_cast %217 : vector<1x2x32xf32> to vector<2x32xf32>
    %219 = vector.shape_cast %216 : vector<2x32xf32> to vector<1x2x32xf32>
    tpu.vector_store %arg11[%c0_100, %c0_101, %c0_102], %219 {strides = array<i32>} : memref<4x2x32xf32, #tpu.memory_space<vmem>>, vector<1x2x32xf32>,
    %c1_103 = arith.constant 1 : index
    %c0_104 = arith.constant 0 : index
    %c0_105 = arith.constant 0 : index
    %220 = vector.load %arg7[%c1_103, %c0_104, %c0_105] : memref<4x2x32xf32, #tpu.memory_space<vmem>>, vector<1x2x32xf32>
    %221 = vector.shape_cast %220 : vector<1x2x32xf32> to vector<2x32xf32>
    %222 = vector.shape_cast %216 : vector<2x32xf32> to vector<1x2x32xf32>
    tpu.vector_store %arg7[%c1_103, %c0_104, %c0_105], %222 {strides = array<i32>} : memref<4x2x32xf32, #tpu.memory_space<vmem>>, vector<1x2x32xf32>,
    %c2_106 = arith.constant 2 : index
    %c0_107 = arith.constant 0 : index
    %c0_108 = arith.constant 0 : index
    %223 = vector.load %arg2[%c2_106, %c0_107, %c0_108] : memref<4x2x96xf32, #tpu.memory_space<vmem>>, vector<1x2x96xf32>
    %224 = vector.shape_cast %223 : vector<1x2x96xf32> to vector<2x96xf32>
    %c1_109 = arith.constant 1 : index
    %c0_110 = arith.constant 0 : index
    %c0_111 = arith.constant 0 : index
    %225 = vector.load %arg11[%c1_109, %c0_110, %c0_111] : memref<4x2x32xf32, #tpu.memory_space<vmem>>, vector<1x2x32xf32>
    %226 = vector.shape_cast %225 : vector<1x2x32xf32> to vector<2x32xf32>
    %227 = arith.truncf %226 : vector<2x32xf32> to vector<2x32xbf16>
    %c1_112 = arith.constant 1 : index
    %c0_113 = arith.constant 0 : index
    %c0_114 = arith.constant 0 : index
    %228 = vector.load %arg5[%c1_112, %c0_113, %c0_114] : memref<4x32x96xbf16, #tpu.memory_space<vmem>>, vector<1x32x96xbf16>
    %229 = vector.shape_cast %228 : vector<1x32x96xbf16> to vector<32x96xbf16>
    %cst_115 = arith.constant dense<0.000000e+00> : vector<2x96xf32>
    %230 = tpu.matmul %227, %229, %cst_115 {dimension_numbers = #tpu.dot_dimension_numbers<[1], [0], [0], [1], [0, 0, 1, 1], [], []>} : vector<2x32xbf16>, vector<32x96xbf16>, vector<2x96xf32> -> vector<2x96xf32>
    %c1_116 = arith.constant 1 : index
    %c0_117 = arith.constant 0 : index
    %c0_118 = arith.constant 0 : index
    %231 = vector.load %arg6[%c1_116, %c0_117, %c0_118] : memref<4x1x96xf32, #tpu.memory_space<vmem>>, vector<1x1x96xf32>
    %232 = vector.shape_cast %231 : vector<1x1x96xf32> to vector<1x96xf32>
    %233 = vector.broadcast %232 : vector<1x96xf32> to vector<2x96xf32>
    %234 = arith.addf %230, %233 : vector<2x96xf32>
    %235 = vector.extract_strided_slice %224 {offsets = [0, 0], sizes = [2, 32], strides = [1, 1]} : vector<2x96xf32> to vector<2x32xf32>
    %236 = vector.extract_strided_slice %234 {offsets = [0, 0], sizes = [2, 32], strides = [1, 1]} : vector<2x96xf32> to vector<2x32xf32>
    %237 = arith.addf %235, %236 : vector<2x32xf32>
    %238 = arith.negf %237 : vector<2x32xf32>
    %239 = math.exp %238 : vector<2x32xf32>
    %cst_119 = arith.constant 1.000000e+00 : f32
    %240 = vector.broadcast %cst_119 : f32 to vector<2x32xf32>
    %241 = arith.addf %240, %239 : vector<2x32xf32>
    %242 = arith.divf %240, %241 : vector<2x32xf32>
    %243 = vector.extract_strided_slice %224 {offsets = [0, 32], sizes = [2, 32], strides = [1, 1]} : vector<2x96xf32> to vector<2x32xf32>
    %244 = vector.extract_strided_slice %234 {offsets = [0, 32], sizes = [2, 32], strides = [1, 1]} : vector<2x96xf32> to vector<2x32xf32>
    %245 = arith.addf %243, %244 : vector<2x32xf32>
    %246 = arith.negf %245 : vector<2x32xf32>
    %247 = math.exp %246 : vector<2x32xf32>
    %cst_120 = arith.constant 1.000000e+00 : f32
    %248 = vector.broadcast %cst_120 : f32 to vector<2x32xf32>
    %249 = arith.addf %248, %247 : vector<2x32xf32>
    %250 = arith.divf %248, %249 : vector<2x32xf32>
    %251 = vector.extract_strided_slice %224 {offsets = [0, 64], sizes = [2, 32], strides = [1, 1]} : vector<2x96xf32> to vector<2x32xf32>
    %252 = vector.extract_strided_slice %234 {offsets = [0, 64], sizes = [2, 32], strides = [1, 1]} : vector<2x96xf32> to vector<2x32xf32>
    %253 = arith.mulf %242, %252 : vector<2x32xf32>
    %254 = arith.addf %251, %253 : vector<2x32xf32>
    %255 = math.tanh %254 : vector<2x32xf32>
    %cst_121 = arith.constant 1.000000e+00 : f32
    %256 = vector.broadcast %cst_121 : f32 to vector<2x32xf32>
    %257 = arith.subf %256, %250 : vector<2x32xf32>
    %258 = arith.mulf %257, %255 : vector<2x32xf32>
    %259 = arith.mulf %250, %226 : vector<2x32xf32>
    %260 = arith.addf %258, %259 : vector<2x32xf32>
    %c1_122 = arith.constant 1 : index
    %c0_123 = arith.constant 0 : index
    %c0_124 = arith.constant 0 : index
    %261 = vector.load %arg11[%c1_122, %c0_123, %c0_124] : memref<4x2x32xf32, #tpu.memory_space<vmem>>, vector<1x2x32xf32>
    %262 = vector.shape_cast %261 : vector<1x2x32xf32> to vector<2x32xf32>
    %263 = vector.shape_cast %260 : vector<2x32xf32> to vector<1x2x32xf32>
    tpu.vector_store %arg11[%c1_122, %c0_123, %c0_124], %263 {strides = array<i32>} : memref<4x2x32xf32, #tpu.memory_space<vmem>>, vector<1x2x32xf32>,
    %c2_125 = arith.constant 2 : index
    %c0_126 = arith.constant 0 : index
    %c0_127 = arith.constant 0 : index
    %264 = vector.load %arg8[%c2_125, %c0_126, %c0_127] : memref<4x2x32xf32, #tpu.memory_space<vmem>>, vector<1x2x32xf32>
    %265 = vector.shape_cast %264 : vector<1x2x32xf32> to vector<2x32xf32>
    %266 = vector.shape_cast %260 : vector<2x32xf32> to vector<1x2x32xf32>
    tpu.vector_store %arg8[%c2_125, %c0_126, %c0_127], %266 {strides = array<i32>} : memref<4x2x32xf32, #tpu.memory_space<vmem>>, vector<1x2x32xf32>,
    %c1_128 = arith.constant 1 : index
    %c0_129 = arith.constant 0 : index
    %c0_130 = arith.constant 0 : index
    %267 = vector.load %arg3[%c1_128, %c0_129, %c0_130] : memref<4x2x96xf32, #tpu.memory_space<vmem>>, vector<1x2x96xf32>
    %268 = vector.shape_cast %267 : vector<1x2x96xf32> to vector<2x96xf32>
    %c2_131 = arith.constant 2 : index
    %c0_132 = arith.constant 0 : index
    %c0_133 = arith.constant 0 : index
    %269 = vector.load %arg11[%c2_131, %c0_132, %c0_133] : memref<4x2x32xf32, #tpu.memory_space<vmem>>, vector<1x2x32xf32>
    %270 = vector.shape_cast %269 : vector<1x2x32xf32> to vector<2x32xf32>
    %271 = arith.truncf %270 : vector<2x32xf32> to vector<2x32xbf16>
    %c2_134 = arith.constant 2 : index
    %c0_135 = arith.constant 0 : index
    %c0_136 = arith.constant 0 : index
    %272 = vector.load %arg5[%c2_134, %c0_135, %c0_136] : memref<4x32x96xbf16, #tpu.memory_space<vmem>>, vector<1x32x96xbf16>
    %273 = vector.shape_cast %272 : vector<1x32x96xbf16> to vector<32x96xbf16>
    %cst_137 = arith.constant dense<0.000000e+00> : vector<2x96xf32>
    %274 = tpu.matmul %271, %273, %cst_137 {dimension_numbers = #tpu.dot_dimension_numbers<[1], [0], [0], [1], [0, 0, 1, 1], [], []>} : vector<2x32xbf16>, vector<32x96xbf16>, vector<2x96xf32> -> vector<2x96xf32>
    %c2_138 = arith.constant 2 : index
    %c0_139 = arith.constant 0 : index
    %c0_140 = arith.constant 0 : index
    %275 = vector.load %arg6[%c2_138, %c0_139, %c0_140] : memref<4x1x96xf32, #tpu.memory_space<vmem>>, vector<1x1x96xf32>
    %276 = vector.shape_cast %275 : vector<1x1x96xf32> to vector<1x96xf32>
    %277 = vector.broadcast %276 : vector<1x96xf32> to vector<2x96xf32>
    %278 = arith.addf %274, %277 : vector<2x96xf32>
    %279 = vector.extract_strided_slice %268 {offsets = [0, 0], sizes = [2, 32], strides = [1, 1]} : vector<2x96xf32> to vector<2x32xf32>
    %280 = vector.extract_strided_slice %278 {offsets = [0, 0], sizes = [2, 32], strides = [1, 1]} : vector<2x96xf32> to vector<2x32xf32>
    %281 = arith.addf %279, %280 : vector<2x32xf32>
    %282 = arith.negf %281 : vector<2x32xf32>
    %283 = math.exp %282 : vector<2x32xf32>
    %cst_141 = arith.constant 1.000000e+00 : f32
    %284 = vector.broadcast %cst_141 : f32 to vector<2x32xf32>
    %285 = arith.addf %284, %283 : vector<2x32xf32>
    %286 = arith.divf %284, %285 : vector<2x32xf32>
    %287 = vector.extract_strided_slice %268 {offsets = [0, 32], sizes = [2, 32], strides = [1, 1]} : vector<2x96xf32> to vector<2x32xf32>
    %288 = vector.extract_strided_slice %278 {offsets = [0, 32], sizes = [2, 32], strides = [1, 1]} : vector<2x96xf32> to vector<2x32xf32>
    %289 = arith.addf %287, %288 : vector<2x32xf32>
    %290 = arith.negf %289 : vector<2x32xf32>
    %291 = math.exp %290 : vector<2x32xf32>
    %cst_142 = arith.constant 1.000000e+00 : f32
    %292 = vector.broadcast %cst_142 : f32 to vector<2x32xf32>
    %293 = arith.addf %292, %291 : vector<2x32xf32>
    %294 = arith.divf %292, %293 : vector<2x32xf32>
    %295 = vector.extract_strided_slice %268 {offsets = [0, 64], sizes = [2, 32], strides = [1, 1]} : vector<2x96xf32> to vector<2x32xf32>
    %296 = vector.extract_strided_slice %278 {offsets = [0, 64], sizes = [2, 32], strides = [1, 1]} : vector<2x96xf32> to vector<2x32xf32>
    %297 = arith.mulf %286, %296 : vector<2x32xf32>
    %298 = arith.addf %295, %297 : vector<2x32xf32>
    %299 = math.tanh %298 : vector<2x32xf32>
    %cst_143 = arith.constant 1.000000e+00 : f32
    %300 = vector.broadcast %cst_143 : f32 to vector<2x32xf32>
    %301 = arith.subf %300, %294 : vector<2x32xf32>
    %302 = arith.mulf %301, %299 : vector<2x32xf32>
    %303 = arith.mulf %294, %270 : vector<2x32xf32>
    %304 = arith.addf %302, %303 : vector<2x32xf32>
    %c2_144 = arith.constant 2 : index
    %c0_145 = arith.constant 0 : index
    %c0_146 = arith.constant 0 : index
    %305 = vector.load %arg11[%c2_144, %c0_145, %c0_146] : memref<4x2x32xf32, #tpu.memory_space<vmem>>, vector<1x2x32xf32>
    %306 = vector.shape_cast %305 : vector<1x2x32xf32> to vector<2x32xf32>
    %307 = vector.shape_cast %304 : vector<2x32xf32> to vector<1x2x32xf32>
    tpu.vector_store %arg11[%c2_144, %c0_145, %c0_146], %307 {strides = array<i32>} : memref<4x2x32xf32, #tpu.memory_space<vmem>>, vector<1x2x32xf32>,
    %c1_147 = arith.constant 1 : index
    %c0_148 = arith.constant 0 : index
    %c0_149 = arith.constant 0 : index
    %308 = vector.load %arg9[%c1_147, %c0_148, %c0_149] : memref<4x2x32xf32, #tpu.memory_space<vmem>>, vector<1x2x32xf32>
    %309 = vector.shape_cast %308 : vector<1x2x32xf32> to vector<2x32xf32>
    %310 = vector.shape_cast %304 : vector<2x32xf32> to vector<1x2x32xf32>
    tpu.vector_store %arg9[%c1_147, %c0_148, %c0_149], %310 {strides = array<i32>} : memref<4x2x32xf32, #tpu.memory_space<vmem>>, vector<1x2x32xf32>,
    %c2_150 = arith.constant 2 : index
    %c0_151 = arith.constant 0 : index
    %c0_152 = arith.constant 0 : index
    %311 = vector.load %arg4[%c2_150, %c0_151, %c0_152] : memref<4x2x96xf32, #tpu.memory_space<vmem>>, vector<1x2x96xf32>
    %312 = vector.shape_cast %311 : vector<1x2x96xf32> to vector<2x96xf32>
    %c3_153 = arith.constant 3 : index
    %c0_154 = arith.constant 0 : index
    %c0_155 = arith.constant 0 : index
    %313 = vector.load %arg11[%c3_153, %c0_154, %c0_155] : memref<4x2x32xf32, #tpu.memory_space<vmem>>, vector<1x2x32xf32>
    %314 = vector.shape_cast %313 : vector<1x2x32xf32> to vector<2x32xf32>
    %315 = arith.truncf %314 : vector<2x32xf32> to vector<2x32xbf16>
    %c3_156 = arith.constant 3 : index
    %c0_157 = arith.constant 0 : index
    %c0_158 = arith.constant 0 : index
    %316 = vector.load %arg5[%c3_156, %c0_157, %c0_158] : memref<4x32x96xbf16, #tpu.memory_space<vmem>>, vector<1x32x96xbf16>
    %317 = vector.shape_cast %316 : vector<1x32x96xbf16> to vector<32x96xbf16>
    %cst_159 = arith.constant dense<0.000000e+00> : vector<2x96xf32>
    %318 = tpu.matmul %315, %317, %cst_159 {dimension_numbers = #tpu.dot_dimension_numbers<[1], [0], [0], [1], [0, 0, 1, 1], [], []>} : vector<2x32xbf16>, vector<32x96xbf16>, vector<2x96xf32> -> vector<2x96xf32>
    %c3_160 = arith.constant 3 : index
    %c0_161 = arith.constant 0 : index
    %c0_162 = arith.constant 0 : index
    %319 = vector.load %arg6[%c3_160, %c0_161, %c0_162] : memref<4x1x96xf32, #tpu.memory_space<vmem>>, vector<1x1x96xf32>
    %320 = vector.shape_cast %319 : vector<1x1x96xf32> to vector<1x96xf32>
    %321 = vector.broadcast %320 : vector<1x96xf32> to vector<2x96xf32>
    %322 = arith.addf %318, %321 : vector<2x96xf32>
    %323 = vector.extract_strided_slice %312 {offsets = [0, 0], sizes = [2, 32], strides = [1, 1]} : vector<2x96xf32> to vector<2x32xf32>
    %324 = vector.extract_strided_slice %322 {offsets = [0, 0], sizes = [2, 32], strides = [1, 1]} : vector<2x96xf32> to vector<2x32xf32>
    %325 = arith.addf %323, %324 : vector<2x32xf32>
    %326 = arith.negf %325 : vector<2x32xf32>
    %327 = math.exp %326 : vector<2x32xf32>
    %cst_163 = arith.constant 1.000000e+00 : f32
    %328 = vector.broadcast %cst_163 : f32 to vector<2x32xf32>
    %329 = arith.addf %328, %327 : vector<2x32xf32>
    %330 = arith.divf %328, %329 : vector<2x32xf32>
    %331 = vector.extract_strided_slice %312 {offsets = [0, 32], sizes = [2, 32], strides = [1, 1]} : vector<2x96xf32> to vector<2x32xf32>
    %332 = vector.extract_strided_slice %322 {offsets = [0, 32], sizes = [2, 32], strides = [1, 1]} : vector<2x96xf32> to vector<2x32xf32>
    %333 = arith.addf %331, %332 : vector<2x32xf32>
    %334 = arith.negf %333 : vector<2x32xf32>
    %335 = math.exp %334 : vector<2x32xf32>
    %cst_164 = arith.constant 1.000000e+00 : f32
    %336 = vector.broadcast %cst_164 : f32 to vector<2x32xf32>
    %337 = arith.addf %336, %335 : vector<2x32xf32>
    %338 = arith.divf %336, %337 : vector<2x32xf32>
    %339 = vector.extract_strided_slice %312 {offsets = [0, 64], sizes = [2, 32], strides = [1, 1]} : vector<2x96xf32> to vector<2x32xf32>
    %340 = vector.extract_strided_slice %322 {offsets = [0, 64], sizes = [2, 32], strides = [1, 1]} : vector<2x96xf32> to vector<2x32xf32>
    %341 = arith.mulf %330, %340 : vector<2x32xf32>
    %342 = arith.addf %339, %341 : vector<2x32xf32>
    %343 = math.tanh %342 : vector<2x32xf32>
    %cst_165 = arith.constant 1.000000e+00 : f32
    %344 = vector.broadcast %cst_165 : f32 to vector<2x32xf32>
    %345 = arith.subf %344, %338 : vector<2x32xf32>
    %346 = arith.mulf %345, %343 : vector<2x32xf32>
    %347 = arith.mulf %338, %314 : vector<2x32xf32>
    %348 = arith.addf %346, %347 : vector<2x32xf32>
    %c3_166 = arith.constant 3 : index
    %c0_167 = arith.constant 0 : index
    %c0_168 = arith.constant 0 : index
    %349 = vector.load %arg11[%c3_166, %c0_167, %c0_168] : memref<4x2x32xf32, #tpu.memory_space<vmem>>, vector<1x2x32xf32>
    %350 = vector.shape_cast %349 : vector<1x2x32xf32> to vector<2x32xf32>
    %351 = vector.shape_cast %348 : vector<2x32xf32> to vector<1x2x32xf32>
    tpu.vector_store %arg11[%c3_166, %c0_167, %c0_168], %351 {strides = array<i32>} : memref<4x2x32xf32, #tpu.memory_space<vmem>>, vector<1x2x32xf32>,
    %c2_169 = arith.constant 2 : index
    %c0_170 = arith.constant 0 : index
    %c0_171 = arith.constant 0 : index
    %352 = vector.load %arg10[%c2_169, %c0_170, %c0_171] : memref<4x2x32xf32, #tpu.memory_space<vmem>>, vector<1x2x32xf32>
    %353 = vector.shape_cast %352 : vector<1x2x32xf32> to vector<2x32xf32>
    %354 = vector.shape_cast %348 : vector<2x32xf32> to vector<1x2x32xf32>
    tpu.vector_store %arg10[%c2_169, %c0_170, %c0_171], %354 {strides = array<i32>} : memref<4x2x32xf32, #tpu.memory_space<vmem>>, vector<1x2x32xf32>,
    %c2_172 = arith.constant 2 : index
    %c0_173 = arith.constant 0 : index
    %c0_174 = arith.constant 0 : index
    %355 = vector.load %arg1[%c2_172, %c0_173, %c0_174] : memref<4x2x96xf32, #tpu.memory_space<vmem>>, vector<1x2x96xf32>
    %356 = vector.shape_cast %355 : vector<1x2x96xf32> to vector<2x96xf32>
    %c0_175 = arith.constant 0 : index
    %c0_176 = arith.constant 0 : index
    %c0_177 = arith.constant 0 : index
    %357 = vector.load %arg11[%c0_175, %c0_176, %c0_177] : memref<4x2x32xf32, #tpu.memory_space<vmem>>, vector<1x2x32xf32>
    %358 = vector.shape_cast %357 : vector<1x2x32xf32> to vector<2x32xf32>
    %359 = arith.truncf %358 : vector<2x32xf32> to vector<2x32xbf16>
    %c0_178 = arith.constant 0 : index
    %c0_179 = arith.constant 0 : index
    %c0_180 = arith.constant 0 : index
    %360 = vector.load %arg5[%c0_178, %c0_179, %c0_180] : memref<4x32x96xbf16, #tpu.memory_space<vmem>>, vector<1x32x96xbf16>
    %361 = vector.shape_cast %360 : vector<1x32x96xbf16> to vector<32x96xbf16>
    %cst_181 = arith.constant dense<0.000000e+00> : vector<2x96xf32>
    %362 = tpu.matmul %359, %361, %cst_181 {dimension_numbers = #tpu.dot_dimension_numbers<[1], [0], [0], [1], [0, 0, 1, 1], [], []>} : vector<2x32xbf16>, vector<32x96xbf16>, vector<2x96xf32> -> vector<2x96xf32>
    %c0_182 = arith.constant 0 : index
    %c0_183 = arith.constant 0 : index
    %c0_184 = arith.constant 0 : index
    %363 = vector.load %arg6[%c0_182, %c0_183, %c0_184] : memref<4x1x96xf32, #tpu.memory_space<vmem>>, vector<1x1x96xf32>
    %364 = vector.shape_cast %363 : vector<1x1x96xf32> to vector<1x96xf32>
    %365 = vector.broadcast %364 : vector<1x96xf32> to vector<2x96xf32>
    %366 = arith.addf %362, %365 : vector<2x96xf32>
    %367 = vector.extract_strided_slice %356 {offsets = [0, 0], sizes = [2, 32], strides = [1, 1]} : vector<2x96xf32> to vector<2x32xf32>
    %368 = vector.extract_strided_slice %366 {offsets = [0, 0], sizes = [2, 32], strides = [1, 1]} : vector<2x96xf32> to vector<2x32xf32>
    %369 = arith.addf %367, %368 : vector<2x32xf32>
    %370 = arith.negf %369 : vector<2x32xf32>
    %371 = math.exp %370 : vector<2x32xf32>
    %cst_185 = arith.constant 1.000000e+00 : f32
    %372 = vector.broadcast %cst_185 : f32 to vector<2x32xf32>
    %373 = arith.addf %372, %371 : vector<2x32xf32>
    %374 = arith.divf %372, %373 : vector<2x32xf32>
    %375 = vector.extract_strided_slice %356 {offsets = [0, 32], sizes = [2, 32], strides = [1, 1]} : vector<2x96xf32> to vector<2x32xf32>
    %376 = vector.extract_strided_slice %366 {offsets = [0, 32], sizes = [2, 32], strides = [1, 1]} : vector<2x96xf32> to vector<2x32xf32>
    %377 = arith.addf %375, %376 : vector<2x32xf32>
    %378 = arith.negf %377 : vector<2x32xf32>
    %379 = math.exp %378 : vector<2x32xf32>
    %cst_186 = arith.constant 1.000000e+00 : f32
    %380 = vector.broadcast %cst_186 : f32 to vector<2x32xf32>
    %381 = arith.addf %380, %379 : vector<2x32xf32>
    %382 = arith.divf %380, %381 : vector<2x32xf32>
    %383 = vector.extract_strided_slice %356 {offsets = [0, 64], sizes = [2, 32], strides = [1, 1]} : vector<2x96xf32> to vector<2x32xf32>
    %384 = vector.extract_strided_slice %366 {offsets = [0, 64], sizes = [2, 32], strides = [1, 1]} : vector<2x96xf32> to vector<2x32xf32>
    %385 = arith.mulf %374, %384 : vector<2x32xf32>
    %386 = arith.addf %383, %385 : vector<2x32xf32>
    %387 = math.tanh %386 : vector<2x32xf32>
    %cst_187 = arith.constant 1.000000e+00 : f32
    %388 = vector.broadcast %cst_187 : f32 to vector<2x32xf32>
    %389 = arith.subf %388, %382 : vector<2x32xf32>
    %390 = arith.mulf %389, %387 : vector<2x32xf32>
    %391 = arith.mulf %382, %358 : vector<2x32xf32>
    %392 = arith.addf %390, %391 : vector<2x32xf32>
    %c0_188 = arith.constant 0 : index
    %c0_189 = arith.constant 0 : index
    %c0_190 = arith.constant 0 : index
    %393 = vector.load %arg11[%c0_188, %c0_189, %c0_190] : memref<4x2x32xf32, #tpu.memory_space<vmem>>, vector<1x2x32xf32>
    %394 = vector.shape_cast %393 : vector<1x2x32xf32> to vector<2x32xf32>
    %395 = vector.shape_cast %392 : vector<2x32xf32> to vector<1x2x32xf32>
    tpu.vector_store %arg11[%c0_188, %c0_189, %c0_190], %395 {strides = array<i32>} : memref<4x2x32xf32, #tpu.memory_space<vmem>>, vector<1x2x32xf32>,
    %c2_191 = arith.constant 2 : index
    %c0_192 = arith.constant 0 : index
    %c0_193 = arith.constant 0 : index
    %396 = vector.load %arg7[%c2_191, %c0_192, %c0_193] : memref<4x2x32xf32, #tpu.memory_space<vmem>>, vector<1x2x32xf32>
    %397 = vector.shape_cast %396 : vector<1x2x32xf32> to vector<2x32xf32>
    %398 = vector.shape_cast %392 : vector<2x32xf32> to vector<1x2x32xf32>
    tpu.vector_store %arg7[%c2_191, %c0_192, %c0_193], %398 {strides = array<i32>} : memref<4x2x32xf32, #tpu.memory_space<vmem>>, vector<1x2x32xf32>,
    %c1_194 = arith.constant 1 : index
    %c0_195 = arith.constant 0 : index
    %c0_196 = arith.constant 0 : index
    %399 = vector.load %arg2[%c1_194, %c0_195, %c0_196] : memref<4x2x96xf32, #tpu.memory_space<vmem>>, vector<1x2x96xf32>
    %400 = vector.shape_cast %399 : vector<1x2x96xf32> to vector<2x96xf32>
    %c1_197 = arith.constant 1 : index
    %c0_198 = arith.constant 0 : index
    %c0_199 = arith.constant 0 : index
    %401 = vector.load %arg11[%c1_197, %c0_198, %c0_199] : memref<4x2x32xf32, #tpu.memory_space<vmem>>, vector<1x2x32xf32>
    %402 = vector.shape_cast %401 : vector<1x2x32xf32> to vector<2x32xf32>
    %403 = arith.truncf %402 : vector<2x32xf32> to vector<2x32xbf16>
    %c1_200 = arith.constant 1 : index
    %c0_201 = arith.constant 0 : index
    %c0_202 = arith.constant 0 : index
    %404 = vector.load %arg5[%c1_200, %c0_201, %c0_202] : memref<4x32x96xbf16, #tpu.memory_space<vmem>>, vector<1x32x96xbf16>
    %405 = vector.shape_cast %404 : vector<1x32x96xbf16> to vector<32x96xbf16>
    %cst_203 = arith.constant dense<0.000000e+00> : vector<2x96xf32>
    %406 = tpu.matmul %403, %405, %cst_203 {dimension_numbers = #tpu.dot_dimension_numbers<[1], [0], [0], [1], [0, 0, 1, 1], [], []>} : vector<2x32xbf16>, vector<32x96xbf16>, vector<2x96xf32> -> vector<2x96xf32>
    %c1_204 = arith.constant 1 : index
    %c0_205 = arith.constant 0 : index
    %c0_206 = arith.constant 0 : index
    %407 = vector.load %arg6[%c1_204, %c0_205, %c0_206] : memref<4x1x96xf32, #tpu.memory_space<vmem>>, vector<1x1x96xf32>
    %408 = vector.shape_cast %407 : vector<1x1x96xf32> to vector<1x96xf32>
    %409 = vector.broadcast %408 : vector<1x96xf32> to vector<2x96xf32>
    %410 = arith.addf %406, %409 : vector<2x96xf32>
    %411 = vector.extract_strided_slice %400 {offsets = [0, 0], sizes = [2, 32], strides = [1, 1]} : vector<2x96xf32> to vector<2x32xf32>
    %412 = vector.extract_strided_slice %410 {offsets = [0, 0], sizes = [2, 32], strides = [1, 1]} : vector<2x96xf32> to vector<2x32xf32>
    %413 = arith.addf %411, %412 : vector<2x32xf32>
    %414 = arith.negf %413 : vector<2x32xf32>
    %415 = math.exp %414 : vector<2x32xf32>
    %cst_207 = arith.constant 1.000000e+00 : f32
    %416 = vector.broadcast %cst_207 : f32 to vector<2x32xf32>
    %417 = arith.addf %416, %415 : vector<2x32xf32>
    %418 = arith.divf %416, %417 : vector<2x32xf32>
    %419 = vector.extract_strided_slice %400 {offsets = [0, 32], sizes = [2, 32], strides = [1, 1]} : vector<2x96xf32> to vector<2x32xf32>
    %420 = vector.extract_strided_slice %410 {offsets = [0, 32], sizes = [2, 32], strides = [1, 1]} : vector<2x96xf32> to vector<2x32xf32>
    %421 = arith.addf %419, %420 : vector<2x32xf32>
    %422 = arith.negf %421 : vector<2x32xf32>
    %423 = math.exp %422 : vector<2x32xf32>
    %cst_208 = arith.constant 1.000000e+00 : f32
    %424 = vector.broadcast %cst_208 : f32 to vector<2x32xf32>
    %425 = arith.addf %424, %423 : vector<2x32xf32>
    %426 = arith.divf %424, %425 : vector<2x32xf32>
    %427 = vector.extract_strided_slice %400 {offsets = [0, 64], sizes = [2, 32], strides = [1, 1]} : vector<2x96xf32> to vector<2x32xf32>
    %428 = vector.extract_strided_slice %410 {offsets = [0, 64], sizes = [2, 32], strides = [1, 1]} : vector<2x96xf32> to vector<2x32xf32>
    %429 = arith.mulf %418, %428 : vector<2x32xf32>
    %430 = arith.addf %427, %429 : vector<2x32xf32>
    %431 = math.tanh %430 : vector<2x32xf32>
    %cst_209 = arith.constant 1.000000e+00 : f32
    %432 = vector.broadcast %cst_209 : f32 to vector<2x32xf32>
    %433 = arith.subf %432, %426 : vector<2x32xf32>
    %434 = arith.mulf %433, %431 : vector<2x32xf32>
    %435 = arith.mulf %426, %402 : vector<2x32xf32>
    %436 = arith.addf %434, %435 : vector<2x32xf32>
    %c1_210 = arith.constant 1 : index
    %c0_211 = arith.constant 0 : index
    %c0_212 = arith.constant 0 : index
    %437 = vector.load %arg11[%c1_210, %c0_211, %c0_212] : memref<4x2x32xf32, #tpu.memory_space<vmem>>, vector<1x2x32xf32>
    %438 = vector.shape_cast %437 : vector<1x2x32xf32> to vector<2x32xf32>
    %439 = vector.shape_cast %436 : vector<2x32xf32> to vector<1x2x32xf32>
    tpu.vector_store %arg11[%c1_210, %c0_211, %c0_212], %439 {strides = array<i32>} : memref<4x2x32xf32, #tpu.memory_space<vmem>>, vector<1x2x32xf32>,
    %c1_213 = arith.constant 1 : index
    %c0_214 = arith.constant 0 : index
    %c0_215 = arith.constant 0 : index
    %440 = vector.load %arg8[%c1_213, %c0_214, %c0_215] : memref<4x2x32xf32, #tpu.memory_space<vmem>>, vector<1x2x32xf32>
    %441 = vector.shape_cast %440 : vector<1x2x32xf32> to vector<2x32xf32>
    %442 = vector.shape_cast %436 : vector<2x32xf32> to vector<1x2x32xf32>
    tpu.vector_store %arg8[%c1_213, %c0_214, %c0_215], %442 {strides = array<i32>} : memref<4x2x32xf32, #tpu.memory_space<vmem>>, vector<1x2x32xf32>,
    %c2_216 = arith.constant 2 : index
    %c0_217 = arith.constant 0 : index
    %c0_218 = arith.constant 0 : index
    %443 = vector.load %arg3[%c2_216, %c0_217, %c0_218] : memref<4x2x96xf32, #tpu.memory_space<vmem>>, vector<1x2x96xf32>
    %444 = vector.shape_cast %443 : vector<1x2x96xf32> to vector<2x96xf32>
    %c2_219 = arith.constant 2 : index
    %c0_220 = arith.constant 0 : index
    %c0_221 = arith.constant 0 : index
    %445 = vector.load %arg11[%c2_219, %c0_220, %c0_221] : memref<4x2x32xf32, #tpu.memory_space<vmem>>, vector<1x2x32xf32>
    %446 = vector.shape_cast %445 : vector<1x2x32xf32> to vector<2x32xf32>
    %447 = arith.truncf %446 : vector<2x32xf32> to vector<2x32xbf16>
    %c2_222 = arith.constant 2 : index
    %c0_223 = arith.constant 0 : index
    %c0_224 = arith.constant 0 : index
    %448 = vector.load %arg5[%c2_222, %c0_223, %c0_224] : memref<4x32x96xbf16, #tpu.memory_space<vmem>>, vector<1x32x96xbf16>
    %449 = vector.shape_cast %448 : vector<1x32x96xbf16> to vector<32x96xbf16>
    %cst_225 = arith.constant dense<0.000000e+00> : vector<2x96xf32>
    %450 = tpu.matmul %447, %449, %cst_225 {dimension_numbers = #tpu.dot_dimension_numbers<[1], [0], [0], [1], [0, 0, 1, 1], [], []>} : vector<2x32xbf16>, vector<32x96xbf16>, vector<2x96xf32> -> vector<2x96xf32>
    %c2_226 = arith.constant 2 : index
    %c0_227 = arith.constant 0 : index
    %c0_228 = arith.constant 0 : index
    %451 = vector.load %arg6[%c2_226, %c0_227, %c0_228] : memref<4x1x96xf32, #tpu.memory_space<vmem>>, vector<1x1x96xf32>
    %452 = vector.shape_cast %451 : vector<1x1x96xf32> to vector<1x96xf32>
    %453 = vector.broadcast %452 : vector<1x96xf32> to vector<2x96xf32>
    %454 = arith.addf %450, %453 : vector<2x96xf32>
    %455 = vector.extract_strided_slice %444 {offsets = [0, 0], sizes = [2, 32], strides = [1, 1]} : vector<2x96xf32> to vector<2x32xf32>
    %456 = vector.extract_strided_slice %454 {offsets = [0, 0], sizes = [2, 32], strides = [1, 1]} : vector<2x96xf32> to vector<2x32xf32>
    %457 = arith.addf %455, %456 : vector<2x32xf32>
    %458 = arith.negf %457 : vector<2x32xf32>
    %459 = math.exp %458 : vector<2x32xf32>
    %cst_229 = arith.constant 1.000000e+00 : f32
    %460 = vector.broadcast %cst_229 : f32 to vector<2x32xf32>
    %461 = arith.addf %460, %459 : vector<2x32xf32>
    %462 = arith.divf %460, %461 : vector<2x32xf32>
    %463 = vector.extract_strided_slice %444 {offsets = [0, 32], sizes = [2, 32], strides = [1, 1]} : vector<2x96xf32> to vector<2x32xf32>
    %464 = vector.extract_strided_slice %454 {offsets = [0, 32], sizes = [2, 32], strides = [1, 1]} : vector<2x96xf32> to vector<2x32xf32>
    %465 = arith.addf %463, %464 : vector<2x32xf32>
    %466 = arith.negf %465 : vector<2x32xf32>
    %467 = math.exp %466 : vector<2x32xf32>
    %cst_230 = arith.constant 1.000000e+00 : f32
    %468 = vector.broadcast %cst_230 : f32 to vector<2x32xf32>
    %469 = arith.addf %468, %467 : vector<2x32xf32>
    %470 = arith.divf %468, %469 : vector<2x32xf32>
    %471 = vector.extract_strided_slice %444 {offsets = [0, 64], sizes = [2, 32], strides = [1, 1]} : vector<2x96xf32> to vector<2x32xf32>
    %472 = vector.extract_strided_slice %454 {offsets = [0, 64], sizes = [2, 32], strides = [1, 1]} : vector<2x96xf32> to vector<2x32xf32>
    %473 = arith.mulf %462, %472 : vector<2x32xf32>
    %474 = arith.addf %471, %473 : vector<2x32xf32>
    %475 = math.tanh %474 : vector<2x32xf32>
    %cst_231 = arith.constant 1.000000e+00 : f32
    %476 = vector.broadcast %cst_231 : f32 to vector<2x32xf32>
    %477 = arith.subf %476, %470 : vector<2x32xf32>
    %478 = arith.mulf %477, %475 : vector<2x32xf32>
    %479 = arith.mulf %470, %446 : vector<2x32xf32>
    %480 = arith.addf %478, %479 : vector<2x32xf32>
    %c2_232 = arith.constant 2 : index
    %c0_233 = arith.constant 0 : index
    %c0_234 = arith.constant 0 : index
    %481 = vector.load %arg11[%c2_232, %c0_233, %c0_234] : memref<4x2x32xf32, #tpu.memory_space<vmem>>, vector<1x2x32xf32>
    %482 = vector.shape_cast %481 : vector<1x2x32xf32> to vector<2x32xf32>
    %483 = vector.shape_cast %480 : vector<2x32xf32> to vector<1x2x32xf32>
    tpu.vector_store %arg11[%c2_232, %c0_233, %c0_234], %483 {strides = array<i32>} : memref<4x2x32xf32, #tpu.memory_space<vmem>>, vector<1x2x32xf32>,
    %c2_235 = arith.constant 2 : index
    %c0_236 = arith.constant 0 : index
    %c0_237 = arith.constant 0 : index
    %484 = vector.load %arg9[%c2_235, %c0_236, %c0_237] : memref<4x2x32xf32, #tpu.memory_space<vmem>>, vector<1x2x32xf32>
    %485 = vector.shape_cast %484 : vector<1x2x32xf32> to vector<2x32xf32>
    %486 = vector.shape_cast %480 : vector<2x32xf32> to vector<1x2x32xf32>
    tpu.vector_store %arg9[%c2_235, %c0_236, %c0_237], %486 {strides = array<i32>} : memref<4x2x32xf32, #tpu.memory_space<vmem>>, vector<1x2x32xf32>,
    %c1_238 = arith.constant 1 : index
    %c0_239 = arith.constant 0 : index
    %c0_240 = arith.constant 0 : index
    %487 = vector.load %arg4[%c1_238, %c0_239, %c0_240] : memref<4x2x96xf32, #tpu.memory_space<vmem>>, vector<1x2x96xf32>
    %488 = vector.shape_cast %487 : vector<1x2x96xf32> to vector<2x96xf32>
    %c3_241 = arith.constant 3 : index
    %c0_242 = arith.constant 0 : index
    %c0_243 = arith.constant 0 : index
    %489 = vector.load %arg11[%c3_241, %c0_242, %c0_243] : memref<4x2x32xf32, #tpu.memory_space<vmem>>, vector<1x2x32xf32>
    %490 = vector.shape_cast %489 : vector<1x2x32xf32> to vector<2x32xf32>
    %491 = arith.truncf %490 : vector<2x32xf32> to vector<2x32xbf16>
    %c3_244 = arith.constant 3 : index
    %c0_245 = arith.constant 0 : index
    %c0_246 = arith.constant 0 : index
    %492 = vector.load %arg5[%c3_244, %c0_245, %c0_246] : memref<4x32x96xbf16, #tpu.memory_space<vmem>>, vector<1x32x96xbf16>
    %493 = vector.shape_cast %492 : vector<1x32x96xbf16> to vector<32x96xbf16>
    %cst_247 = arith.constant dense<0.000000e+00> : vector<2x96xf32>
    %494 = tpu.matmul %491, %493, %cst_247 {dimension_numbers = #tpu.dot_dimension_numbers<[1], [0], [0], [1], [0, 0, 1, 1], [], []>} : vector<2x32xbf16>, vector<32x96xbf16>, vector<2x96xf32> -> vector<2x96xf32>
    %c3_248 = arith.constant 3 : index
    %c0_249 = arith.constant 0 : index
    %c0_250 = arith.constant 0 : index
    %495 = vector.load %arg6[%c3_248, %c0_249, %c0_250] : memref<4x1x96xf32, #tpu.memory_space<vmem>>, vector<1x1x96xf32>
    %496 = vector.shape_cast %495 : vector<1x1x96xf32> to vector<1x96xf32>
    %497 = vector.broadcast %496 : vector<1x96xf32> to vector<2x96xf32>
    %498 = arith.addf %494, %497 : vector<2x96xf32>
    %499 = vector.extract_strided_slice %488 {offsets = [0, 0], sizes = [2, 32], strides = [1, 1]} : vector<2x96xf32> to vector<2x32xf32>
    %500 = vector.extract_strided_slice %498 {offsets = [0, 0], sizes = [2, 32], strides = [1, 1]} : vector<2x96xf32> to vector<2x32xf32>
    %501 = arith.addf %499, %500 : vector<2x32xf32>
    %502 = arith.negf %501 : vector<2x32xf32>
    %503 = math.exp %502 : vector<2x32xf32>
    %cst_251 = arith.constant 1.000000e+00 : f32
    %504 = vector.broadcast %cst_251 : f32 to vector<2x32xf32>
    %505 = arith.addf %504, %503 : vector<2x32xf32>
    %506 = arith.divf %504, %505 : vector<2x32xf32>
    %507 = vector.extract_strided_slice %488 {offsets = [0, 32], sizes = [2, 32], strides = [1, 1]} : vector<2x96xf32> to vector<2x32xf32>
    %508 = vector.extract_strided_slice %498 {offsets = [0, 32], sizes = [2, 32], strides = [1, 1]} : vector<2x96xf32> to vector<2x32xf32>
    %509 = arith.addf %507, %508 : vector<2x32xf32>
    %510 = arith.negf %509 : vector<2x32xf32>
    %511 = math.exp %510 : vector<2x32xf32>
    %cst_252 = arith.constant 1.000000e+00 : f32
    %512 = vector.broadcast %cst_252 : f32 to vector<2x32xf32>
    %513 = arith.addf %512, %511 : vector<2x32xf32>
    %514 = arith.divf %512, %513 : vector<2x32xf32>
    %515 = vector.extract_strided_slice %488 {offsets = [0, 64], sizes = [2, 32], strides = [1, 1]} : vector<2x96xf32> to vector<2x32xf32>
    %516 = vector.extract_strided_slice %498 {offsets = [0, 64], sizes = [2, 32], strides = [1, 1]} : vector<2x96xf32> to vector<2x32xf32>
    %517 = arith.mulf %506, %516 : vector<2x32xf32>
    %518 = arith.addf %515, %517 : vector<2x32xf32>
    %519 = math.tanh %518 : vector<2x32xf32>
    %cst_253 = arith.constant 1.000000e+00 : f32
    %520 = vector.broadcast %cst_253 : f32 to vector<2x32xf32>
    %521 = arith.subf %520, %514 : vector<2x32xf32>
    %522 = arith.mulf %521, %519 : vector<2x32xf32>
    %523 = arith.mulf %514, %490 : vector<2x32xf32>
    %524 = arith.addf %522, %523 : vector<2x32xf32>
    %c3_254 = arith.constant 3 : index
    %c0_255 = arith.constant 0 : index
    %c0_256 = arith.constant 0 : index
    %525 = vector.load %arg11[%c3_254, %c0_255, %c0_256] : memref<4x2x32xf32, #tpu.memory_space<vmem>>, vector<1x2x32xf32>
    %526 = vector.shape_cast %525 : vector<1x2x32xf32> to vector<2x32xf32>
    %527 = vector.shape_cast %524 : vector<2x32xf32> to vector<1x2x32xf32>
    tpu.vector_store %arg11[%c3_254, %c0_255, %c0_256], %527 {strides = array<i32>} : memref<4x2x32xf32, #tpu.memory_space<vmem>>, vector<1x2x32xf32>,
    %c1_257 = arith.constant 1 : index
    %c0_258 = arith.constant 0 : index
    %c0_259 = arith.constant 0 : index
    %528 = vector.load %arg10[%c1_257, %c0_258, %c0_259] : memref<4x2x32xf32, #tpu.memory_space<vmem>>, vector<1x2x32xf32>
    %529 = vector.shape_cast %528 : vector<1x2x32xf32> to vector<2x32xf32>
    %530 = vector.shape_cast %524 : vector<2x32xf32> to vector<1x2x32xf32>
    tpu.vector_store %arg10[%c1_257, %c0_258, %c0_259], %530 {strides = array<i32>} : memref<4x2x32xf32, #tpu.memory_space<vmem>>, vector<1x2x32xf32>,
    %c3_260 = arith.constant 3 : index
    %c0_261 = arith.constant 0 : index
    %c0_262 = arith.constant 0 : index
    %531 = vector.load %arg1[%c3_260, %c0_261, %c0_262] : memref<4x2x96xf32, #tpu.memory_space<vmem>>, vector<1x2x96xf32>
    %532 = vector.shape_cast %531 : vector<1x2x96xf32> to vector<2x96xf32>
    %c0_263 = arith.constant 0 : index
    %c0_264 = arith.constant 0 : index
    %c0_265 = arith.constant 0 : index
    %533 = vector.load %arg11[%c0_263, %c0_264, %c0_265] : memref<4x2x32xf32, #tpu.memory_space<vmem>>, vector<1x2x32xf32>
    %534 = vector.shape_cast %533 : vector<1x2x32xf32> to vector<2x32xf32>
    %535 = arith.truncf %534 : vector<2x32xf32> to vector<2x32xbf16>
    %c0_266 = arith.constant 0 : index
    %c0_267 = arith.constant 0 : index
    %c0_268 = arith.constant 0 : index
    %536 = vector.load %arg5[%c0_266, %c0_267, %c0_268] : memref<4x32x96xbf16, #tpu.memory_space<vmem>>, vector<1x32x96xbf16>
    %537 = vector.shape_cast %536 : vector<1x32x96xbf16> to vector<32x96xbf16>
    %cst_269 = arith.constant dense<0.000000e+00> : vector<2x96xf32>
    %538 = tpu.matmul %535, %537, %cst_269 {dimension_numbers = #tpu.dot_dimension_numbers<[1], [0], [0], [1], [0, 0, 1, 1], [], []>} : vector<2x32xbf16>, vector<32x96xbf16>, vector<2x96xf32> -> vector<2x96xf32>
    %c0_270 = arith.constant 0 : index
    %c0_271 = arith.constant 0 : index
    %c0_272 = arith.constant 0 : index
    %539 = vector.load %arg6[%c0_270, %c0_271, %c0_272] : memref<4x1x96xf32, #tpu.memory_space<vmem>>, vector<1x1x96xf32>
    %540 = vector.shape_cast %539 : vector<1x1x96xf32> to vector<1x96xf32>
    %541 = vector.broadcast %540 : vector<1x96xf32> to vector<2x96xf32>
    %542 = arith.addf %538, %541 : vector<2x96xf32>
    %543 = vector.extract_strided_slice %532 {offsets = [0, 0], sizes = [2, 32], strides = [1, 1]} : vector<2x96xf32> to vector<2x32xf32>
    %544 = vector.extract_strided_slice %542 {offsets = [0, 0], sizes = [2, 32], strides = [1, 1]} : vector<2x96xf32> to vector<2x32xf32>
    %545 = arith.addf %543, %544 : vector<2x32xf32>
    %546 = arith.negf %545 : vector<2x32xf32>
    %547 = math.exp %546 : vector<2x32xf32>
    %cst_273 = arith.constant 1.000000e+00 : f32
    %548 = vector.broadcast %cst_273 : f32 to vector<2x32xf32>
    %549 = arith.addf %548, %547 : vector<2x32xf32>
    %550 = arith.divf %548, %549 : vector<2x32xf32>
    %551 = vector.extract_strided_slice %532 {offsets = [0, 32], sizes = [2, 32], strides = [1, 1]} : vector<2x96xf32> to vector<2x32xf32>
    %552 = vector.extract_strided_slice %542 {offsets = [0, 32], sizes = [2, 32], strides = [1, 1]} : vector<2x96xf32> to vector<2x32xf32>
    %553 = arith.addf %551, %552 : vector<2x32xf32>
    %554 = arith.negf %553 : vector<2x32xf32>
    %555 = math.exp %554 : vector<2x32xf32>
    %cst_274 = arith.constant 1.000000e+00 : f32
    %556 = vector.broadcast %cst_274 : f32 to vector<2x32xf32>
    %557 = arith.addf %556, %555 : vector<2x32xf32>
    %558 = arith.divf %556, %557 : vector<2x32xf32>
    %559 = vector.extract_strided_slice %532 {offsets = [0, 64], sizes = [2, 32], strides = [1, 1]} : vector<2x96xf32> to vector<2x32xf32>
    %560 = vector.extract_strided_slice %542 {offsets = [0, 64], sizes = [2, 32], strides = [1, 1]} : vector<2x96xf32> to vector<2x32xf32>
    %561 = arith.mulf %550, %560 : vector<2x32xf32>
    %562 = arith.addf %559, %561 : vector<2x32xf32>
    %563 = math.tanh %562 : vector<2x32xf32>
    %cst_275 = arith.constant 1.000000e+00 : f32
    %564 = vector.broadcast %cst_275 : f32 to vector<2x32xf32>
    %565 = arith.subf %564, %558 : vector<2x32xf32>
    %566 = arith.mulf %565, %563 : vector<2x32xf32>
    %567 = arith.mulf %558, %534 : vector<2x32xf32>
    %568 = arith.addf %566, %567 : vector<2x32xf32>
    %c0_276 = arith.constant 0 : index
    %c0_277 = arith.constant 0 : index
    %c0_278 = arith.constant 0 : index
    %569 = vector.load %arg11[%c0_276, %c0_277, %c0_278] : memref<4x2x32xf32, #tpu.memory_space<vmem>>, vector<1x2x32xf32>
    %570 = vector.shape_cast %569 : vector<1x2x32xf32> to vector<2x32xf32>
    %571 = vector.shape_cast %568 : vector<2x32xf32> to vector<1x2x32xf32>
    tpu.vector_store %arg11[%c0_276, %c0_277, %c0_278], %571 {strides = array<i32>} : memref<4x2x32xf32, #tpu.memory_space<vmem>>, vector<1x2x32xf32>,
    %c3_279 = arith.constant 3 : index
    %c0_280 = arith.constant 0 : index
    %c0_281 = arith.constant 0 : index
    %572 = vector.load %arg7[%c3_279, %c0_280, %c0_281] : memref<4x2x32xf32, #tpu.memory_space<vmem>>, vector<1x2x32xf32>
    %573 = vector.shape_cast %572 : vector<1x2x32xf32> to vector<2x32xf32>
    %574 = vector.shape_cast %568 : vector<2x32xf32> to vector<1x2x32xf32>
    tpu.vector_store %arg7[%c3_279, %c0_280, %c0_281], %574 {strides = array<i32>} : memref<4x2x32xf32, #tpu.memory_space<vmem>>, vector<1x2x32xf32>,
    %c0_282 = arith.constant 0 : index
    %c0_283 = arith.constant 0 : index
    %c0_284 = arith.constant 0 : index
    %575 = vector.load %arg2[%c0_282, %c0_283, %c0_284] : memref<4x2x96xf32, #tpu.memory_space<vmem>>, vector<1x2x96xf32>
    %576 = vector.shape_cast %575 : vector<1x2x96xf32> to vector<2x96xf32>
    %c1_285 = arith.constant 1 : index
    %c0_286 = arith.constant 0 : index
    %c0_287 = arith.constant 0 : index
    %577 = vector.load %arg11[%c1_285, %c0_286, %c0_287] : memref<4x2x32xf32, #tpu.memory_space<vmem>>, vector<1x2x32xf32>
    %578 = vector.shape_cast %577 : vector<1x2x32xf32> to vector<2x32xf32>
    %579 = arith.truncf %578 : vector<2x32xf32> to vector<2x32xbf16>
    %c1_288 = arith.constant 1 : index
    %c0_289 = arith.constant 0 : index
    %c0_290 = arith.constant 0 : index
    %580 = vector.load %arg5[%c1_288, %c0_289, %c0_290] : memref<4x32x96xbf16, #tpu.memory_space<vmem>>, vector<1x32x96xbf16>
    %581 = vector.shape_cast %580 : vector<1x32x96xbf16> to vector<32x96xbf16>
    %cst_291 = arith.constant dense<0.000000e+00> : vector<2x96xf32>
    %582 = tpu.matmul %579, %581, %cst_291 {dimension_numbers = #tpu.dot_dimension_numbers<[1], [0], [0], [1], [0, 0, 1, 1], [], []>} : vector<2x32xbf16>, vector<32x96xbf16>, vector<2x96xf32> -> vector<2x96xf32>
    %c1_292 = arith.constant 1 : index
    %c0_293 = arith.constant 0 : index
    %c0_294 = arith.constant 0 : index
    %583 = vector.load %arg6[%c1_292, %c0_293, %c0_294] : memref<4x1x96xf32, #tpu.memory_space<vmem>>, vector<1x1x96xf32>
    %584 = vector.shape_cast %583 : vector<1x1x96xf32> to vector<1x96xf32>
    %585 = vector.broadcast %584 : vector<1x96xf32> to vector<2x96xf32>
    %586 = arith.addf %582, %585 : vector<2x96xf32>
    %587 = vector.extract_strided_slice %576 {offsets = [0, 0], sizes = [2, 32], strides = [1, 1]} : vector<2x96xf32> to vector<2x32xf32>
    %588 = vector.extract_strided_slice %586 {offsets = [0, 0], sizes = [2, 32], strides = [1, 1]} : vector<2x96xf32> to vector<2x32xf32>
    %589 = arith.addf %587, %588 : vector<2x32xf32>
    %590 = arith.negf %589 : vector<2x32xf32>
    %591 = math.exp %590 : vector<2x32xf32>
    %cst_295 = arith.constant 1.000000e+00 : f32
    %592 = vector.broadcast %cst_295 : f32 to vector<2x32xf32>
    %593 = arith.addf %592, %591 : vector<2x32xf32>
    %594 = arith.divf %592, %593 : vector<2x32xf32>
    %595 = vector.extract_strided_slice %576 {offsets = [0, 32], sizes = [2, 32], strides = [1, 1]} : vector<2x96xf32> to vector<2x32xf32>
    %596 = vector.extract_strided_slice %586 {offsets = [0, 32], sizes = [2, 32], strides = [1, 1]} : vector<2x96xf32> to vector<2x32xf32>
    %597 = arith.addf %595, %596 : vector<2x32xf32>
    %598 = arith.negf %597 : vector<2x32xf32>
    %599 = math.exp %598 : vector<2x32xf32>
    %cst_296 = arith.constant 1.000000e+00 : f32
    %600 = vector.broadcast %cst_296 : f32 to vector<2x32xf32>
    %601 = arith.addf %600, %599 : vector<2x32xf32>
    %602 = arith.divf %600, %601 : vector<2x32xf32>
    %603 = vector.extract_strided_slice %576 {offsets = [0, 64], sizes = [2, 32], strides = [1, 1]} : vector<2x96xf32> to vector<2x32xf32>
    %604 = vector.extract_strided_slice %586 {offsets = [0, 64], sizes = [2, 32], strides = [1, 1]} : vector<2x96xf32> to vector<2x32xf32>
    %605 = arith.mulf %594, %604 : vector<2x32xf32>
    %606 = arith.addf %603, %605 : vector<2x32xf32>
    %607 = math.tanh %606 : vector<2x32xf32>
    %cst_297 = arith.constant 1.000000e+00 : f32
    %608 = vector.broadcast %cst_297 : f32 to vector<2x32xf32>
    %609 = arith.subf %608, %602 : vector<2x32xf32>
    %610 = arith.mulf %609, %607 : vector<2x32xf32>
    %611 = arith.mulf %602, %578 : vector<2x32xf32>
    %612 = arith.addf %610, %611 : vector<2x32xf32>
    %c1_298 = arith.constant 1 : index
    %c0_299 = arith.constant 0 : index
    %c0_300 = arith.constant 0 : index
    %613 = vector.load %arg11[%c1_298, %c0_299, %c0_300] : memref<4x2x32xf32, #tpu.memory_space<vmem>>, vector<1x2x32xf32>
    %614 = vector.shape_cast %613 : vector<1x2x32xf32> to vector<2x32xf32>
    %615 = vector.shape_cast %612 : vector<2x32xf32> to vector<1x2x32xf32>
    tpu.vector_store %arg11[%c1_298, %c0_299, %c0_300], %615 {strides = array<i32>} : memref<4x2x32xf32, #tpu.memory_space<vmem>>, vector<1x2x32xf32>,
    %c0_301 = arith.constant 0 : index
    %c0_302 = arith.constant 0 : index
    %c0_303 = arith.constant 0 : index
    %616 = vector.load %arg8[%c0_301, %c0_302, %c0_303] : memref<4x2x32xf32, #tpu.memory_space<vmem>>, vector<1x2x32xf32>
    %617 = vector.shape_cast %616 : vector<1x2x32xf32> to vector<2x32xf32>
    %618 = vector.shape_cast %612 : vector<2x32xf32> to vector<1x2x32xf32>
    tpu.vector_store %arg8[%c0_301, %c0_302, %c0_303], %618 {strides = array<i32>} : memref<4x2x32xf32, #tpu.memory_space<vmem>>, vector<1x2x32xf32>,
    %c3_304 = arith.constant 3 : index
    %c0_305 = arith.constant 0 : index
    %c0_306 = arith.constant 0 : index
    %619 = vector.load %arg3[%c3_304, %c0_305, %c0_306] : memref<4x2x96xf32, #tpu.memory_space<vmem>>, vector<1x2x96xf32>
    %620 = vector.shape_cast %619 : vector<1x2x96xf32> to vector<2x96xf32>
    %c2_307 = arith.constant 2 : index
    %c0_308 = arith.constant 0 : index
    %c0_309 = arith.constant 0 : index
    %621 = vector.load %arg11[%c2_307, %c0_308, %c0_309] : memref<4x2x32xf32, #tpu.memory_space<vmem>>, vector<1x2x32xf32>
    %622 = vector.shape_cast %621 : vector<1x2x32xf32> to vector<2x32xf32>
    %623 = arith.truncf %622 : vector<2x32xf32> to vector<2x32xbf16>
    %c2_310 = arith.constant 2 : index
    %c0_311 = arith.constant 0 : index
    %c0_312 = arith.constant 0 : index
    %624 = vector.load %arg5[%c2_310, %c0_311, %c0_312] : memref<4x32x96xbf16, #tpu.memory_space<vmem>>, vector<1x32x96xbf16>
    %625 = vector.shape_cast %624 : vector<1x32x96xbf16> to vector<32x96xbf16>
    %cst_313 = arith.constant dense<0.000000e+00> : vector<2x96xf32>
    %626 = tpu.matmul %623, %625, %cst_313 {dimension_numbers = #tpu.dot_dimension_numbers<[1], [0], [0], [1], [0, 0, 1, 1], [], []>} : vector<2x32xbf16>, vector<32x96xbf16>, vector<2x96xf32> -> vector<2x96xf32>
    %c2_314 = arith.constant 2 : index
    %c0_315 = arith.constant 0 : index
    %c0_316 = arith.constant 0 : index
    %627 = vector.load %arg6[%c2_314, %c0_315, %c0_316] : memref<4x1x96xf32, #tpu.memory_space<vmem>>, vector<1x1x96xf32>
    %628 = vector.shape_cast %627 : vector<1x1x96xf32> to vector<1x96xf32>
    %629 = vector.broadcast %628 : vector<1x96xf32> to vector<2x96xf32>
    %630 = arith.addf %626, %629 : vector<2x96xf32>
    %631 = vector.extract_strided_slice %620 {offsets = [0, 0], sizes = [2, 32], strides = [1, 1]} : vector<2x96xf32> to vector<2x32xf32>
    %632 = vector.extract_strided_slice %630 {offsets = [0, 0], sizes = [2, 32], strides = [1, 1]} : vector<2x96xf32> to vector<2x32xf32>
    %633 = arith.addf %631, %632 : vector<2x32xf32>
    %634 = arith.negf %633 : vector<2x32xf32>
    %635 = math.exp %634 : vector<2x32xf32>
    %cst_317 = arith.constant 1.000000e+00 : f32
    %636 = vector.broadcast %cst_317 : f32 to vector<2x32xf32>
    %637 = arith.addf %636, %635 : vector<2x32xf32>
    %638 = arith.divf %636, %637 : vector<2x32xf32>
    %639 = vector.extract_strided_slice %620 {offsets = [0, 32], sizes = [2, 32], strides = [1, 1]} : vector<2x96xf32> to vector<2x32xf32>
    %640 = vector.extract_strided_slice %630 {offsets = [0, 32], sizes = [2, 32], strides = [1, 1]} : vector<2x96xf32> to vector<2x32xf32>
    %641 = arith.addf %639, %640 : vector<2x32xf32>
    %642 = arith.negf %641 : vector<2x32xf32>
    %643 = math.exp %642 : vector<2x32xf32>
    %cst_318 = arith.constant 1.000000e+00 : f32
    %644 = vector.broadcast %cst_318 : f32 to vector<2x32xf32>
    %645 = arith.addf %644, %643 : vector<2x32xf32>
    %646 = arith.divf %644, %645 : vector<2x32xf32>
    %647 = vector.extract_strided_slice %620 {offsets = [0, 64], sizes = [2, 32], strides = [1, 1]} : vector<2x96xf32> to vector<2x32xf32>
    %648 = vector.extract_strided_slice %630 {offsets = [0, 64], sizes = [2, 32], strides = [1, 1]} : vector<2x96xf32> to vector<2x32xf32>
    %649 = arith.mulf %638, %648 : vector<2x32xf32>
    %650 = arith.addf %647, %649 : vector<2x32xf32>
    %651 = math.tanh %650 : vector<2x32xf32>
    %cst_319 = arith.constant 1.000000e+00 : f32
    %652 = vector.broadcast %cst_319 : f32 to vector<2x32xf32>
    %653 = arith.subf %652, %646 : vector<2x32xf32>
    %654 = arith.mulf %653, %651 : vector<2x32xf32>
    %655 = arith.mulf %646, %622 : vector<2x32xf32>
    %656 = arith.addf %654, %655 : vector<2x32xf32>
    %c2_320 = arith.constant 2 : index
    %c0_321 = arith.constant 0 : index
    %c0_322 = arith.constant 0 : index
    %657 = vector.load %arg11[%c2_320, %c0_321, %c0_322] : memref<4x2x32xf32, #tpu.memory_space<vmem>>, vector<1x2x32xf32>
    %658 = vector.shape_cast %657 : vector<1x2x32xf32> to vector<2x32xf32>
    %659 = vector.shape_cast %656 : vector<2x32xf32> to vector<1x2x32xf32>
    tpu.vector_store %arg11[%c2_320, %c0_321, %c0_322], %659 {strides = array<i32>} : memref<4x2x32xf32, #tpu.memory_space<vmem>>, vector<1x2x32xf32>,
    %c3_323 = arith.constant 3 : index
    %c0_324 = arith.constant 0 : index
    %c0_325 = arith.constant 0 : index
    %660 = vector.load %arg9[%c3_323, %c0_324, %c0_325] : memref<4x2x32xf32, #tpu.memory_space<vmem>>, vector<1x2x32xf32>
    %661 = vector.shape_cast %660 : vector<1x2x32xf32> to vector<2x32xf32>
    %662 = vector.shape_cast %656 : vector<2x32xf32> to vector<1x2x32xf32>
    tpu.vector_store %arg9[%c3_323, %c0_324, %c0_325], %662 {strides = array<i32>} : memref<4x2x32xf32, #tpu.memory_space<vmem>>, vector<1x2x32xf32>,
    %c0_326 = arith.constant 0 : index
    %c0_327 = arith.constant 0 : index
    %c0_328 = arith.constant 0 : index
    %663 = vector.load %arg4[%c0_326, %c0_327, %c0_328] : memref<4x2x96xf32, #tpu.memory_space<vmem>>, vector<1x2x96xf32>
    %664 = vector.shape_cast %663 : vector<1x2x96xf32> to vector<2x96xf32>
    %c3_329 = arith.constant 3 : index
    %c0_330 = arith.constant 0 : index
    %c0_331 = arith.constant 0 : index
    %665 = vector.load %arg11[%c3_329, %c0_330, %c0_331] : memref<4x2x32xf32, #tpu.memory_space<vmem>>, vector<1x2x32xf32>
    %666 = vector.shape_cast %665 : vector<1x2x32xf32> to vector<2x32xf32>
    %667 = arith.truncf %666 : vector<2x32xf32> to vector<2x32xbf16>
    %c3_332 = arith.constant 3 : index
    %c0_333 = arith.constant 0 : index
    %c0_334 = arith.constant 0 : index
    %668 = vector.load %arg5[%c3_332, %c0_333, %c0_334] : memref<4x32x96xbf16, #tpu.memory_space<vmem>>, vector<1x32x96xbf16>
    %669 = vector.shape_cast %668 : vector<1x32x96xbf16> to vector<32x96xbf16>
    %cst_335 = arith.constant dense<0.000000e+00> : vector<2x96xf32>
    %670 = tpu.matmul %667, %669, %cst_335 {dimension_numbers = #tpu.dot_dimension_numbers<[1], [0], [0], [1], [0, 0, 1, 1], [], []>} : vector<2x32xbf16>, vector<32x96xbf16>, vector<2x96xf32> -> vector<2x96xf32>
    %c3_336 = arith.constant 3 : index
    %c0_337 = arith.constant 0 : index
    %c0_338 = arith.constant 0 : index
    %671 = vector.load %arg6[%c3_336, %c0_337, %c0_338] : memref<4x1x96xf32, #tpu.memory_space<vmem>>, vector<1x1x96xf32>
    %672 = vector.shape_cast %671 : vector<1x1x96xf32> to vector<1x96xf32>
    %673 = vector.broadcast %672 : vector<1x96xf32> to vector<2x96xf32>
    %674 = arith.addf %670, %673 : vector<2x96xf32>
    %675 = vector.extract_strided_slice %664 {offsets = [0, 0], sizes = [2, 32], strides = [1, 1]} : vector<2x96xf32> to vector<2x32xf32>
    %676 = vector.extract_strided_slice %674 {offsets = [0, 0], sizes = [2, 32], strides = [1, 1]} : vector<2x96xf32> to vector<2x32xf32>
    %677 = arith.addf %675, %676 : vector<2x32xf32>
    %678 = arith.negf %677 : vector<2x32xf32>
    %679 = math.exp %678 : vector<2x32xf32>
    %cst_339 = arith.constant 1.000000e+00 : f32
    %680 = vector.broadcast %cst_339 : f32 to vector<2x32xf32>
    %681 = arith.addf %680, %679 : vector<2x32xf32>
    %682 = arith.divf %680, %681 : vector<2x32xf32>
    %683 = vector.extract_strided_slice %664 {offsets = [0, 32], sizes = [2, 32], strides = [1, 1]} : vector<2x96xf32> to vector<2x32xf32>
    %684 = vector.extract_strided_slice %674 {offsets = [0, 32], sizes = [2, 32], strides = [1, 1]} : vector<2x96xf32> to vector<2x32xf32>
    %685 = arith.addf %683, %684 : vector<2x32xf32>
    %686 = arith.negf %685 : vector<2x32xf32>
    %687 = math.exp %686 : vector<2x32xf32>
    %cst_340 = arith.constant 1.000000e+00 : f32
    %688 = vector.broadcast %cst_340 : f32 to vector<2x32xf32>
    %689 = arith.addf %688, %687 : vector<2x32xf32>
    %690 = arith.divf %688, %689 : vector<2x32xf32>
    %691 = vector.extract_strided_slice %664 {offsets = [0, 64], sizes = [2, 32], strides = [1, 1]} : vector<2x96xf32> to vector<2x32xf32>
    %692 = vector.extract_strided_slice %674 {offsets = [0, 64], sizes = [2, 32], strides = [1, 1]} : vector<2x96xf32> to vector<2x32xf32>
    %693 = arith.mulf %682, %692 : vector<2x32xf32>
    %694 = arith.addf %691, %693 : vector<2x32xf32>
    %695 = math.tanh %694 : vector<2x32xf32>
    %cst_341 = arith.constant 1.000000e+00 : f32
    %696 = vector.broadcast %cst_341 : f32 to vector<2x32xf32>
    %697 = arith.subf %696, %690 : vector<2x32xf32>
    %698 = arith.mulf %697, %695 : vector<2x32xf32>
    %699 = arith.mulf %690, %666 : vector<2x32xf32>
    %700 = arith.addf %698, %699 : vector<2x32xf32>
    %c3_342 = arith.constant 3 : index
    %c0_343 = arith.constant 0 : index
    %c0_344 = arith.constant 0 : index
    %701 = vector.load %arg11[%c3_342, %c0_343, %c0_344] : memref<4x2x32xf32, #tpu.memory_space<vmem>>, vector<1x2x32xf32>
    %702 = vector.shape_cast %701 : vector<1x2x32xf32> to vector<2x32xf32>
    %703 = vector.shape_cast %700 : vector<2x32xf32> to vector<1x2x32xf32>
    tpu.vector_store %arg11[%c3_342, %c0_343, %c0_344], %703 {strides = array<i32>} : memref<4x2x32xf32, #tpu.memory_space<vmem>>, vector<1x2x32xf32>,
    %c0_345 = arith.constant 0 : index
    %c0_346 = arith.constant 0 : index
    %c0_347 = arith.constant 0 : index
    %704 = vector.load %arg10[%c0_345, %c0_346, %c0_347] : memref<4x2x32xf32, #tpu.memory_space<vmem>>, vector<1x2x32xf32>
    %705 = vector.shape_cast %704 : vector<1x2x32xf32> to vector<2x32xf32>
    %706 = vector.shape_cast %700 : vector<2x32xf32> to vector<1x2x32xf32>
    tpu.vector_store %arg10[%c0_345, %c0_346, %c0_347], %706 {strides = array<i32>} : memref<4x2x32xf32, #tpu.memory_space<vmem>>, vector<1x2x32xf32>,
    return
  }
  func.func @transform_0(%arg0: i32) -> (i32, i32, i32) {
    %c0_i32 = arith.constant 0 : i32
    %c0_i32_0 = arith.constant 0 : i32
    %c0_i32_1 = arith.constant 0 : i32
    return %arg0, %c0_i32, %c0_i32_0 : i32, i32, i32
  }
  func.func @transform_1(%arg0: i32) -> (i32, i32, i32) {
    %c0_i32 = arith.constant 0 : i32
    %0 = arith.subi %c0_i32, %arg0 : i32
    %c0_i32_0 = arith.constant 0 : i32
    %c0_i32_1 = arith.constant 0 : i32
    %c0_i32_2 = arith.constant 0 : i32
    return %0, %c0_i32_0, %c0_i32_1 : i32, i32, i32
  }
  func.func @transform_2(%arg0: i32) -> (i32, i32, i32) {
    %c0_i32 = arith.constant 0 : i32
    %c0_i32_0 = arith.constant 0 : i32
    %c0_i32_1 = arith.constant 0 : i32
    return %arg0, %c0_i32, %c0_i32_0 : i32, i32, i32
  }
  func.func @transform_3(%arg0: i32) -> (i32, i32, i32) {
    %c0_i32 = arith.constant 0 : i32
    %0 = arith.subi %c0_i32, %arg0 : i32
    %c0_i32_0 = arith.constant 0 : i32
    %c0_i32_1 = arith.constant 0 : i32
    %c0_i32_2 = arith.constant 0 : i32
    return %0, %c0_i32_0, %c0_i32_1 : i32, i32, i32
  }
  func.func @transform_4(%arg0: i32) -> (i32, i32, i32) {
    %c0_i32 = arith.constant 0 : i32
    %c0_i32_0 = arith.constant 0 : i32
    %c0_i32_1 = arith.constant 0 : i32
    %c0_i32_2 = arith.constant 0 : i32
    return %c0_i32, %c0_i32_0, %c0_i32_1 : i32, i32, i32
  }
  func.func @transform_5(%arg0: i32) -> (i32, i32, i32) {
    %c0_i32 = arith.constant 0 : i32
    %c0_i32_0 = arith.constant 0 : i32
    %c0_i32_1 = arith.constant 0 : i32
    %c0_i32_2 = arith.constant 0 : i32
    return %c0_i32, %c0_i32_0, %c0_i32_1 : i32, i32, i32
  }
  func.func @transform_6(%arg0: i32) -> (i32, i32, i32) {
    %c0_i32 = arith.constant 0 : i32
    %c0_i32_0 = arith.constant 0 : i32
    %c0_i32_1 = arith.constant 0 : i32
    return %arg0, %c0_i32, %c0_i32_0 : i32, i32, i32
  }
  func.func @transform_7(%arg0: i32) -> (i32, i32, i32) {
    %c0_i32 = arith.constant 0 : i32
    %0 = arith.subi %c0_i32, %arg0 : i32
    %c0_i32_0 = arith.constant 0 : i32
    %c0_i32_1 = arith.constant 0 : i32
    %c0_i32_2 = arith.constant 0 : i32
    return %0, %c0_i32_0, %c0_i32_1 : i32, i32, i32
  }
  func.func @transform_8(%arg0: i32) -> (i32, i32, i32) {
    %c0_i32 = arith.constant 0 : i32
    %c0_i32_0 = arith.constant 0 : i32
    %c0_i32_1 = arith.constant 0 : i32
    return %arg0, %c0_i32, %c0_i32_0 : i32, i32, i32
  }
  func.func @transform_9(%arg0: i32) -> (i32, i32, i32) {
    %c0_i32 = arith.constant 0 : i32
    %0 = arith.subi %c0_i32, %arg0 : i32
    %c0_i32_0 = arith.constant 0 : i32
    %c0_i32_1 = arith.constant 0 : i32
    %c0_i32_2 = arith.constant 0 : i32
    return %0, %c0_i32_0, %c0_i32_1 : i32, i32, i32
  }
}

</mosaic_0001>

<bundles_post_ra>
// kernel: _lambda_.7
= control target key start
LH: loop header
LB: loop body
LE: loop exit
PB: predicated region body
PF: predicated region fallthrough
CT: control target
= control target key end

     0   :  { %v132_v1 = vmov 0   ;;  %vm55_vm0 = vcmask 261120   ;;  %v25_v7 = vlaneseq  ;;  %vm100_vm1 = vcmask 785408   ;;  %s133_s27 = smov 32   ;;  %s185_s1 = inlined_call_operand.vmem [shape: bf16[32,192], index: 1, kind: input, shape index: {}]   ;;  %s186_s0 = inlined_call_operand.vmem [shape: f32[8,32], index: 0, kind: input, shape index: {}]   ;;  %s187_s2 = inlined_call_operand.vmem [shape: f32[1,192], index: 2, kind: input, shape index: {}]   ;;  %s188_s3 = inlined_call_operand.vmem [shape: f32[8,96], index: 3, kind: output, shape index: {0}]   ;;  %s189_s4 = inlined_call_operand.vmem [shape: f32[8,96], index: 4, kind: output, shape index: {1}]  }
   0x1   :  { %v126_v0 = vld [vmem:[%s185_s1 + $0x4] ss:$8 sps:$4 sm:$0xff]   ;;  %91 = vmatprep.mubr.bf16.mxu0 %v132_v1  ;;  %v128_v2 = vld [vmem:[%s185_s1] ss:$8 sps:$4 sm:$0xff]   ;;  %v129_v3 = vld [vmem:[%s185_s1 + $0x14] ss:$8 sps:$4 sm:$0xff]  }
   0x2   :  { %59 = vmatprep.subr.bf16.mxu0 %v126_v0  ;;  %v131_v4 = vld [vmem:[%s185_s1 + $0x10] ss:$8 sps:$4 sm:$0xff]   ;;  %v17_v5 = vld [vmem:[%s186_s0] sm:$0xff]  ;;  %v26_v8 = vshrl.u32 %v25_v7, 7 }
   0x3   :  { %60 = vmatpush1.bf16.msra.mxu0 %v128_v2  ;;  %v18_v6 = vpack.c.bf16 %v17_v5, %v17_v5  ;;  %v23_v10 = vld [vmem:[%s187_s2] sm:$0x3] }
   0x4   :  { %61 = vmatprep.subr.bf16.mxu0 %v129_v3  ;;  %v27_v9 = vsub.s32 0, %v26_v8  ;;  %v31_v12 = vsub.s32 1, %v26_v8 }
   0x6   :  { %v28_v11 = vrot.slane %v23_v10, %v27_v9  ;;  %v32_v15 = vrot.slane %v23_v10, %v31_v12 }
   0x7   :  { %62 = vmatpush1.bf16.msra.mxu0 %v131_v4 }
   0xa   :  { %123 = vmatmul.mubr.msk.bf16.vlgmr.msra.gmra.mrb[0].mxu0 %vm55_vm0, %v18_v6 }
  0xdd   :  { %v93_v13 = vpop.f32.mrb[0].mxu0 }
  0xde   :  { %v94_v14 = vadd.f32 %v93_v13, %v28_v11  ;;  %v95_v16 = vpop.f32.mrb[1].mxu0 }
  0xdf   :  { %v97_v17 = vpop.f32.mrb[2].mxu0  ;;  %v96_v19 = vadd.f32 %v95_v16, %v32_v15 }
  0xe0   :  { %101 = vst.msk [vmem:[%s188_s3] sm:$0xff] %vm100_vm1, %v94_v14  ;;  %v98_v18 = vpop.f32.mrb[3].mxu0  ;;  %104 = vrot.lane.b32.xlu0 %v94_v14, %s133_s27 }
  0xe4   :  { %106 = vrot.lane.b32.xlu0 %v96_v19, %s133_s27 }
 0x152   :  { %v105_v20 = vpop.permute.xlu0 %104 }
 0x156   :  { %v107_v21 = vpop.permute.xlu0 %106 }
 0x157   :  { %v108_v22 = vsel %vm55_vm0, %v105_v20, %v107_v21 }
 0x158   :  { %110 = vst.msk [vmem:[%s189_s4] sm:$0xff] %vm100_vm1, %v108_v22 }

// kernel: _lambda_.10
= control target key start
LH: loop header
LB: loop body
LE: loop exit
PB: predicated region body
PF: predicated region fallthrough
CT: control target
= control target key end

     0   :  { %v221_v1 = vmov 0   ;;  %vm55_vm0 = vcmask 261120   ;;  %v166_v13 = vlaneseq  ;;  %vm178_vm1 = vcmask 785408   ;;  %s300_s3 = inlined_call_operand.vmem [shape: bf16[32,192], index: 3, kind: input, shape index: {}]   ;;  %s301_s2 = inlined_call_operand.vmem [shape: bf16[32,192], index: 2, kind: input, shape index: {}]   ;;  %s302_s1 = inlined_call_operand.vmem [shape: f32[8,32], index: 1, kind: input, shape index: {}]   ;;  %s303_s0 = inlined_call_operand.vmem [shape: f32[8,32], index: 0, kind: input, shape index: {}]   ;;  %s304_s4 = inlined_call_operand.vmem [shape: f32[1,192], index: 4, kind: input, shape index: {}]   ;;  %s305_s5 = inlined_call_operand.vmem [shape: f32[8,96], index: 5, kind: output, shape index: {0}]   ;;  %s306_s6 = inlined_call_operand.vmem [shape: f32[8,96], index: 6, kind: output, shape index: {1}]  }
   0x1   :  { %v209_v0 = vld [vmem:[%s300_s3 + $0x4] ss:$8 sps:$4 sm:$0xff]   ;;  %91 = vmatprep.mubr.bf16.mxu0 %v221_v1  ;;  %155 = vmatprep.mubr.bf16.mxu1 %v221_v1  ;;  %v213_v3 = vld [vmem:[%s300_s3] ss:$8 sps:$4 sm:$0xff]   ;;  %v215_v5 = vld [vmem:[%s300_s3 + $0x14] ss:$8 sps:$4 sm:$0xff]  }
   0x2   :  { %v211_v2 = vld [vmem:[%s301_s2 + $0x4] ss:$8 sps:$4 sm:$0xff]   ;;  %59 = vmatprep.subr.bf16.mxu0 %v209_v0  ;;  %v214_v4 = vld [vmem:[%s301_s2] ss:$8 sps:$4 sm:$0xff]   ;;  %v217_v6 = vld [vmem:[%s301_s2 + $0x14] ss:$8 sps:$4 sm:$0xff]  }
   0x3   :  { %123 = vmatprep.subr.bf16.mxu1 %v211_v2  ;;  %60 = vmatpush1.bf16.msra.mxu0 %v213_v3  ;;  %v219_v7 = vld [vmem:[%s300_s3 + $0x10] ss:$8 sps:$4 sm:$0xff]   ;;  %v29_v9 = vld [vmem:[%s302_s1] sm:$0xff]  ;;  %v167_v14 = vshrl.u32 %v166_v13, 7 }
   0x4   :  { %124 = vmatpush1.bf16.msra.mxu1 %v214_v4  ;;  %61 = vmatprep.subr.bf16.mxu0 %v215_v5  ;;  %v220_v8 = vld [vmem:[%s301_s2 + $0x10] ss:$8 sps:$4 sm:$0xff]   ;;  %v23_v10 = vld [vmem:[%s303_s0] sm:$0xff]  ;;  %v30_v11 = vpack.c.bf16 %v29_v9, %v29_v9  ;;  %s222_s0 = smov 32  }
   0x5   :  { %125 = vmatprep.subr.bf16.mxu1 %v217_v6  ;;  %v24_v12 = vpack.c.bf16 %v23_v10, %v23_v10  ;;  %v168_v15 = vsub.s32 0, %v167_v14  ;;  %v164_v16 = vld [vmem:[%s304_s4] sm:$0x3]  ;;  %v172_v17 = vsub.s32 1, %v167_v14 }
   0x7   :  { %62 = vmatpush1.bf16.msra.mxu0 %v219_v7  ;;  %v169_v18 = vrot.slane %v164_v16, %v168_v15  ;;  %v173_v27 = vrot.slane %v164_v16, %v172_v17 }
   0x8   :  { %126 = vmatpush1.bf16.msra.mxu1 %v220_v8 }
   0xa   :  { %201 = vmatmul.mubr.msk.bf16.vlgmr.msra.gmra.mrb[0].mxu0 %vm55_vm0, %v30_v11 }
   0xb   :  { %206 = vmatmul.mubr.msk.bf16.vlgmr.msra.gmra.mrb[0].mxu1 %vm55_vm0, %v24_v12 }
  0xdd   :  { %v93_v19 = vpop.f32.mrb[0].mxu0 }
  0xde   :  { %v157_v20 = vpop.f32.mrb[0].mxu1  ;;  %v95_v22 = vpop.f32.mrb[1].mxu0 }
  0xdf   :  { %v158_v21 = vadd.f32 %v157_v20, %v93_v19  ;;  %v159_v23 = vpop.f32.mrb[1].mxu1  ;;  %v97_v25 = vpop.f32.mrb[2].mxu0 }
  0xe0   :  { %v160_v24 = vadd.f32 %v159_v23, %v95_v22  ;;  %v161_v26 = vpop.f32.mrb[2].mxu1  ;;  %v98_v28 = vpop.f32.mrb[3].mxu0 }
  0xe1   :  { %v162_v29 = vpop.f32.mrb[3].mxu1  ;;  %v176_v30 = vadd.f32 %v169_v18, %v158_v21 }
  0xe2   :  { %v177_v31 = vadd.f32 %v173_v27, %v160_v24 }
  0xe3   :  { %182 = vrot.lane.b32.xlu0 %v176_v30, %s222_s0  ;;  %179 = vst.msk [vmem:[%s305_s5] sm:$0xff] %vm178_vm1, %v176_v30 }
  0xe7   :  { %184 = vrot.lane.b32.xlu0 %v177_v31, %s222_s0 }
 0x155   :  { %v183_v32 = vpop.permute.xlu0 %182 }
 0x159   :  { %v185_v33 = vpop.permute.xlu0 %184 }
 0x15a   :  { %v186_v34 = vsel %vm55_vm0, %v183_v32, %v185_v33 }
 0x15b   :  { %188 = vst.msk [vmem:[%s306_s6] sm:$0xff] %vm178_vm1, %v186_v34 }

// kernel: _lambda_.13
= control target key start
LH: loop header
LB: loop body
LE: loop exit
PB: predicated region body
PF: predicated region fallthrough
CT: control target
= control target key end

     0   :  { %v378_v0 = vmov 0.0   ;;  %vm379_vm0 = vmmov 0   ;;  %vm60_vm1 = vcmask 261120   ;;  %vm303_vm2 = vcmask 523264   ;;  %s490_s5 = inlined_call_operand.vmem [shape: bf16[32,32], index: 5, kind: input, shape index: {}]   ;;  %s491_s4 = inlined_call_operand.vmem [shape: bf16[32,32], index: 4, kind: input, shape index: {}]   ;;  %s492_s1 = inlined_call_operand.vmem [shape: f32[8,32], index: 1, kind: input, shape index: {}]   ;;  %s493_s0 = inlined_call_operand.vmem [shape: f32[8,32], index: 0, kind: input, shape index: {}]   ;;  %s494_s7 = inlined_call_operand.vmem [shape: bf16[32,32], index: 7, kind: input, shape index: {}]   ;;  %s495_s6 = inlined_call_operand.vmem [shape: bf16[32,32], index: 6, kind: input, shape index: {}]   ;;  %s496_s3 = inlined_call_operand.vmem [shape: f32[8,32], index: 3, kind: input, shape index: {}]   ;;  %s497_s2 = inlined_call_operand.vmem [shape: f32[8,32], index: 2, kind: input, shape index: {}]   ;;  %s498_s9 = inlined_call_operand.vmem [shape: f32[1,32], index: 9, kind: input, shape index: {}]   ;;  %s499_s8 = inlined_call_operand.vmem [shape: f32[1,32], index: 8, kind: input, shape index: {}]   ;;  %s500_s10 = inlined_call_operand.vmem [shape: f32[8,64], index: 10, kind: output, shape index: {}]  }
   0x1   :  { %335 = vmatprep.subr.bf16.mxu0 %v378_v0  ;;  %343 = vmatprep.subr.bf16.mxu1 %v378_v0  ;;  %v370_v1 = vld [vmem:[%s490_s5] sm:$0xff]   ;;  %v372_v3 = vld [vmem:[%s490_s5 + $0x8] sm:$0xff]  }
   0x2   :  { %v371_v2 = vld [vmem:[%s491_s4] sm:$0xff]   ;;  %339 = vmatprep.mubr.msk.bf16.mxu0 %vm379_vm0, %v378_v0  ;;  %347 = vmatprep.mubr.msk.bf16.mxu1 %vm379_vm0, %v378_v0  ;;  %v373_v4 = vld [vmem:[%s491_s4 + $0x8] sm:$0xff]  }
   0x3   :  { %336 = vmatpush3.bf16.msra.mxu0 %v370_v1  ;;  %344 = vmatpush3.bf16.msra.mxu1 %v371_v2  ;;  %v42_v5 = vld [vmem:[%s492_s1] sm:$0xff]  ;;  %v376_v11 = vld [vmem:[%s494_s7 + $0x8] sm:$0xff]  }
   0x4   :  { %337 = vmatprep.subr.bf16.mxu0 %v378_v0  ;;  %345 = vmatprep.subr.bf16.mxu1 %v378_v0  ;;  %v36_v6 = vld [vmem:[%s493_s0] sm:$0xff]  ;;  %v43_v7 = vpack.c.bf16 %v42_v5, %v42_v5  ;;  %v377_v13 = vld [vmem:[%s495_s6 + $0x8] sm:$0xff]  }
   0x5   :  { %v37_v8 = vpack.c.bf16 %v36_v6, %v36_v6  ;;  %v374_v9 = vld [vmem:[%s494_s7] sm:$0xff]  }
   0x6   :  { %v375_v10 = vld [vmem:[%s495_s6] sm:$0xff]   ;;  %s380_s6 = smov 32  }
   0x7   :  { %338 = vmatpush3.bf16.msra.mxu0 %v372_v3  ;;  %346 = vmatpush3.bf16.msra.mxu1 %v373_v4  ;;  %v173_v12 = vld [vmem:[%s496_s3] sm:$0xff] }
   0x8   :  { %351 = vmatprep.subr.bf16.mxu0 %v378_v0  ;;  %359 = vmatprep.subr.bf16.mxu1 %v378_v0  ;;  %v167_v14 = vld [vmem:[%s497_s2] sm:$0xff]  ;;  %v174_v15 = vpack.c.bf16 %v173_v12, %v173_v12 }
   0x9   :  { %v168_v16 = vpack.c.bf16 %v167_v14, %v167_v14  ;;  %v322_v29 = vld [vmem:[%s498_s9] ss:$0 sm:$0xff] }
   0xa   :  { %340 = vmatmul.mubr.msk.bf16.vlgmr.msra.gmra.mrb[0].mxu0 %vm60_vm1, %v43_v7  ;;  %348 = vmatmul.mubr.msk.bf16.vlgmr.msra.gmra.mrb[0].mxu1 %vm60_vm1, %v37_v8  ;;  %v315_v37 = vld [vmem:[%s499_s8] ss:$0 sm:$0xff] }
   0xb   :  { %352 = vmatpush3.bf16.msra.mxu0 %v374_v9  ;;  %360 = vmatpush3.bf16.msra.mxu1 %v375_v10 }
   0xc   :  { %353 = vmatprep.subr.bf16.mxu0 %v378_v0  ;;  %361 = vmatprep.subr.bf16.mxu1 %v378_v0 }
   0xd   :  { %355 = vmatprep.mubr.msk.bf16.mxu0 %vm379_vm0, %v378_v0  ;;  %363 = vmatprep.mubr.msk.bf16.mxu1 %vm379_vm0, %v378_v0 }
   0xf   :  { %354 = vmatpush3.bf16.msra.mxu0 %v376_v11  ;;  %362 = vmatpush3.bf16.msra.mxu1 %v377_v13 }
  0x12   :  { %356 = vmatmul.mubr.msk.bf16.vlgmr.msra.gmra.mrb[4].mxu0 %vm60_vm1, %v174_v15  ;;  %364 = vmatmul.mubr.msk.bf16.vlgmr.msra.gmra.mrb[4].mxu1 %vm60_vm1, %v168_v16 }
  0xdd   :  { %v98_v17 = vpop.f32.mrb[0].mxu0  ;;  %v153_v18 = vpop.f32.mrb[0].mxu1 }
  0xde   :  { %v341_v19 = vpop.f32.mrb[1].mxu0  ;;  %v154_v20 = vadd.f32 %v153_v18, %v98_v17  ;;  %v349_v21 = vpop.f32.mrb[1].mxu1 }
  0xdf   :  { %v101_v22 = vpop.f32.mrb[2].mxu0  ;;  %v156_v23 = vpop.f32.mrb[2].mxu1 }
  0xe0   :  { %v342_v24 = vpop.f32.mrb[3].mxu0  ;;  %v350_v25 = vpop.f32.mrb[3].mxu1  ;;  %v166_v38 = vadd.f32 %v315_v37, %v154_v20 }
  0xe5   :  { %v228_v26 = vpop.f32.mrb[4].mxu0  ;;  %v283_v27 = vpop.f32.mrb[4].mxu1 }
  0xe6   :  { %v357_v28 = vpop.f32.mrb[5].mxu0  ;;  %v284_v30 = vadd.f32 %v283_v27, %v228_v26  ;;  %v365_v31 = vpop.f32.mrb[5].mxu1 }
  0xe7   :  { %v231_v32 = vpop.f32.mrb[6].mxu0  ;;  %v286_v33 = vpop.f32.mrb[6].mxu1 }
  0xe8   :  { %v358_v34 = vpop.f32.mrb[7].mxu0  ;;  %v366_v35 = vpop.f32.mrb[7].mxu1  ;;  %v296_v36 = vadd.f32 %v322_v29, %v284_v30 }
  0xea   :  { %298 = vrot.lane.b32.xlu0 %v296_v36, %s380_s6 }
 0x15c   :  { %v299_v39 = vpop.permute.xlu0 %298 }
 0x15d   :  { %v301_v40 = vsel %vm60_vm1, %v166_v38, %v299_v39 }
 0x15e   :  { %v302_v41 = vmax.f32 %v301_v40, 0.0 }
 0x160   :  { %304 = vst.msk [vmem:[%s500_s10] sm:$0xff] %vm303_vm2, %v302_v41 }

// kernel: _lambda_.9
= control target key start
LH: loop header
LB: loop body
LE: loop exit
PB: predicated region body
PF: predicated region fallthrough
CT: control target
= control target key end

     0   :  { %vm104_vm0 = vcmask 254976   ;;  %v2369_v0 = vmov 0.0   ;;  %vm2370_vm1 = vmmov 0   ;;  %vm135_vm2 = vcmask 261120   ;;  %s2371_s29 = smov 64   ;;  %s2372_s21 = smov 32   ;;  %s2960_s4 = inlined_call_operand.vmem [shape: bf16[4,32,96], index: 4, kind: input, shape index: {}]   ;;  %s2961_s5 = inlined_call_operand.vmem [shape: f32[4,1,96], index: 5, kind: input, shape index: {}]   ;;  %s2962_s0 = inlined_call_operand.vmem [shape: f32[4,2,96], index: 0, kind: input, shape index: {}]   ;;  %s2963_s1 = inlined_call_operand.vmem [shape: f32[4,2,96], index: 1, kind: input, shape index: {}]   ;;  %s2964_s2 = inlined_call_operand.vmem [shape: f32[4,2,96], index: 2, kind: input, shape index: {}]   ;;  %s2965_s3 = inlined_call_operand.vmem [shape: f32[4,2,96], index: 3, kind: input, shape index: {}]   ;;  %s2966_s6 = inlined_call_operand.vmem [shape: f32[4,2,32], index: 6, kind: output, shape index: {0}]   ;;  %s2967_s7 = inlined_call_operand.vmem [shape: f32[4,2,32], index: 7, kind: output, shape index: {1}]   ;;  %s2968_s8 = inlined_call_operand.vmem [shape: f32[4,2,32], index: 8, kind: output, shape index: {2}]   ;;  %s2969_s9 = inlined_call_operand.vmem [shape: f32[4,2,32], index: 9, kind: output, shape index: {3}]  }
   0x1   :  { %2108 = vmatprep.subr.bf16.mxu0 %v2369_v0  ;;  %v2241_v1 = vld [vmem:[%s2960_s4] sm:$0xff]   ;;  %2116 = vmatprep.subr.bf16.mxu1 %v2369_v0  ;;  %105 = vst.msk [vmem:[#allocation2] sm:$0x3] %vm104_vm0, %v2369_v0  ;;  %106 = vst.msk [vmem:[#allocation2 + $0x2] sm:$0x3] %vm104_vm0, %v2369_v0  ;;  %v2242_v2 = vld [vmem:[%s2960_s4 + $0x10] sm:$0xff]  }
   0x2   :  { %107 = vst.msk [vmem:[#allocation2 + $0x4] sm:$0x3] %vm104_vm0, %v2369_v0  ;;  %108 = vst.msk [vmem:[#allocation2 + $0x6] sm:$0x3] %vm104_vm0, %v2369_v0  ;;  %2112 = vmatprep.mubr.msk.bf16.mxu0 %vm2370_vm1, %v2369_v0  ;;  %2120 = vmatprep.mubr.msk.bf16.mxu1 %vm2370_vm1, %v2369_v0  ;;  %v2243_v3 = vld [vmem:[%s2960_s4 + $0x8] sm:$0xff]   ;;  %v2244_v4 = vld [vmem:[%s2960_s4 + $0x18] sm:$0xff]  }
   0x3   :  { %2109 = vmatpush3.bf16.msra.mxu0 %v2241_v1  ;;  %2117 = vmatpush3.bf16.msra.mxu1 %v2242_v2  ;;  %v2245_v5 = vld [vmem:[%s2960_s4 + $0x20] sm:$0xff]   ;;  %v2246_v6 = vld [vmem:[%s2960_s4 + $0x30] sm:$0xff]   ;;  %v2247_v11 = vld [vmem:[%s2960_s4 + $0x28] sm:$0xff]   ;;  %s2373_s22 = smov 96  }
   0x4   :  { %2110 = vmatprep.subr.bf16.mxu0 %v2369_v0  ;;  %2118 = vmatprep.subr.bf16.mxu1 %v2369_v0  ;;  %v2248_v12 = vld [vmem:[%s2960_s4 + $0x38] sm:$0xff]   ;;  %v2501_v17 = vld [vmem:[%s2961_s5] ss:$0 sm:$0xff]  ;;  %v2506_v19 = vld [vmem:[%s2961_s5 + $0x1] ss:$0 sm:$0xff] }
   0x5   :  { %v2514_v29 = vld [vmem:[%s2961_s5 + $0x2] ss:$0 sm:$0xff]  ;;  %v2520_v31 = vld [vmem:[%s2961_s5 + $0x3] ss:$0 sm:$0xff]  ;;  %v109_v41 = vld [vmem:[%s2962_s0] sm:$0x3] }
   0x6   :  { %v1901_v43 = vld [vmem:[%s2963_s1 + $0x6] sm:$0x3]  ;;  %v326_v46 = vld [vmem:[%s2964_s2] sm:$0x3] }
   0x7   :  { %2111 = vmatpush3.bf16.msra.mxu0 %v2243_v3  ;;  %2119 = vmatpush3.bf16.msra.mxu1 %v2244_v4  ;;  %v1923_v49 = vld [vmem:[%s2965_s3 + $0x6] sm:$0x3] }
   0x8   :  { %v2458_v7 = vld [vmem:[#allocation2] sm:$0x3]  ;;  %2124 = vmatprep.subr.bf16.mxu0 %v2369_v0  ;;  %v2461_v8 = vld [vmem:[#allocation2 + $0x2] sm:$0x3]  ;;  %2132 = vmatprep.subr.bf16.mxu1 %v2369_v0 }
   0x9   :  { %v111_v9 = vpack.c.bf16 %v2458_v7, %v2458_v7  ;;  %v220_v10 = vpack.c.bf16 %v2461_v8, %v2461_v8  ;;  %v2474_v13 = vld [vmem:[#allocation2 + $0x4] sm:$0x3]  ;;  %v2476_v14 = vld [vmem:[#allocation2 + $0x6] sm:$0x3] }
   0xa   :  { %v329_v15 = vpack.c.bf16 %v2474_v13, %v2474_v13  ;;  %v438_v16 = vpack.c.bf16 %v2476_v14, %v2476_v14 }
   0xb   :  { %2113 = vmatmul.mubr.msk.bf16.vlgmr.msra.gmra.mrb[0].mxu0 %vm135_vm2, %v111_v9  ;;  %2121 = vmatmul.mubr.msk.bf16.vlgmr.msra.gmra.mrb[0].mxu1 %vm135_vm2, %v220_v10 }
   0xc   :  { %2125 = vmatpush3.bf16.msra.mxu0 %v2245_v5  ;;  %2133 = vmatpush3.bf16.msra.mxu1 %v2246_v6 }
   0xd   :  { %2126 = vmatprep.subr.bf16.mxu0 %v2369_v0  ;;  %2134 = vmatprep.subr.bf16.mxu1 %v2369_v0 }
   0xe   :  { %2128 = vmatprep.mubr.msk.bf16.mxu0 %vm2370_vm1, %v2369_v0  ;;  %2136 = vmatprep.mubr.msk.bf16.mxu1 %vm2370_vm1, %v2369_v0 }
  0x10   :  { %2127 = vmatpush3.bf16.msra.mxu0 %v2247_v11  ;;  %2135 = vmatpush3.bf16.msra.mxu1 %v2248_v12 }
  0x11   :  { %2140 = vmatprep.subr.bf16.mxu0 %v2369_v0  ;;  %2148 = vmatprep.subr.bf16.mxu1 %v2369_v0 }
  0x13   :  { %2129 = vmatmul.mubr.msk.bf16.vlgmr.msra.gmra.mrb[4].mxu0 %vm135_vm2, %v329_v15  ;;  %2137 = vmatmul.mubr.msk.bf16.vlgmr.msra.gmra.mrb[4].mxu1 %vm135_vm2, %v438_v16 }
  0x14   :  { %2144 = vmatprep.mubr.msk.bf16.mxu0 %vm2370_vm1, %v2369_v0  ;;  %2152 = vmatprep.mubr.msk.bf16.mxu1 %vm2370_vm1, %v2369_v0 }
  0xde   :  { %v173_v18 = vpop.f32.mrb[0].mxu0  ;;  %v283_v20 = vpop.f32.mrb[0].mxu1 }
  0xdf   :  { %v174_v21 = vadd.f32 %v2501_v17, %v173_v18  ;;  %v2114_v22 = vpop.f32.mrb[1].mxu0  ;;  %v2122_v23 = vpop.f32.mrb[1].mxu1  ;;  %v284_v26 = vadd.f32 %v2506_v19, %v283_v20 }
  0xe0   :  { %v176_v24 = vpop.f32.mrb[2].mxu0  ;;  %v286_v25 = vpop.f32.mrb[2].mxu1 }
  0xe1   :  { %187 = vrot.lane.b32.xlu0 %v174_v21, %s2371_s29  ;;  %v2115_v27 = vpop.f32.mrb[3].mxu0  ;;  %v2123_v28 = vpop.f32.mrb[3].mxu1  ;;  %v179_v42 = vadd.f32 %v174_v21, %v109_v41  ;;  %v289_v45 = vadd.f32 %v1901_v43, %v284_v26  ;;  %v2249_v25 = vld [vmem:[%s2960_s4] sm:$0xff]  }
  0xe2   :  { %2141 = vmatpush3.bf16.msra.mxu0 %v2249_v25  ;;  %v2251_v27 = vld [vmem:[%s2960_s4 + $0x10] sm:$0xff]  }
  0xe3   :  { %v1900_v44 = vmul.f32 -1.442695, %v179_v42  ;;  %v1911_v47 = vmul.f32 -1.442695, %v289_v45  ;;  %2142 = vmatprep.subr.bf16.mxu0 %v2369_v0  ;;  %2149 = vmatpush3.bf16.msra.mxu1 %v2251_v27 }
  0xe4   :  { %2150 = vmatprep.subr.bf16.mxu1 %v2369_v0 }
  0xe5   :  { %297 = vrot.lane.b32.xlu0 %v284_v26, %s2371_s29  ;;  %2273 = vpow2.f32 %v1900_v44  ;;  %v2250_v26 = vld [vmem:[%s2960_s4 + $0x8] sm:$0xff]  }
  0xe6   :  { %v392_v30 = vpop.f32.mrb[4].mxu0  ;;  %v501_v32 = vpop.f32.mrb[4].mxu1  ;;  %2275 = vpow2.f32 %v1911_v47  ;;  %2143 = vmatpush3.bf16.msra.mxu0 %v2250_v26 }
  0xe7   :  { %v393_v33 = vadd.f32 %v2514_v29, %v392_v30  ;;  %v2130_v34 = vpop.f32.mrb[5].mxu0  ;;  %v2138_v35 = vpop.f32.mrb[5].mxu1  ;;  %v502_v38 = vadd.f32 %v2520_v31, %v501_v32  ;;  %2156 = vmatprep.subr.bf16.mxu0 %v2369_v0 }
  0xe8   :  { %v395_v36 = vpop.f32.mrb[6].mxu0  ;;  %v504_v37 = vpop.f32.mrb[6].mxu1  ;;  %v2252_v35 = vld [vmem:[%s2960_s4 + $0x18] sm:$0xff]  }
  0xe9   :  { %406 = vrot.lane.b32.xlu1 %v393_v33, %s2371_s29  ;;  %v2131_v39 = vpop.f32.mrb[7].mxu0  ;;  %v2139_v40 = vpop.f32.mrb[7].mxu1  ;;  %v398_v48 = vadd.f32 %v393_v33, %v326_v46  ;;  %v507_v51 = vadd.f32 %v1923_v49, %v502_v38  ;;  %2151 = vmatpush3.bf16.msra.mxu1 %v2252_v35 }
  0xea   :  { %2164 = vmatprep.subr.bf16.mxu1 %v2369_v0 }
  0xeb   :  { %v1922_v50 = vmul.f32 -1.442695, %v398_v48  ;;  %v1933_v52 = vmul.f32 -1.442695, %v507_v51 }
  0xed   :  { %515 = vrot.lane.b32.xlu1 %v502_v38, %s2371_s29  ;;  %2277 = vpow2.f32 %v1922_v50 }
  0xee   :  { %2279 = vpow2.f32 %v1933_v52 }
  0xef   :  { %v2274_v53 = vpop.eup %2273 }
  0xf0   :  { %v183_v54 = vadd.f32 1.0, %v2274_v53  ;;  %v2276_v55 = vpop.eup %2275 }
  0xf1   :  { %v293_v56 = vadd.f32 1.0, %v2276_v55 }
  0xf2   :  { %2281 = vrcp.f32 %v183_v54 }
  0xf3   :  { %2283 = vrcp.f32 %v293_v56 }
  0xf7   :  { %v2278_v57 = vpop.eup %2277 }
  0xf8   :  { %v402_v58 = vadd.f32 1.0, %v2278_v57  ;;  %v2280_v59 = vpop.eup %2279 }
  0xf9   :  { %v511_v60 = vadd.f32 1.0, %v2280_v59 }
  0xfa   :  { %2285 = vrcp.f32 %v402_v58  ;;  %v2253_v58 = vld [vmem:[%s2960_s4 + $0x20] sm:$0xff]  }
  0xfb   :  { %2287 = vrcp.f32 %v511_v60 }
  0xfc   :  { %v2282_v61 = vpop.eup %2281 }
  0xfd   :  { %v2284_v1 = vpop.eup %2283  ;;  %v197_v30 = vsub.f32 1.0, %v2282_v61 }
  0xfe   :  { %v307_v37 = vsub.f32 1.0, %v2284_v1 }
 0x104   :  { %v2540_v4 = vpop.eup %2285 }
 0x105   :  { %v2544_v9 = vpop.eup %2287 }
 0x153   :  { %v188_v62 = vpop.permute.xlu0 %187 }
 0x154   :  { %v190_v63 = vmul.f32 %v2282_v61, %v188_v62  ;;  %v2254_v62 = vld [vmem:[%s2960_s4 + $0x28] sm:$0xff]  }
 0x156   :  { %192 = vrot.lane.b32.xlu0 %v190_v63, %s2371_s29  ;;  %v2255_v63 = vld [vmem:[%s2960_s4 + $0x30] sm:$0xff]  }
 0x157   :  { %v298_v2 = vpop.permute.xlu0 %297 }
 0x158   :  { %v300_v3 = vmul.f32 %v2284_v1, %v298_v2 }
 0x15a   :  { %302 = vrot.lane.b32.xlu1 %v300_v3, %s2371_s29  ;;  %v2256_v3 = vld [vmem:[%s2960_s4 + $0x38] sm:$0xff]  }
 0x15b   :  { %v407_v5 = vpop.permute.xlu1 %406 }
 0x15c   :  { %v409_v6 = vmul.f32 %v2540_v4, %v407_v5 }
 0x15e   :  { %411 = vrot.lane.b32.xlu0 %v409_v6, %s2371_s29 }
 0x15f   :  { %v516_v10 = vpop.permute.xlu1 %515 }
 0x160   :  { %v518_v11 = vmul.f32 %v2544_v9, %v516_v10 }
 0x162   :  { %520 = vrot.lane.b32.xlu1 %v518_v11, %s2371_s29 }
 0x166   :  { %204 = vrot.lane.b32.xlu1 %v2458_v7, %s2372_s21 }
 0x16a   :  { %314 = vrot.lane.b32.xlu1 %v2461_v8, %s2372_s21 }
 0x16e   :  { %423 = vrot.lane.b32.xlu1 %v2474_v13, %s2372_s21 }
 0x172   :  { %532 = vrot.lane.b32.xlu1 %v2476_v14, %s2372_s21 }
 0x1c8   :  { %v193_v12 = vpop.permute.xlu0 %192 }
 0x1c9   :  { %v195_v15 = vadd.f32 %v193_v12, %v109_v41 }
 0x1cb   :  { %2289 = vtanh.f32 %v195_v15 }
 0x1cc   :  { %v303_v16 = vpop.permute.xlu1 %302 }
 0x1cd   :  { %v305_v18 = vadd.f32 %v1901_v43, %v303_v16  ;;  %v416_v43 = vsub.f32 1.0, %v2540_v4 }
 0x1cf   :  { %2291 = vtanh.f32 %v305_v18 }
 0x1d0   :  { %v412_v20 = vpop.permute.xlu0 %411 }
 0x1d1   :  { %v414_v21 = vadd.f32 %v412_v20, %v326_v46 }
 0x1d3   :  { %2293 = vtanh.f32 %v414_v21 }
 0x1d4   :  { %v521_v22 = vpop.permute.xlu1 %520 }
 0x1d5   :  { %v2290_v7 = vpop.eup %2289  ;;  %v523_v23 = vadd.f32 %v1923_v49, %v521_v22  ;;  %v525_v49 = vsub.f32 1.0, %v2544_v9 }
 0x1d6   :  { %199 = vrot.lane.b32.xlu0 %v2290_v7, %s2373_s22 }
 0x1d7   :  { %2295 = vtanh.f32 %v523_v23 }
 0x1d8   :  { %v205_v24 = vpop.permute.xlu1 %204 }
 0x1d9   :  { %v2292_v8 = vpop.eup %2291  ;;  %v207_v33 = vmul.f32 %v2282_v61, %v205_v24 }
 0x1da   :  { %309 = vrot.lane.b32.xlu0 %v2292_v8, %s2373_s22 }
 0x1dc   :  { %v315_v28 = vpop.permute.xlu1 %314 }
 0x1dd   :  { %v2294_v13 = vpop.eup %2293  ;;  %v317_v40 = vmul.f32 %v2284_v1, %v315_v28 }
 0x1de   :  { %418 = vrot.lane.b32.xlu0 %v2294_v13, %s2373_s22 }
 0x1e0   :  { %v424_v38 = vpop.permute.xlu1 %423 }
 0x1e1   :  { %v2296_v14 = vpop.eup %2295  ;;  %v426_v45 = vmul.f32 %v2540_v4, %v424_v38 }
 0x1e2   :  { %527 = vrot.lane.b32.xlu0 %v2296_v14, %s2373_s22 }
 0x1e4   :  { %v533_v47 = vpop.permute.xlu1 %532 }
 0x1e5   :  { %v535_v51 = vmul.f32 %v2544_v9, %v533_v47 }
 0x248   :  { %v200_v32 = vpop.permute.xlu0 %199 }
 0x249   :  { %v202_v34 = vmul.f32 %v200_v32, %v197_v30  ;;  %v1935_v30 = vld [vmem:[%s2962_s0 + $0x2] sm:$0x3] }
 0x24b   :  { %v208_v36 = vadd.f32 %v207_v33, %v202_v34  ;;  %v1942_v33 = vld [vmem:[%s2963_s1 + $0x4] sm:$0x3] }
 0x24c   :  { %v310_v39 = vpop.permute.xlu0 %309 }
 0x24d   :  { %v312_v41 = vmul.f32 %v310_v39, %v307_v37  ;;  %210 = vrot.lane.b32.xlu0 %v208_v36, %s2373_s22  ;;  %v1954_v36 = vld [vmem:[%s2964_s2 + $0x2] sm:$0x3]  ;;  %v1966_v39 = vld [vmem:[%s2965_s3 + $0x4] sm:$0x3] }
 0x24f   :  { %v318_v42 = vadd.f32 %v317_v40, %v312_v41 }
 0x250   :  { %v419_v44 = vpop.permute.xlu0 %418 }
 0x251   :  { %v421_v46 = vmul.f32 %v419_v44, %v416_v43  ;;  %320 = vrot.lane.b32.xlu1 %v318_v42, %s2373_s22 }
 0x253   :  { %v427_v48 = vadd.f32 %v426_v45, %v421_v46 }
 0x254   :  { %v528_v50 = vpop.permute.xlu0 %527 }
 0x255   :  { %v530_v52 = vmul.f32 %v528_v50, %v525_v49  ;;  %429 = vrot.lane.b32.xlu0 %v427_v48, %s2373_s22 }
 0x257   :  { %v536_v53 = vadd.f32 %v535_v51, %v530_v52 }
 0x259   :  { %538 = vrot.lane.b32.xlu1 %v536_v53, %s2373_s22 }
 0x2bf   :  { %v211_v54 = vpop.permute.xlu0 %210 }
 0x2c0   :  { %214 = vst.msk [vmem:[#allocation2] sm:$0x3] %vm104_vm0, %v211_v54  ;;  %215 = vst.msk [vmem:[%s2966_s6] sm:$0x3] %vm104_vm0, %v211_v54 }
 0x2c3   :  { %v321_v55 = vpop.permute.xlu1 %320 }
 0x2c4   :  { %323 = vst.msk [vmem:[#allocation2 + $0x2] sm:$0x3] %vm104_vm0, %v321_v55  ;;  %1912 = vst.msk [vmem:[%s2967_s7 + $0x6] sm:$0x3] %vm104_vm0, %v321_v55 }
 0x2c7   :  { %v430_v56 = vpop.permute.xlu0 %429  ;;  %v2594_v57 = vld [vmem:[#allocation2] sm:$0x3] }
 0x2c8   :  { %432 = vst.msk [vmem:[#allocation2 + $0x4] sm:$0x3] %vm104_vm0, %v430_v56  ;;  %433 = vst.msk [vmem:[%s2968_s8] sm:$0x3] %vm104_vm0, %v430_v56  ;;  %v547_v59 = vpack.c.bf16 %v2594_v57, %v2594_v57 }
 0x2ca   :  { %2145 = vmatmul.mubr.msk.bf16.vlgmr.msra.gmra.mrb[8].mxu0 %vm135_vm2, %v547_v59 }
 0x2cb   :  { %v539_v60 = vpop.permute.xlu1 %538  ;;  %2157 = vmatpush3.bf16.msra.mxu0 %v2253_v58  ;;  %v2607_v61 = vld [vmem:[#allocation2 + $0x2] sm:$0x3]  ;;  %2160 = vmatprep.mubr.msk.bf16.mxu0 %vm2370_vm1, %v2369_v0 }
 0x2cc   :  { %541 = vst.msk [vmem:[#allocation2 + $0x6] sm:$0x3] %vm104_vm0, %v539_v60  ;;  %1934 = vst.msk [vmem:[%s2969_s9 + $0x6] sm:$0x3] %vm104_vm0, %v539_v60  ;;  %v654_v1 = vpack.c.bf16 %v2607_v61, %v2607_v61  ;;  %2158 = vmatprep.subr.bf16.mxu0 %v2369_v0 }
 0x2ce   :  { %2153 = vmatmul.mubr.msk.bf16.vlgmr.msra.gmra.mrb[8].mxu1 %vm135_vm2, %v654_v1 }
 0x2cf   :  { %2159 = vmatpush3.bf16.msra.mxu0 %v2254_v62  ;;  %2165 = vmatpush3.bf16.msra.mxu1 %v2255_v63  ;;  %v2626_v2 = vld [vmem:[#allocation2 + $0x4] sm:$0x3] }
 0x2d0   :  { %v761_v4 = vpack.c.bf16 %v2626_v2, %v2626_v2  ;;  %2166 = vmatprep.subr.bf16.mxu1 %v2369_v0  ;;  %2168 = vmatprep.mubr.msk.bf16.mxu1 %vm2370_vm1, %v2369_v0 }
 0x2d1   :  { %2172 = vmatprep.subr.bf16.mxu0 %v2369_v0 }
 0x2d2   :  { %2161 = vmatmul.mubr.msk.bf16.vlgmr.msra.gmra.mrb[12].mxu0 %vm135_vm2, %v761_v4 }
 0x2d3   :  { %2167 = vmatpush3.bf16.msra.mxu1 %v2256_v3  ;;  %v2638_v5 = vld [vmem:[#allocation2 + $0x6] sm:$0x3]  ;;  %2176 = vmatprep.mubr.msk.bf16.mxu0 %vm2370_vm1, %v2369_v0 }
 0x2d4   :  { %v868_v6 = vpack.c.bf16 %v2638_v5, %v2638_v5  ;;  %2180 = vmatprep.subr.bf16.mxu1 %v2369_v0 }
 0x2d6   :  { %2169 = vmatmul.mubr.msk.bf16.vlgmr.msra.gmra.mrb[12].mxu1 %vm135_vm2, %v868_v6 }
 0x2d7   :  { %2184 = vmatprep.mubr.msk.bf16.mxu1 %vm2370_vm1, %v2369_v0 }
 0x39d   :  { %v608_v9 = vpop.f32.mrb[8].mxu0 }
 0x39e   :  { %v609_v10 = vadd.f32 %v2501_v17, %v608_v9  ;;  %v2146_v11 = vpop.f32.mrb[9].mxu0 }
 0x39f   :  { %v611_v12 = vpop.f32.mrb[10].mxu0 }
 0x3a0   :  { %622 = vrot.lane.b32.xlu0 %v609_v10, %s2371_s29  ;;  %v2147_v15 = vpop.f32.mrb[11].mxu0  ;;  %v614_v32 = vadd.f32 %v1935_v30, %v609_v10 }
 0x3a1   :  { %v715_v16 = vpop.f32.mrb[8].mxu1 }
 0x3a2   :  { %v716_v18 = vadd.f32 %v2506_v19, %v715_v16  ;;  %v2154_v20 = vpop.f32.mrb[9].mxu1  ;;  %v1940_v34 = vmul.f32 -1.442695, %v614_v32 }
 0x3a3   :  { %v718_v21 = vpop.f32.mrb[10].mxu1  ;;  %v2258_v20 = vld [vmem:[%s2960_s4 + $0x8] sm:$0xff]  }
 0x3a4   :  { %v2155_v22 = vpop.f32.mrb[11].mxu1  ;;  %729 = vrot.lane.b32.xlu1 %v716_v18, %s2371_s29  ;;  %v721_v35 = vadd.f32 %v1942_v33, %v716_v18  ;;  %2297 = vpow2.f32 %v1940_v34  ;;  %v2257_v18 = vld [vmem:[%s2960_s4] sm:$0xff]   ;;  %v2259_v21 = vld [vmem:[%s2960_s4 + $0x10] sm:$0xff]  }
 0x3a5   :  { %v822_v7 = vpop.f32.mrb[12].mxu0  ;;  %2173 = vmatpush3.bf16.msra.mxu0 %v2257_v18  ;;  %2181 = vmatpush3.bf16.msra.mxu1 %v2259_v21  ;;  %v1978_v21 = vld [vmem:[%s2962_s0 + $0x4] sm:$0x3] }
 0x3a6   :  { %v823_v23 = vadd.f32 %v2514_v29, %v822_v7  ;;  %v2162_v8 = vpop.f32.mrb[13].mxu0  ;;  %v1952_v37 = vmul.f32 -1.442695, %v721_v35  ;;  %2174 = vmatprep.subr.bf16.mxu0 %v2369_v0  ;;  %2182 = vmatprep.subr.bf16.mxu1 %v2369_v0 }
 0x3a7   :  { %v825_v13 = vpop.f32.mrb[14].mxu0 }
 0x3a8   :  { %836 = vrot.lane.b32.xlu0 %v823_v23, %s2371_s29  ;;  %v2163_v14 = vpop.f32.mrb[15].mxu0  ;;  %v828_v38 = vadd.f32 %v1954_v36, %v823_v23  ;;  %2299 = vpow2.f32 %v1952_v37 }
 0x3a9   :  { %v929_v24 = vpop.f32.mrb[12].mxu1  ;;  %2175 = vmatpush3.bf16.msra.mxu0 %v2258_v20  ;;  %v2260_v14 = vld [vmem:[%s2960_s4 + $0x18] sm:$0xff]  }
 0x3aa   :  { %v930_v25 = vadd.f32 %v2520_v31, %v929_v24  ;;  %v2170_v26 = vpop.f32.mrb[13].mxu1  ;;  %v1964_v40 = vmul.f32 -1.442695, %v828_v38  ;;  %2188 = vmatprep.subr.bf16.mxu0 %v2369_v0  ;;  %2183 = vmatpush3.bf16.msra.mxu1 %v2260_v14  ;;  %v2009_v14 = vld [vmem:[%s2965_s3 + $0x2] sm:$0x3] }
 0x3ab   :  { %v932_v27 = vpop.f32.mrb[14].mxu1  ;;  %2196 = vmatprep.subr.bf16.mxu1 %v2369_v0 }
 0x3ac   :  { %943 = vrot.lane.b32.xlu1 %v930_v25, %s2371_s29  ;;  %v2171_v28 = vpop.f32.mrb[15].mxu1  ;;  %v935_v41 = vadd.f32 %v1966_v39, %v930_v25  ;;  %2301 = vpow2.f32 %v1964_v40 }
 0x3ae   :  { %v1976_v42 = vmul.f32 -1.442695, %v935_v41  ;;  %v2298_v43 = vpop.eup %2297 }
 0x3af   :  { %v618_v44 = vadd.f32 1.0, %v2298_v43 }
 0x3b0   :  { %2303 = vpow2.f32 %v1976_v42 }
 0x3b1   :  { %2305 = vrcp.f32 %v618_v44 }
 0x3b2   :  { %v2300_v45 = vpop.eup %2299 }
 0x3b3   :  { %v725_v46 = vadd.f32 1.0, %v2300_v45 }
 0x3b5   :  { %2307 = vrcp.f32 %v725_v46 }
 0x3b6   :  { %v2302_v47 = vpop.eup %2301 }
 0x3b7   :  { %v832_v48 = vadd.f32 1.0, %v2302_v47 }
 0x3b9   :  { %2309 = vrcp.f32 %v832_v48  ;;  %v2261_v48 = vld [vmem:[%s2960_s4 + $0x20] sm:$0xff]  }
 0x3ba   :  { %v2304_v49 = vpop.eup %2303 }
 0x3bb   :  { %v939_v50 = vadd.f32 1.0, %v2304_v49  ;;  %v2306_v51 = vpop.eup %2305 }
 0x3bc   :  { %v632_v7 = vsub.f32 1.0, %v2306_v51 }
 0x3bd   :  { %2311 = vrcp.f32 %v939_v50 }
 0x3bf   :  { %v2308_v54 = vpop.eup %2307 }
 0x3c0   :  { %v739_v25 = vsub.f32 1.0, %v2308_v54 }
 0x3c3   :  { %v2310_v58 = vpop.eup %2309 }
 0x3c7   :  { %v2671_v62 = vpop.eup %2311 }
 0x412   :  { %v623_v52 = vpop.permute.xlu0 %622 }
 0x413   :  { %v625_v53 = vmul.f32 %v2306_v51, %v623_v52  ;;  %v2262_v52 = vld [vmem:[%s2960_s4 + $0x28] sm:$0xff]  }
 0x415   :  { %627 = vrot.lane.b32.xlu0 %v625_v53, %s2371_s29  ;;  %v2263_v53 = vld [vmem:[%s2960_s4 + $0x30] sm:$0xff]  }
 0x416   :  { %v730_v55 = vpop.permute.xlu1 %729 }
 0x417   :  { %v732_v56 = vmul.f32 %v2308_v54, %v730_v55 }
 0x419   :  { %734 = vrot.lane.b32.xlu1 %v732_v56, %s2371_s29  ;;  %v2264_v56 = vld [vmem:[%s2960_s4 + $0x38] sm:$0xff]  }
 0x41a   :  { %v837_v59 = vpop.permute.xlu0 %836 }
 0x41b   :  { %v839_v60 = vmul.f32 %v2310_v58, %v837_v59 }
 0x41d   :  { %841 = vrot.lane.b32.xlu0 %v839_v60, %s2371_s29 }
 0x41e   :  { %v944_v63 = vpop.permute.xlu1 %943 }
 0x41f   :  { %v946_v1 = vmul.f32 %v2671_v62, %v944_v63 }
 0x421   :  { %948 = vrot.lane.b32.xlu1 %v946_v1, %s2371_s29 }
 0x425   :  { %639 = vrot.lane.b32.xlu1 %v2594_v57, %s2372_s21 }
 0x429   :  { %746 = vrot.lane.b32.xlu1 %v2607_v61, %s2372_s21 }
 0x42d   :  { %853 = vrot.lane.b32.xlu1 %v2626_v2, %s2372_s21 }
 0x431   :  { %960 = vrot.lane.b32.xlu1 %v2638_v5, %s2372_s21 }
 0x487   :  { %v628_v3 = vpop.permute.xlu0 %627 }
 0x488   :  { %v630_v4 = vadd.f32 %v1935_v30, %v628_v3 }
 0x48a   :  { %2313 = vtanh.f32 %v630_v4 }
 0x48b   :  { %v735_v6 = vpop.permute.xlu1 %734 }
 0x48c   :  { %v737_v9 = vadd.f32 %v1942_v33, %v735_v6  ;;  %v846_v33 = vsub.f32 1.0, %v2310_v58 }
 0x48e   :  { %2315 = vtanh.f32 %v737_v9 }
 0x48f   :  { %v842_v10 = vpop.permute.xlu0 %841 }
 0x490   :  { %v844_v11 = vadd.f32 %v1954_v36, %v842_v10 }
 0x492   :  { %2317 = vtanh.f32 %v844_v11 }
 0x493   :  { %v949_v12 = vpop.permute.xlu1 %948 }
 0x494   :  { %v2314_v57 = vpop.eup %2313  ;;  %v951_v15 = vadd.f32 %v1966_v39, %v949_v12  ;;  %v953_v39 = vsub.f32 1.0, %v2671_v62 }
 0x495   :  { %634 = vrot.lane.b32.xlu0 %v2314_v57, %s2373_s22 }
 0x496   :  { %2319 = vtanh.f32 %v951_v15 }
 0x497   :  { %v640_v16 = vpop.permute.xlu1 %639 }
 0x498   :  { %v2316_v61 = vpop.eup %2315  ;;  %v642_v8 = vmul.f32 %v2306_v51, %v640_v16 }
 0x499   :  { %741 = vrot.lane.b32.xlu0 %v2316_v61, %s2373_s22 }
 0x49b   :  { %v747_v22 = vpop.permute.xlu1 %746 }
 0x49c   :  { %v2318_v2 = vpop.eup %2317  ;;  %v749_v28 = vmul.f32 %v2308_v54, %v747_v22 }
 0x49d   :  { %848 = vrot.lane.b32.xlu0 %v2318_v2, %s2373_s22 }
 0x49f   :  { %v854_v26 = vpop.permute.xlu1 %853 }
 0x4a0   :  { %v2320_v5 = vpop.eup %2319  ;;  %v856_v35 = vmul.f32 %v2310_v58, %v854_v26 }
 0x4a1   :  { %955 = vrot.lane.b32.xlu0 %v2320_v5, %s2373_s22 }
 0x4a3   :  { %v961_v37 = vpop.permute.xlu1 %960 }
 0x4a4   :  { %v963_v41 = vmul.f32 %v2671_v62, %v961_v37 }
 0x507   :  { %v635_v23 = vpop.permute.xlu0 %634 }
 0x508   :  { %v637_v13 = vmul.f32 %v635_v23, %v632_v7 }
 0x50a   :  { %v643_v24 = vadd.f32 %v642_v8, %v637_v13 }
 0x50b   :  { %v742_v27 = vpop.permute.xlu0 %741 }
 0x50c   :  { %v744_v30 = vmul.f32 %v742_v27, %v739_v25  ;;  %645 = vrot.lane.b32.xlu0 %v643_v24, %s2373_s22 }
 0x50e   :  { %v750_v32 = vadd.f32 %v749_v28, %v744_v30 }
 0x50f   :  { %v849_v34 = vpop.permute.xlu0 %848 }
 0x510   :  { %v851_v36 = vmul.f32 %v849_v34, %v846_v33  ;;  %752 = vrot.lane.b32.xlu1 %v750_v32, %s2373_s22 }
 0x512   :  { %v857_v38 = vadd.f32 %v856_v35, %v851_v36 }
 0x513   :  { %v956_v40 = vpop.permute.xlu0 %955 }
 0x514   :  { %v958_v42 = vmul.f32 %v956_v40, %v953_v39  ;;  %859 = vrot.lane.b32.xlu0 %v857_v38, %s2373_s22 }
 0x516   :  { %v964_v43 = vadd.f32 %v963_v41, %v958_v42 }
 0x518   :  { %966 = vrot.lane.b32.xlu1 %v964_v43, %s2373_s22 }
 0x57e   :  { %v646_v44 = vpop.permute.xlu0 %645 }
 0x57f   :  { %648 = vst.msk [vmem:[#allocation2] sm:$0x3] %vm104_vm0, %v646_v44  ;;  %1941 = vst.msk [vmem:[%s2966_s6 + $0x2] sm:$0x3] %vm104_vm0, %v646_v44 }
 0x582   :  { %v753_v45 = vpop.permute.xlu1 %752 }
 0x583   :  { %755 = vst.msk [vmem:[#allocation2 + $0x2] sm:$0x3] %vm104_vm0, %v753_v45  ;;  %1953 = vst.msk [vmem:[%s2967_s7 + $0x4] sm:$0x3] %vm104_vm0, %v753_v45 }
 0x586   :  { %v860_v46 = vpop.permute.xlu0 %859  ;;  %v2719_v47 = vld [vmem:[#allocation2] sm:$0x3] }
 0x587   :  { %862 = vst.msk [vmem:[#allocation2 + $0x4] sm:$0x3] %vm104_vm0, %v860_v46  ;;  %1965 = vst.msk [vmem:[%s2968_s8 + $0x2] sm:$0x3] %vm104_vm0, %v860_v46  ;;  %v975_v49 = vpack.c.bf16 %v2719_v47, %v2719_v47 }
 0x589   :  { %2177 = vmatmul.mubr.msk.bf16.vlgmr.msra.gmra.mrb[16].mxu0 %vm135_vm2, %v975_v49 }
 0x58a   :  { %v967_v50 = vpop.permute.xlu1 %966  ;;  %2189 = vmatpush3.bf16.msra.mxu0 %v2261_v48  ;;  %v2732_v51 = vld [vmem:[#allocation2 + $0x2] sm:$0x3]  ;;  %2192 = vmatprep.mubr.msk.bf16.mxu0 %vm2370_vm1, %v2369_v0 }
 0x58b   :  { %969 = vst.msk [vmem:[#allocation2 + $0x6] sm:$0x3] %vm104_vm0, %v967_v50  ;;  %1977 = vst.msk [vmem:[%s2969_s9 + $0x4] sm:$0x3] %vm104_vm0, %v967_v50  ;;  %v1082_v54 = vpack.c.bf16 %v2732_v51, %v2732_v51  ;;  %2190 = vmatprep.subr.bf16.mxu0 %v2369_v0 }
 0x58d   :  { %2185 = vmatmul.mubr.msk.bf16.vlgmr.msra.gmra.mrb[16].mxu1 %vm135_vm2, %v1082_v54 }
 0x58e   :  { %2191 = vmatpush3.bf16.msra.mxu0 %v2262_v52  ;;  %2197 = vmatpush3.bf16.msra.mxu1 %v2263_v53  ;;  %v2751_v55 = vld [vmem:[#allocation2 + $0x4] sm:$0x3] }
 0x58f   :  { %v1189_v58 = vpack.c.bf16 %v2751_v55, %v2751_v55  ;;  %2198 = vmatprep.subr.bf16.mxu1 %v2369_v0  ;;  %2200 = vmatprep.mubr.msk.bf16.mxu1 %vm2370_vm1, %v2369_v0 }
 0x590   :  { %2204 = vmatprep.subr.bf16.mxu0 %v2369_v0 }
 0x591   :  { %2193 = vmatmul.mubr.msk.bf16.vlgmr.msra.gmra.mrb[20].mxu0 %vm135_vm2, %v1189_v58 }
 0x592   :  { %2199 = vmatpush3.bf16.msra.mxu1 %v2264_v56  ;;  %v2763_v59 = vld [vmem:[#allocation2 + $0x6] sm:$0x3]  ;;  %2208 = vmatprep.mubr.msk.bf16.mxu0 %vm2370_vm1, %v2369_v0 }
 0x593   :  { %v1296_v60 = vpack.c.bf16 %v2763_v59, %v2763_v59  ;;  %2212 = vmatprep.subr.bf16.mxu1 %v2369_v0 }
 0x595   :  { %2201 = vmatmul.mubr.msk.bf16.vlgmr.msra.gmra.mrb[20].mxu1 %vm135_vm2, %v1296_v60 }
 0x596   :  { %2216 = vmatprep.mubr.msk.bf16.mxu1 %vm2370_vm1, %v2369_v0 }
 0x65c   :  { %v1036_v62 = vpop.f32.mrb[16].mxu0 }
 0x65d   :  { %v1037_v63 = vadd.f32 %v2501_v17, %v1036_v62  ;;  %v2178_v1 = vpop.f32.mrb[17].mxu0 }
 0x65e   :  { %v1039_v3 = vpop.f32.mrb[18].mxu0  ;;  %v2265_v1 = vld [vmem:[%s2960_s4] sm:$0xff]  }
 0x65f   :  { %1050 = vrot.lane.b32.xlu0 %v1037_v63, %s2371_s29  ;;  %v2179_v4 = vpop.f32.mrb[19].mxu0  ;;  %v1042_v22 = vadd.f32 %v1978_v21, %v1037_v63  ;;  %2205 = vmatpush3.bf16.msra.mxu0 %v2265_v1  ;;  %v2266_v3 = vld [vmem:[%s2960_s4 + $0x8] sm:$0xff]  }
 0x660   :  { %v1143_v6 = vpop.f32.mrb[16].mxu1  ;;  %2206 = vmatprep.subr.bf16.mxu0 %v2369_v0  ;;  %v2267_v4 = vld [vmem:[%s2960_s4 + $0x10] sm:$0xff]  }
 0x661   :  { %v1144_v9 = vadd.f32 %v2506_v19, %v1143_v6  ;;  %v2186_v10 = vpop.f32.mrb[17].mxu1  ;;  %v1983_v7 = vmul.f32 -1.442695, %v1042_v22  ;;  %2213 = vmatpush3.bf16.msra.mxu1 %v2267_v4 }
 0x662   :  { %v1146_v11 = vpop.f32.mrb[18].mxu1  ;;  %2214 = vmatprep.subr.bf16.mxu1 %v2369_v0 }
 0x663   :  { %v2187_v12 = vpop.f32.mrb[19].mxu1  ;;  %1157 = vrot.lane.b32.xlu1 %v1144_v9, %s2371_s29  ;;  %2321 = vpow2.f32 %v1983_v7  ;;  %2207 = vmatpush3.bf16.msra.mxu0 %v2266_v3 }
 0x664   :  { %v1250_v57 = vpop.f32.mrb[20].mxu0  ;;  %2220 = vmatprep.subr.bf16.mxu0 %v2369_v0 }
 0x665   :  { %v1251_v15 = vadd.f32 %v2514_v29, %v1250_v57  ;;  %v2194_v61 = vpop.f32.mrb[21].mxu0  ;;  %v1985_v29 = vld [vmem:[%s2963_s1 + $0x2] sm:$0x3]  ;;  %v2268_v57 = vld [vmem:[%s2960_s4 + $0x18] sm:$0xff]  }
 0x666   :  { %v1253_v2 = vpop.f32.mrb[22].mxu0  ;;  %v1149_v23 = vadd.f32 %v1985_v29, %v1144_v9  ;;  %2215 = vmatpush3.bf16.msra.mxu1 %v2268_v57  ;;  %v2038_v57 = vld [vmem:[%s2964_s2 + $0x6] sm:$0x3] }
 0x667   :  { %1264 = vrot.lane.b32.xlu0 %v1251_v15, %s2371_s29  ;;  %v2195_v17 = vpop.f32.mrb[23].mxu0  ;;  %2228 = vmatprep.subr.bf16.mxu1 %v2369_v0 }
 0x668   :  { %v1357_v5 = vpop.f32.mrb[20].mxu1  ;;  %v1995_v8 = vmul.f32 -1.442695, %v1149_v23 }
 0x669   :  { %v1358_v16 = vadd.f32 %v2520_v31, %v1357_v5  ;;  %v2202_v18 = vpop.f32.mrb[21].mxu1  ;;  %v1997_v31 = vld [vmem:[%s2964_s2 + $0x4] sm:$0x3] }
 0x66a   :  { %v1360_v20 = vpop.f32.mrb[22].mxu1  ;;  %v1256_v13 = vadd.f32 %v1997_v31, %v1251_v15  ;;  %2323 = vpow2.f32 %v1995_v8 }
 0x66b   :  { %1371 = vrot.lane.b32.xlu1 %v1358_v16, %s2371_s29  ;;  %v2203_v19 = vpop.f32.mrb[23].mxu1  ;;  %v1363_v25 = vadd.f32 %v2009_v14, %v1358_v16 }
 0x66c   :  { %v2007_v24 = vmul.f32 -1.442695, %v1256_v13 }
 0x66d   :  { %v2019_v26 = vmul.f32 -1.442695, %v1363_v25  ;;  %v2322_v27 = vpop.eup %2321 }
 0x66e   :  { %2325 = vpow2.f32 %v2007_v24  ;;  %v1046_v28 = vadd.f32 1.0, %v2322_v27 }
 0x66f   :  { %2327 = vpow2.f32 %v2019_v26 }
 0x670   :  { %2329 = vrcp.f32 %v1046_v28  ;;  %v2269_v28 = vld [vmem:[%s2960_s4 + $0x20] sm:$0xff]  }
 0x674   :  { %v2324_v30 = vpop.eup %2323 }
 0x675   :  { %v1153_v32 = vadd.f32 1.0, %v2324_v30 }
 0x677   :  { %2331 = vrcp.f32 %v1153_v32 }
 0x678   :  { %v2326_v33 = vpop.eup %2325 }
 0x679   :  { %v1260_v34 = vadd.f32 1.0, %v2326_v33  ;;  %v2328_v35 = vpop.eup %2327 }
 0x67a   :  { %v1367_v36 = vadd.f32 1.0, %v2328_v35  ;;  %v2330_v37 = vpop.eup %2329  ;;  %v2271_v35 = vld [vmem:[%s2960_s4 + $0x30] sm:$0xff]  }
 0x67b   :  { %2333 = vrcp.f32 %v1260_v34  ;;  %v1060_v9 = vsub.f32 1.0, %v2330_v37  ;;  %v2270_v34 = vld [vmem:[%s2960_s4 + $0x28] sm:$0xff]  }
 0x67c   :  { %2335 = vrcp.f32 %v1367_v36 }
 0x681   :  { %v2332_v40 = vpop.eup %2331 }
 0x682   :  { %v1167_v61 = vsub.f32 1.0, %v2332_v40 }
 0x685   :  { %v2334_v43 = vpop.eup %2333 }
 0x686   :  { %v2796_v46 = vpop.eup %2335  ;;  %v1274_v20 = vsub.f32 1.0, %v2334_v43 }
 0x687   :  { %v1381_v23 = vsub.f32 1.0, %v2796_v46 }
 0x6d1   :  { %v1051_v38 = vpop.permute.xlu0 %1050 }
 0x6d2   :  { %v1053_v39 = vmul.f32 %v2330_v37, %v1051_v38  ;;  %v2272_v38 = vld [vmem:[%s2960_s4 + $0x38] sm:$0xff]  }
 0x6d4   :  { %1055 = vrot.lane.b32.xlu0 %v1053_v39, %s2371_s29 }
 0x6d5   :  { %v1158_v41 = vpop.permute.xlu1 %1157 }
 0x6d6   :  { %v1160_v42 = vmul.f32 %v2332_v40, %v1158_v41 }
 0x6d8   :  { %1162 = vrot.lane.b32.xlu1 %v1160_v42, %s2371_s29  ;;  %v2022_v42 = vld [vmem:[%s2961_s5] ss:$0 sm:$0xff] }
 0x6d9   :  { %v1265_v44 = vpop.permute.xlu0 %1264 }
 0x6da   :  { %v1267_v45 = vmul.f32 %v2334_v43, %v1265_v44 }
 0x6dc   :  { %1269 = vrot.lane.b32.xlu0 %v1267_v45, %s2371_s29 }
 0x6dd   :  { %v1372_v48 = vpop.permute.xlu1 %1371 }
 0x6de   :  { %v1374_v49 = vmul.f32 %v2796_v46, %v1372_v48 }
 0x6e0   :  { %1376 = vrot.lane.b32.xlu1 %v1374_v49, %s2371_s29 }
 0x6e4   :  { %1067 = vrot.lane.b32.xlu1 %v2719_v47, %s2372_s21 }
 0x6e8   :  { %1174 = vrot.lane.b32.xlu1 %v2732_v51, %s2372_s21 }
 0x6ec   :  { %1281 = vrot.lane.b32.xlu1 %v2751_v55, %s2372_s21 }
 0x6f0   :  { %1388 = vrot.lane.b32.xlu1 %v2763_v59, %s2372_s21 }
 0x746   :  { %v1056_v50 = vpop.permute.xlu0 %1055 }
 0x747   :  { %v1058_v52 = vadd.f32 %v1978_v21, %v1056_v50 }
 0x749   :  { %2337 = vtanh.f32 %v1058_v52 }
 0x74a   :  { %v1163_v53 = vpop.permute.xlu1 %1162 }
 0x74b   :  { %v1165_v54 = vadd.f32 %v1985_v29, %v1163_v53 }
 0x74d   :  { %2339 = vtanh.f32 %v1165_v54  ;;  %v2044_v54 = vld [vmem:[%s2961_s5 + $0x2] ss:$0 sm:$0xff] }
 0x74e   :  { %v1270_v56 = vpop.permute.xlu0 %1269 }
 0x74f   :  { %v1272_v58 = vadd.f32 %v1997_v31, %v1270_v56 }
 0x751   :  { %2341 = vtanh.f32 %v1272_v58 }
 0x752   :  { %v1377_v60 = vpop.permute.xlu1 %1376 }
 0x753   :  { %v2338_v47 = vpop.eup %2337  ;;  %v1379_v62 = vadd.f32 %v2009_v14, %v1377_v60 }
 0x754   :  { %1062 = vrot.lane.b32.xlu0 %v2338_v47, %s2373_s22 }
 0x755   :  { %2343 = vtanh.f32 %v1379_v62 }
 0x756   :  { %v1068_v63 = vpop.permute.xlu1 %1067 }
 0x757   :  { %v2340_v51 = vpop.eup %2339  ;;  %v1070_v11 = vmul.f32 %v2330_v37, %v1068_v63 }
 0x758   :  { %1169 = vrot.lane.b32.xlu0 %v2340_v51, %s2373_s22  ;;  %v2055_v51 = vld [vmem:[%s2961_s5 + $0x3] ss:$0 sm:$0xff] }
 0x75a   :  { %v1175_v6 = vpop.permute.xlu1 %1174 }
 0x75b   :  { %v2342_v55 = vpop.eup %2341  ;;  %v1177_v5 = vmul.f32 %v2332_v40, %v1175_v6  ;;  %v2021_v6 = vld [vmem:[%s2962_s0 + $0x6] sm:$0x3] }
 0x75c   :  { %1276 = vrot.lane.b32.xlu0 %v2342_v55, %s2373_s22 }
 0x75e   :  { %v1282_v2 = vpop.permute.xlu1 %1281 }
 0x75f   :  { %v2344_v59 = vpop.eup %2343  ;;  %v1284_v21 = vmul.f32 %v2334_v43, %v1282_v2  ;;  %v1719_v2 = vld [vmem:[%s2965_s3] sm:$0x3] }
 0x760   :  { %1383 = vrot.lane.b32.xlu0 %v2344_v59, %s2373_s22 }
 0x762   :  { %v1389_v29 = vpop.permute.xlu1 %1388 }
 0x763   :  { %v1391_v8 = vmul.f32 %v2796_v46, %v1389_v29 }
 0x7c6   :  { %v1063_v10 = vpop.permute.xlu0 %1062 }
 0x7c7   :  { %v1065_v12 = vmul.f32 %v1063_v10, %v1060_v9  ;;  %v1507_v10 = vld [vmem:[%s2963_s1] sm:$0x3] }
 0x7c9   :  { %v1071_v15 = vadd.f32 %v1070_v11, %v1065_v12 }
 0x7ca   :  { %v1170_v17 = vpop.permute.xlu0 %1169 }
 0x7cb   :  { %v1172_v16 = vmul.f32 %v1170_v17, %v1167_v61  ;;  %1073 = vrot.lane.b32.xlu0 %v1071_v15, %s2373_s22 }
 0x7cd   :  { %v1178_v18 = vadd.f32 %v1177_v5, %v1172_v16 }
 0x7ce   :  { %v1277_v19 = vpop.permute.xlu0 %1276 }
 0x7cf   :  { %v1279_v22 = vmul.f32 %v1277_v19, %v1274_v20  ;;  %1180 = vrot.lane.b32.xlu1 %v1178_v18, %s2373_s22 }
 0x7d1   :  { %v1285_v7 = vadd.f32 %v1284_v21, %v1279_v22 }
 0x7d2   :  { %v1384_v31 = vpop.permute.xlu0 %1383 }
 0x7d3   :  { %v1386_v13 = vmul.f32 %v1384_v31, %v1381_v23  ;;  %1287 = vrot.lane.b32.xlu0 %v1285_v7, %s2373_s22 }
 0x7d5   :  { %v1392_v14 = vadd.f32 %v1391_v8, %v1386_v13 }
 0x7d7   :  { %1394 = vrot.lane.b32.xlu1 %v1392_v14, %s2373_s22 }
 0x83d   :  { %v1074_v24 = vpop.permute.xlu0 %1073 }
 0x83e   :  { %1076 = vst.msk [vmem:[#allocation2] sm:$0x3] %vm104_vm0, %v1074_v24  ;;  %1984 = vst.msk [vmem:[%s2966_s6 + $0x4] sm:$0x3] %vm104_vm0, %v1074_v24 }
 0x841   :  { %v1181_v25 = vpop.permute.xlu1 %1180 }
 0x842   :  { %1183 = vst.msk [vmem:[#allocation2 + $0x2] sm:$0x3] %vm104_vm0, %v1181_v25  ;;  %1996 = vst.msk [vmem:[%s2967_s7 + $0x2] sm:$0x3] %vm104_vm0, %v1181_v25 }
 0x845   :  { %v1288_v26 = vpop.permute.xlu0 %1287  ;;  %v2844_v27 = vld [vmem:[#allocation2] sm:$0x3] }
 0x846   :  { %1290 = vst.msk [vmem:[#allocation2 + $0x4] sm:$0x3] %vm104_vm0, %v1288_v26  ;;  %2008 = vst.msk [vmem:[%s2968_s8 + $0x4] sm:$0x3] %vm104_vm0, %v1288_v26  ;;  %v1403_v30 = vpack.c.bf16 %v2844_v27, %v2844_v27 }
 0x848   :  { %2209 = vmatmul.mubr.msk.bf16.vlgmr.msra.gmra.mrb[24].mxu0 %vm135_vm2, %v1403_v30 }
 0x849   :  { %v1395_v32 = vpop.permute.xlu1 %1394  ;;  %2221 = vmatpush3.bf16.msra.mxu0 %v2269_v28  ;;  %v2857_v33 = vld [vmem:[#allocation2 + $0x2] sm:$0x3]  ;;  %2224 = vmatprep.mubr.msk.bf16.mxu0 %vm2370_vm1, %v2369_v0 }
 0x84a   :  { %1397 = vst.msk [vmem:[#allocation2 + $0x6] sm:$0x3] %vm104_vm0, %v1395_v32  ;;  %2020 = vst.msk [vmem:[%s2969_s9 + $0x2] sm:$0x3] %vm104_vm0, %v1395_v32  ;;  %v1509_v36 = vpack.c.bf16 %v2857_v33, %v2857_v33  ;;  %2222 = vmatprep.subr.bf16.mxu0 %v2369_v0 }
 0x84c   :  { %2217 = vmatmul.mubr.msk.bf16.vlgmr.msra.gmra.mrb[24].mxu1 %vm135_vm2, %v1509_v36 }
 0x84d   :  { %2223 = vmatpush3.bf16.msra.mxu0 %v2270_v34  ;;  %2229 = vmatpush3.bf16.msra.mxu1 %v2271_v35  ;;  %v2876_v37 = vld [vmem:[#allocation2 + $0x4] sm:$0x3] }
 0x84e   :  { %v1615_v39 = vpack.c.bf16 %v2876_v37, %v2876_v37  ;;  %2230 = vmatprep.subr.bf16.mxu1 %v2369_v0  ;;  %2232 = vmatprep.mubr.msk.bf16.mxu1 %vm2370_vm1, %v2369_v0  ;;  %v2033_v0 = vld [vmem:[%s2961_s5 + $0x1] ss:$0 sm:$0xff] }
 0x850   :  { %2225 = vmatmul.mubr.msk.bf16.vlgmr.msra.gmra.mrb[28].mxu0 %vm135_vm2, %v1615_v39 }
 0x851   :  { %2231 = vmatpush3.bf16.msra.mxu1 %v2272_v38  ;;  %v2887_v40 = vld [vmem:[#allocation2 + $0x6] sm:$0x3] }
 0x852   :  { %v1721_v41 = vpack.c.bf16 %v2887_v40, %v2887_v40 }
 0x854   :  { %2233 = vmatmul.mubr.msk.bf16.vlgmr.msra.gmra.mrb[28].mxu1 %vm135_vm2, %v1721_v41 }
 0x91b   :  { %v1464_v43 = vpop.f32.mrb[24].mxu0 }
 0x91c   :  { %v1465_v44 = vadd.f32 %v2022_v42, %v1464_v43  ;;  %v2210_v45 = vpop.f32.mrb[25].mxu0 }
 0x91d   :  { %v1467_v46 = vpop.f32.mrb[26].mxu0 }
 0x91e   :  { %1478 = vrot.lane.b32.xlu0 %v1465_v44, %s2371_s29  ;;  %v2211_v48 = vpop.f32.mrb[27].mxu0  ;;  %v1470_v9 = vadd.f32 %v2021_v6, %v1465_v44 }
 0x91f   :  { %v1570_v49 = vpop.f32.mrb[24].mxu1 }
 0x920   :  { %v1571_v50 = vadd.f32 %v2033_v0, %v1570_v49  ;;  %v2218_v52 = vpop.f32.mrb[25].mxu1  ;;  %v2026_v11 = vmul.f32 -1.442695, %v1470_v9 }
 0x921   :  { %v1573_v53 = vpop.f32.mrb[26].mxu1 }
 0x922   :  { %v2219_v56 = vpop.f32.mrb[27].mxu1  ;;  %1584 = vrot.lane.b32.xlu1 %v1571_v50, %s2371_s29  ;;  %v1576_v12 = vadd.f32 %v1571_v50, %v1507_v10  ;;  %2345 = vpow2.f32 %v2026_v11 }
 0x923   :  { %v1676_v58 = vpop.f32.mrb[28].mxu0 }
 0x924   :  { %v1677_v60 = vadd.f32 %v2044_v54, %v1676_v58  ;;  %v2226_v47 = vpop.f32.mrb[29].mxu0  ;;  %v2037_v15 = vmul.f32 -1.442695, %v1576_v12 }
 0x925   :  { %v1679_v62 = vpop.f32.mrb[30].mxu0 }
 0x926   :  { %1690 = vrot.lane.b32.xlu0 %v1677_v60, %s2371_s29  ;;  %v2227_v55 = vpop.f32.mrb[31].mxu0  ;;  %v1682_v61 = vadd.f32 %v2038_v57, %v1677_v60  ;;  %2347 = vpow2.f32 %v2037_v15 }
 0x927   :  { %v1782_v59 = vpop.f32.mrb[28].mxu1 }
 0x928   :  { %v1783_v63 = vadd.f32 %v2055_v51, %v1782_v59  ;;  %v2234_v1 = vpop.f32.mrb[29].mxu1  ;;  %v2048_v17 = vmul.f32 -1.442695, %v1682_v61 }
 0x929   :  { %v1785_v3 = vpop.f32.mrb[30].mxu1 }
 0x92a   :  { %1796 = vrot.lane.b32.xlu1 %v1783_v63, %s2371_s29  ;;  %v2235_v4 = vpop.f32.mrb[31].mxu1  ;;  %v1788_v5 = vadd.f32 %v1783_v63, %v1719_v2  ;;  %2349 = vpow2.f32 %v2048_v17 }
 0x92c   :  { %v2059_v16 = vmul.f32 -1.442695, %v1788_v5  ;;  %v2346_v18 = vpop.eup %2345 }
 0x92d   :  { %v1474_v20 = vadd.f32 1.0, %v2346_v18 }
 0x92e   :  { %2351 = vpow2.f32 %v2059_v16 }
 0x92f   :  { %2353 = vrcp.f32 %v1474_v20 }
 0x930   :  { %v2348_v19 = vpop.eup %2347 }
 0x931   :  { %v1580_v21 = vadd.f32 1.0, %v2348_v19 }
 0x933   :  { %2355 = vrcp.f32 %v1580_v21 }
 0x934   :  { %v2350_v22 = vpop.eup %2349 }
 0x935   :  { %v1686_v29 = vadd.f32 1.0, %v2350_v22 }
 0x937   :  { %2357 = vrcp.f32 %v1686_v29 }
 0x938   :  { %v2352_v7 = vpop.eup %2351 }
 0x939   :  { %v1792_v23 = vadd.f32 1.0, %v2352_v7  ;;  %v2354_v31 = vpop.eup %2353 }
 0x93a   :  { %v1488_v48 = vsub.f32 1.0, %v2354_v31 }
 0x93b   :  { %2359 = vrcp.f32 %v1792_v23 }
 0x93d   :  { %v2356_v14 = vpop.eup %2355 }
 0x93e   :  { %v1594_v54 = vsub.f32 1.0, %v2356_v14 }
 0x941   :  { %v2358_v26 = vpop.eup %2357 }
 0x942   :  { %v1700_v51 = vsub.f32 1.0, %v2358_v26 }
 0x945   :  { %v2360_v32 = vpop.eup %2359 }
 0x946   :  { %v1806_v4 = vsub.f32 1.0, %v2360_v32 }
 0x990   :  { %v1479_v8 = vpop.permute.xlu0 %1478 }
 0x991   :  { %v1481_v13 = vmul.f32 %v2354_v31, %v1479_v8 }
 0x993   :  { %1483 = vrot.lane.b32.xlu0 %v1481_v13, %s2371_s29 }
 0x994   :  { %v1585_v24 = vpop.permute.xlu1 %1584 }
 0x995   :  { %v1587_v25 = vmul.f32 %v2356_v14, %v1585_v24 }
 0x997   :  { %1589 = vrot.lane.b32.xlu1 %v1587_v25, %s2371_s29 }
 0x998   :  { %v1691_v28 = vpop.permute.xlu0 %1690 }
 0x999   :  { %v1693_v30 = vmul.f32 %v2358_v26, %v1691_v28 }
 0x99b   :  { %1695 = vrot.lane.b32.xlu0 %v1693_v30, %s2371_s29 }
 0x99c   :  { %v1797_v34 = vpop.permute.xlu1 %1796 }
 0x99d   :  { %v1799_v35 = vmul.f32 %v2360_v32, %v1797_v34 }
 0x99f   :  { %1801 = vrot.lane.b32.xlu1 %v1799_v35, %s2371_s29 }
 0x9a3   :  { %1495 = vrot.lane.b32.xlu1 %v2844_v27, %s2372_s21 }
 0x9a7   :  { %1601 = vrot.lane.b32.xlu1 %v2857_v33, %s2372_s21 }
 0x9ab   :  { %1707 = vrot.lane.b32.xlu1 %v2876_v37, %s2372_s21 }
 0x9af   :  { %1813 = vrot.lane.b32.xlu1 %v2887_v40, %s2372_s21 }
 0xa05   :  { %v1484_v36 = vpop.permute.xlu0 %1483 }
 0xa06   :  { %v1486_v38 = vadd.f32 %v2021_v6, %v1484_v36 }
 0xa08   :  { %2361 = vtanh.f32 %v1486_v38 }
 0xa09   :  { %v1590_v39 = vpop.permute.xlu1 %1589 }
 0xa0a   :  { %v1592_v41 = vadd.f32 %v1590_v39, %v1507_v10 }
 0xa0c   :  { %2363 = vtanh.f32 %v1592_v41 }
 0xa0d   :  { %v1696_v42 = vpop.permute.xlu0 %1695 }
 0xa0e   :  { %v1698_v43 = vadd.f32 %v2038_v57, %v1696_v42 }
 0xa10   :  { %2365 = vtanh.f32 %v1698_v43 }
 0xa11   :  { %v1802_v44 = vpop.permute.xlu1 %1801 }
 0xa12   :  { %v2362_v27 = vpop.eup %2361  ;;  %v1804_v45 = vadd.f32 %v1802_v44, %v1719_v2 }
 0xa13   :  { %1490 = vrot.lane.b32.xlu0 %v2362_v27, %s2373_s22 }
 0xa14   :  { %2367 = vtanh.f32 %v1804_v45 }
 0xa15   :  { %v1496_v46 = vpop.permute.xlu1 %1495 }
 0xa16   :  { %v2364_v33 = vpop.eup %2363  ;;  %v1498_v50 = vmul.f32 %v2354_v31, %v1496_v46 }
 0xa17   :  { %1596 = vrot.lane.b32.xlu0 %v2364_v33, %s2373_s22 }
 0xa19   :  { %v1602_v0 = vpop.permute.xlu1 %1601 }
 0xa1a   :  { %v2366_v37 = vpop.eup %2365  ;;  %v1604_v60 = vmul.f32 %v2356_v14, %v1602_v0 }
 0xa1b   :  { %1702 = vrot.lane.b32.xlu0 %v2366_v37, %s2373_s22 }
 0xa1d   :  { %v1708_v56 = vpop.permute.xlu1 %1707 }
 0xa1e   :  { %v2368_v40 = vpop.eup %2367  ;;  %v1710_v59 = vmul.f32 %v2358_v26, %v1708_v56 }
 0xa1f   :  { %1808 = vrot.lane.b32.xlu0 %v2368_v40, %s2373_s22 }
 0xa21   :  { %v1814_v1 = vpop.permute.xlu1 %1813 }
 0xa22   :  { %v1816_v9 = vmul.f32 %v2360_v32, %v1814_v1 }
 0xa85   :  { %v1491_v49 = vpop.permute.xlu0 %1490 }
 0xa86   :  { %v1493_v52 = vmul.f32 %v1491_v49, %v1488_v48 }
 0xa88   :  { %v1499_v53 = vadd.f32 %v1498_v50, %v1493_v52 }
 0xa89   :  { %v1597_v58 = vpop.permute.xlu0 %1596 }
 0xa8a   :  { %v1599_v47 = vmul.f32 %v1597_v58, %v1594_v54  ;;  %1501 = vrot.lane.b32.xlu0 %v1499_v53, %s2373_s22 }
 0xa8c   :  { %v1605_v62 = vadd.f32 %v1604_v60, %v1599_v47 }
 0xa8d   :  { %v1703_v55 = vpop.permute.xlu0 %1702 }
 0xa8e   :  { %v1705_v63 = vmul.f32 %v1703_v55, %v1700_v51  ;;  %1607 = vrot.lane.b32.xlu1 %v1605_v62, %s2373_s22 }
 0xa90   :  { %v1711_v3 = vadd.f32 %v1710_v59, %v1705_v63 }
 0xa91   :  { %v1809_v6 = vpop.permute.xlu0 %1808 }
 0xa92   :  { %v1811_v10 = vmul.f32 %v1809_v6, %v1806_v4  ;;  %1713 = vrot.lane.b32.xlu0 %v1711_v3, %s2373_s22 }
 0xa94   :  { %v1817_v11 = vadd.f32 %v1816_v9, %v1811_v10 }
 0xa96   :  { %1819 = vrot.lane.b32.xlu1 %v1817_v11, %s2373_s22 }
 0xafc   :  { %v1502_v12 = vpop.permute.xlu0 %1501 }
 0xafd   :  { %1504 = vst.msk [vmem:[#allocation2] sm:$0x3] %vm104_vm0, %v1502_v12  ;;  %2027 = vst.msk [vmem:[%s2966_s6 + $0x6] sm:$0x3] %vm104_vm0, %v1502_v12 }
 0xb00   :  { %v1608_v57 = vpop.permute.xlu1 %1607 }
 0xb01   :  { %1610 = vst.msk [vmem:[#allocation2 + $0x2] sm:$0x3] %vm104_vm0, %v1608_v57  ;;  %1611 = vst.msk [vmem:[%s2967_s7] sm:$0x3] %vm104_vm0, %v1608_v57 }
 0xb04   :  { %v1714_v15 = vpop.permute.xlu0 %1713 }
 0xb05   :  { %1716 = vst.msk [vmem:[#allocation2 + $0x4] sm:$0x3] %vm104_vm0, %v1714_v15  ;;  %2049 = vst.msk [vmem:[%s2968_s8 + $0x6] sm:$0x3] %vm104_vm0, %v1714_v15 }
 0xb08   :  { %v1820_v61 = vpop.permute.xlu1 %1819 }
 0xb09   :  { %1822 = vst.msk [vmem:[#allocation2 + $0x6] sm:$0x3] %vm104_vm0, %v1820_v61  ;;  %1823 = vst.msk [vmem:[%s2969_s9] sm:$0x3] %vm104_vm0, %v1820_v61 }

</bundles_post_ra>
